<compile_context>
chip_gen: v7x
topology: tpu7x:2x2x1
jax: 0.10.0
libtpu: 0.0.40
codegen_flags: <defaults>
</compile_context>

<pallas_src>
import math
from functools import partial

import jax
import jax.numpy as jnp
from jax.experimental import pallas as pl
from jax.experimental.pallas import tpu as pltpu


# ----------------------------------------------------------------------------- kernels
def _conv_tap_kernel(x_ref, w_ref, b_ref, *rest, K, stride, Ho, Wo, act, res_scale):
    """Direct convolution for one batch element: in-kernel tap reduction (no im2col).

    x_ref : (1, stride*stride, Hq, Wq, Cin) f32   parity view of the zero-padded input
    w_ref : (K*K, Cin, Cout) bf16
    b_ref : (1, Cout) f32
    rest  : ([res_ref (1, Ho, Wo, Cout) f32], o_ref (1, Ho, Wo, Cout) f32)
    """
    if res_scale is None:
        (o_ref,) = rest
        res_ref = None
    else:
        res_ref, o_ref = rest
    Cin = x_ref.shape[-1]
    Cout = o_ref.shape[-1]

    acc = jnp.zeros((Ho * Wo, Cout), jnp.float32)
    for t in range(K * K):                           # statically-unrolled tap reduction
        i, j = t // K, t % K
        par = (i % stride) * stride + (j % stride)   # which parity sub-image
        oi, oj = i // stride, j // stride            # static window offset inside it
        win = x_ref[0, par, oi:oi + Ho, oj:oj + Wo, :]          # (Ho, Wo, Cin) f32
        win = win.reshape(Ho * Wo, Cin).astype(jnp.bfloat16)    # tile-aligned collapse
        acc = acc + jnp.dot(win, w_ref[t], preferred_element_type=jnp.float32)

    acc = acc + b_ref[...]                           # f32 epilogue
    if act == "lrelu":
        acc = jnp.where(acc > 0, acc, 0.2 * acc)
    elif act == "sigmoid":
        acc = jax.nn.sigmoid(acc)
    if res_scale is not None:                        # fused "0.2 * x + h" residual
        acc = acc + res_scale * res_ref[0].reshape(Ho * Wo, Cout)
    o_ref[0] = acc.reshape(Ho, Wo, Cout).astype(o_ref.dtype)


def _ca_residual_kernel(x_ref, f_ref, w1_ref, b1_ref, w2_ref, b2_ref, o_ref):
    """out = x + sigmoid(relu(avgpool(f) @ w1 + b1) @ w2 + b2) * f    (per batch element)."""
    f = f_ref[0]                                     # (M, C) f32
    pooled = jnp.mean(f, axis=0, keepdims=True)      # (1, C)  == AdaptiveAvgPool2d((1,1))
    h = jnp.dot(pooled, w1_ref[...], preferred_element_type=jnp.float32) + b1_ref[...]
    h = jnp.maximum(h, 0.0)                          # ReLU
    s = jnp.dot(h, w2_ref[...], preferred_element_type=jnp.float32) + b2_ref[...]
    s = jax.nn.sigmoid(s)                            # (1, C)
    o_ref[0] = (x_ref[0] + s * f).astype(o_ref.dtype)


# ----------------------------------------------------------------------------- wrappers
def conv2d(x, w, b, *, stride=1, padding=1, act="none", residual=None, res_scale=None):
    """x: (B, H, W, Cin) f32 NHWC, w: (K*K, Cin, Cout) bf16, b: (Cout,) f32."""
    B, H, W, Cin = x.shape
    KK, Cin_w, Cout = w.shape
    assert Cin_w == Cin
    K = int(round(KK ** 0.5))

    Ho = (H + 2 * padding - K) // stride + 1
    Wo = (W + 2 * padding - K) // stride + 1
    # parity view: x_view[b, p*stride+q, hh, ww, c] = x_pad[b, hh*stride+p, ww*stride+q, c]
    Hq = (K - 1) // stride + Ho
    Wq = (K - 1) // stride + Wo
    Ht, Wt = Hq * stride, Wq * stride
    xp = jnp.pad(x, ((0, 0),
                     (padding, max(Ht - H - padding, 0)),
                     (padding, max(Wt - W - padding, 0)),
                     (0, 0)))[:, :Ht, :Wt, :]
    xv = jnp.transpose(xp.reshape(B, Hq, stride, Wq, stride, Cin),
                       (0, 2, 4, 1, 3, 5)).reshape(B, stride * stride, Hq, Wq, Cin)
    bias = b.reshape(1, Cout).astype(jnp.float32)

    in_specs = [
        pl.BlockSpec((1, stride * stride, Hq, Wq, Cin), lambda bb: (bb, 0, 0, 0, 0)),
        pl.BlockSpec((KK, Cin, Cout), lambda bb: (0, 0, 0)),
        pl.BlockSpec((1, Cout), lambda bb: (0, 0)),
    ]
    args = [xv, w, bias]
    if residual is not None:
        in_specs.append(pl.BlockSpec((1, Ho, Wo, Cout), lambda bb: (bb, 0, 0, 0)))
        args.append(residual)

    out = pl.pallas_call(
        partial(_conv_tap_kernel, K=K, stride=stride, Ho=Ho, Wo=Wo, act=act,
                res_scale=(res_scale if residual is not None else None)),
        out_shape=jax.ShapeDtypeStruct((B, Ho, Wo, Cout), jnp.float32),
        grid=(B,),
        in_specs=in_specs,
        out_specs=pl.BlockSpec((1, Ho, Wo, Cout), lambda bb: (bb, 0, 0, 0)),
        compiler_params=pltpu.CompilerParams(dimension_semantics=("parallel",)),
    )(*args)
    return out


def ca_residual(x, f, w1, b1, w2, b2):
    B, H, W, C = x.shape
    M = H * W
    Cm = w1.shape[-1]
    out = pl.pallas_call(
        _ca_residual_kernel,
        out_shape=jax.ShapeDtypeStruct((B, M, C), jnp.float32),
        grid=(B,),
        in_specs=[
            pl.BlockSpec((1, M, C), lambda bb: (bb, 0, 0)),
            pl.BlockSpec((1, M, C), lambda bb: (bb, 0, 0)),
            pl.BlockSpec((C, Cm), lambda bb: (0, 0)),
            pl.BlockSpec((1, Cm), lambda bb: (0, 0)),
            pl.BlockSpec((Cm, C), lambda bb: (0, 0)),
            pl.BlockSpec((1, C), lambda bb: (0, 0)),
        ],
        out_specs=pl.BlockSpec((1, M, C), lambda bb: (bb, 0, 0)),
        compiler_params=pltpu.CompilerParams(dimension_semantics=("parallel",)),
    )(x.reshape(B, M, C), f.reshape(B, M, C),
      w1, b1.reshape(1, Cm), w2, b2.reshape(1, C))
    return out.reshape(B, H, W, C)


def upsample2x(x):  # nn.Upsample(scale_factor=2, mode='nearest') -- tiny tensor, glue
    return jnp.repeat(jnp.repeat(x, 2, axis=1), 2, axis=2)


# ----------------------------------------------------------------------------- params
def _conv_init(key, cin, cout, k):
    kw, kb = jax.random.split(key)
    std = 1.0 / math.sqrt(cin * k * k)
    w = jax.random.normal(kw, (k, k, cin, cout), jnp.float32) * std
    b = jax.random.uniform(kb, (cout,), jnp.float32, minval=-std, maxval=std)
    # weights stored bf16 for the MXU; tap-major layout (i*K+j, cin, cout)
    return {"w": w.reshape(k * k, cin, cout).astype(jnp.bfloat16), "b": b}


def _linear_init(key, cin, cout):  # 1x1 conv of the channel-attention branch (kept f32)
    kw, kb = jax.random.split(key)
    std = 1.0 / math.sqrt(cin)
    return {"w": jax.random.normal(kw, (cin, cout), jnp.float32) * std,
            "b": jax.random.uniform(kb, (cout,), jnp.float32, minval=-std, maxval=std)}


def init_background_encoder(key, dim=32):
    ks = jax.random.split(key, 10)
    res = []
    for r in range(3):  # ResBlocks(3, 32, norm='none')
        res.append({"c1": _conv_init(ks[1 + 2 * r], dim, dim // 2, 3),
                    "c2": _conv_init(ks[2 + 2 * r], dim // 2, dim, 3)})
    return {
        "head": _conv_init(ks[0], 3, dim, 3),          # Conv2dBlock(3, 32, 3, s=2, p=1)
        "res": res,
        "ca1": _linear_init(ks[7], dim, dim // 16),    # Conv2d(32, 2, 1)
        "ca2": _linear_init(ks[8], dim // 16, dim),    # Conv2d(2, 32, 1)
        "tail": _conv_init(ks[9], dim, 3, 3),          # Conv2dBlock(32, 3, 3, s=1, p=1)
    }


# ----------------------------------------------------------------------------- forward
def background_encoder_fwd(p, x):
    """x: (B, H, W, 4) NHWC f32 (rgb + mask). Returns (B, H, W, 3) in (0, 1)."""
    img, mask = x[..., :3], x[..., 3:4]
    bg = img * (1.0 - mask)                                         # mask out foreground

    y = conv2d(bg, p["head"]["w"], p["head"]["b"], stride=2, padding=1, act="none")
    out = y
    for rp in p["res"]:                                             # 3 x ResBlock(32)
        h = conv2d(out, rp["c1"]["w"], rp["c1"]["b"], stride=1, padding=1, act="lrelu")
        out = conv2d(h, rp["c2"]["w"], rp["c2"]["b"], stride=1, padding=1, act="none",
                     residual=out, res_scale=0.2)                   # fused 0.2*x + h
    y = ca_residual(y, out, p["ca1"]["w"], p["ca1"]["b"], p["ca2"]["w"], p["ca2"]["b"])
    y = upsample2x(y)                                               # Dropout2d(0.0) = id
    y = conv2d(y, p["tail"]["w"], p["tail"]["b"], stride=1, padding=1, act="sigmoid")
    return y


# ----------------------------------------------------------------------------- main
if __name__ == "__main__":
    key = jax.random.PRNGKey(0)
    kp, kx = jax.random.split(key)
    params = init_background_encoder(kp, dim=32)

    B, H, W = 2, 16, 16
    x = jax.random.uniform(kx, (B, 4, H, W), jnp.float32)   # NCHW: rgb (3) + mask (1)

    def fwd(xin):
        xh = jnp.transpose(xin, (0, 2, 3, 1))                # NCHW -> NHWC
        y = background_encoder_fwd(params, xh)
        return jnp.transpose(y, (0, 3, 1, 2))                # back to NCHW

    out = jax.block_until_ready(jax.jit(fwd)(x))
    assert out.shape == (B, 3, H, W), out.shape
    assert bool(jnp.all(jnp.isfinite(out)))
    assert bool(jnp.all(out >= 0.0)) and bool(jnp.all(out <= 1.0))  # Sigmoid range
    print("KERNEL_OK")
</pallas_src>

<mosaic_0001>
module attributes {stable_mosaic.version = 11 : i64} {
  func.func @_conv_tap_kernel(%arg0: i32, %arg1: memref<1x4x9x9x3xf32, #tpu.memory_space<vmem>>, %arg2: memref<9x3x32xbf16, #tpu.memory_space<vmem>>, %arg3: memref<1x32xf32, #tpu.memory_space<vmem>>, %arg4: memref<1x8x8x32xf32, #tpu.memory_space<vmem>>) attributes {dimension_semantics = [#tpu.dimension_semantics<parallel>], iteration_bounds = array<i64: 2>, scalar_prefetch = 0 : i64, scratch_operands = 0 : i64, tpu.core_type = #tpu.core_type<tc>, window_params = [{transform_indices = @transform_0, window_bounds = array<i64: 1, 4, 9, 9, 3>}, {pipeline_mode = #tpu.pipeline_mode<synchronous>, transform_indices = @transform_1, window_bounds = array<i64: 9, 3, 32>}, {pipeline_mode = #tpu.pipeline_mode<synchronous>, transform_indices = @transform_2, window_bounds = array<i64: 1, 32>}, {transform_indices = @transform_3, window_bounds = array<i64: 1, 8, 8, 32>}]} {
    %cst = arith.constant 0.000000e+00 : f32
    %0 = vector.broadcast %cst : f32 to vector<64x32xf32>
    %c0 = arith.constant 0 : index
    %c0_0 = arith.constant 0 : index
    %c0_1 = arith.constant 0 : index
    %c0_2 = arith.constant 0 : index
    %c0_3 = arith.constant 0 : index
    %1 = vector.load %arg1[%c0, %c0_0, %c0_1, %c0_2, %c0_3] : memref<1x4x9x9x3xf32, #tpu.memory_space<vmem>>, vector<1x1x8x8x3xf32>
    %2 = vector.shape_cast %1 : vector<1x1x8x8x3xf32> to vector<8x8x3xf32>
    %3 = vector.shape_cast %2 : vector<8x8x3xf32> to vector<64x3xf32>
    %4 = arith.truncf %3 : vector<64x3xf32> to vector<64x3xbf16>
    %c0_4 = arith.constant 0 : index
    %c0_5 = arith.constant 0 : index
    %c0_6 = arith.constant 0 : index
    %5 = vector.load %arg2[%c0_4, %c0_5, %c0_6] : memref<9x3x32xbf16, #tpu.memory_space<vmem>>, vector<1x3x32xbf16>
    %6 = vector.shape_cast %5 : vector<1x3x32xbf16> to vector<3x32xbf16>
    %cst_7 = arith.constant dense<0.000000e+00> : vector<64x32xf32>
    %7 = tpu.matmul %4, %6, %cst_7 {dimension_numbers = #tpu.dot_dimension_numbers<[1], [0], [0], [1], [0, 0, 1, 1], [], []>} : vector<64x3xbf16>, vector<3x32xbf16>, vector<64x32xf32> -> vector<64x32xf32>
    %8 = arith.addf %0, %7 : vector<64x32xf32>
    %c0_8 = arith.constant 0 : index
    %c1 = arith.constant 1 : index
    %c0_9 = arith.constant 0 : index
    %c0_10 = arith.constant 0 : index
    %c0_11 = arith.constant 0 : index
    %9 = vector.load %arg1[%c0_8, %c1, %c0_9, %c0_10, %c0_11] : memref<1x4x9x9x3xf32, #tpu.memory_space<vmem>>, vector<1x1x8x8x3xf32>
    %10 = vector.shape_cast %9 : vector<1x1x8x8x3xf32> to vector<8x8x3xf32>
    %11 = vector.shape_cast %10 : vector<8x8x3xf32> to vector<64x3xf32>
    %12 = arith.truncf %11 : vector<64x3xf32> to vector<64x3xbf16>
    %c1_12 = arith.constant 1 : index
    %c0_13 = arith.constant 0 : index
    %c0_14 = arith.constant 0 : index
    %13 = vector.load %arg2[%c1_12, %c0_13, %c0_14] : memref<9x3x32xbf16, #tpu.memory_space<vmem>>, vector<1x3x32xbf16>
    %14 = vector.shape_cast %13 : vector<1x3x32xbf16> to vector<3x32xbf16>
    %cst_15 = arith.constant dense<0.000000e+00> : vector<64x32xf32>
    %15 = tpu.matmul %12, %14, %cst_15 {dimension_numbers = #tpu.dot_dimension_numbers<[1], [0], [0], [1], [0, 0, 1, 1], [], []>} : vector<64x3xbf16>, vector<3x32xbf16>, vector<64x32xf32> -> vector<64x32xf32>
    %16 = arith.addf %8, %15 : vector<64x32xf32>
    %c0_16 = arith.constant 0 : index
    %c0_17 = arith.constant 0 : index
    %c0_18 = arith.constant 0 : index
    %c1_19 = arith.constant 1 : index
    %c0_20 = arith.constant 0 : index
    %17 = vector.load %arg1[%c0_16, %c0_17, %c0_18, %c1_19, %c0_20] : memref<1x4x9x9x3xf32, #tpu.memory_space<vmem>>, vector<1x1x8x8x3xf32>
    %18 = vector.shape_cast %17 : vector<1x1x8x8x3xf32> to vector<8x8x3xf32>
    %19 = vector.shape_cast %18 : vector<8x8x3xf32> to vector<64x3xf32>
    %20 = arith.truncf %19 : vector<64x3xf32> to vector<64x3xbf16>
    %c2 = arith.constant 2 : index
    %c0_21 = arith.constant 0 : index
    %c0_22 = arith.constant 0 : index
    %21 = vector.load %arg2[%c2, %c0_21, %c0_22] : memref<9x3x32xbf16, #tpu.memory_space<vmem>>, vector<1x3x32xbf16>
    %22 = vector.shape_cast %21 : vector<1x3x32xbf16> to vector<3x32xbf16>
    %cst_23 = arith.constant dense<0.000000e+00> : vector<64x32xf32>
    %23 = tpu.matmul %20, %22, %cst_23 {dimension_numbers = #tpu.dot_dimension_numbers<[1], [0], [0], [1], [0, 0, 1, 1], [], []>} : vector<64x3xbf16>, vector<3x32xbf16>, vector<64x32xf32> -> vector<64x32xf32>
    %24 = arith.addf %16, %23 : vector<64x32xf32>
    %c0_24 = arith.constant 0 : index
    %c2_25 = arith.constant 2 : index
    %c0_26 = arith.constant 0 : index
    %c0_27 = arith.constant 0 : index
    %c0_28 = arith.constant 0 : index
    %25 = vector.load %arg1[%c0_24, %c2_25, %c0_26, %c0_27, %c0_28] : memref<1x4x9x9x3xf32, #tpu.memory_space<vmem>>, vector<1x1x8x8x3xf32>
    %26 = vector.shape_cast %25 : vector<1x1x8x8x3xf32> to vector<8x8x3xf32>
    %27 = vector.shape_cast %26 : vector<8x8x3xf32> to vector<64x3xf32>
    %28 = arith.truncf %27 : vector<64x3xf32> to vector<64x3xbf16>
    %c3 = arith.constant 3 : index
    %c0_29 = arith.constant 0 : index
    %c0_30 = arith.constant 0 : index
    %29 = vector.load %arg2[%c3, %c0_29, %c0_30] : memref<9x3x32xbf16, #tpu.memory_space<vmem>>, vector<1x3x32xbf16>
    %30 = vector.shape_cast %29 : vector<1x3x32xbf16> to vector<3x32xbf16>
    %cst_31 = arith.constant dense<0.000000e+00> : vector<64x32xf32>
    %31 = tpu.matmul %28, %30, %cst_31 {dimension_numbers = #tpu.dot_dimension_numbers<[1], [0], [0], [1], [0, 0, 1, 1], [], []>} : vector<64x3xbf16>, vector<3x32xbf16>, vector<64x32xf32> -> vector<64x32xf32>
    %32 = arith.addf %24, %31 : vector<64x32xf32>
    %c0_32 = arith.constant 0 : index
    %c3_33 = arith.constant 3 : index
    %c0_34 = arith.constant 0 : index
    %c0_35 = arith.constant 0 : index
    %c0_36 = arith.constant 0 : index
    %33 = vector.load %arg1[%c0_32, %c3_33, %c0_34, %c0_35, %c0_36] : memref<1x4x9x9x3xf32, #tpu.memory_space<vmem>>, vector<1x1x8x8x3xf32>
    %34 = vector.shape_cast %33 : vector<1x1x8x8x3xf32> to vector<8x8x3xf32>
    %35 = vector.shape_cast %34 : vector<8x8x3xf32> to vector<64x3xf32>
    %36 = arith.truncf %35 : vector<64x3xf32> to vector<64x3xbf16>
    %c4 = arith.constant 4 : index
    %c0_37 = arith.constant 0 : index
    %c0_38 = arith.constant 0 : index
    %37 = vector.load %arg2[%c4, %c0_37, %c0_38] : memref<9x3x32xbf16, #tpu.memory_space<vmem>>, vector<1x3x32xbf16>
    %38 = vector.shape_cast %37 : vector<1x3x32xbf16> to vector<3x32xbf16>
    %cst_39 = arith.constant dense<0.000000e+00> : vector<64x32xf32>
    %39 = tpu.matmul %36, %38, %cst_39 {dimension_numbers = #tpu.dot_dimension_numbers<[1], [0], [0], [1], [0, 0, 1, 1], [], []>} : vector<64x3xbf16>, vector<3x32xbf16>, vector<64x32xf32> -> vector<64x32xf32>
    %40 = arith.addf %32, %39 : vector<64x32xf32>
    %c0_40 = arith.constant 0 : index
    %c2_41 = arith.constant 2 : index
    %c0_42 = arith.constant 0 : index
    %c1_43 = arith.constant 1 : index
    %c0_44 = arith.constant 0 : index
    %41 = vector.load %arg1[%c0_40, %c2_41, %c0_42, %c1_43, %c0_44] : memref<1x4x9x9x3xf32, #tpu.memory_space<vmem>>, vector<1x1x8x8x3xf32>
    %42 = vector.shape_cast %41 : vector<1x1x8x8x3xf32> to vector<8x8x3xf32>
    %43 = vector.shape_cast %42 : vector<8x8x3xf32> to vector<64x3xf32>
    %44 = arith.truncf %43 : vector<64x3xf32> to vector<64x3xbf16>
    %c5 = arith.constant 5 : index
    %c0_45 = arith.constant 0 : index
    %c0_46 = arith.constant 0 : index
    %45 = vector.load %arg2[%c5, %c0_45, %c0_46] : memref<9x3x32xbf16, #tpu.memory_space<vmem>>, vector<1x3x32xbf16>
    %46 = vector.shape_cast %45 : vector<1x3x32xbf16> to vector<3x32xbf16>
    %cst_47 = arith.constant dense<0.000000e+00> : vector<64x32xf32>
    %47 = tpu.matmul %44, %46, %cst_47 {dimension_numbers = #tpu.dot_dimension_numbers<[1], [0], [0], [1], [0, 0, 1, 1], [], []>} : vector<64x3xbf16>, vector<3x32xbf16>, vector<64x32xf32> -> vector<64x32xf32>
    %48 = arith.addf %40, %47 : vector<64x32xf32>
    %c0_48 = arith.constant 0 : index
    %c0_49 = arith.constant 0 : index
    %c1_50 = arith.constant 1 : index
    %c0_51 = arith.constant 0 : index
    %c0_52 = arith.constant 0 : index
    %49 = vector.load %arg1[%c0_48, %c0_49, %c1_50, %c0_51, %c0_52] : memref<1x4x9x9x3xf32, #tpu.memory_space<vmem>>, vector<1x1x8x8x3xf32>
    %50 = vector.shape_cast %49 : vector<1x1x8x8x3xf32> to vector<8x8x3xf32>
    %51 = vector.shape_cast %50 : vector<8x8x3xf32> to vector<64x3xf32>
    %52 = arith.truncf %51 : vector<64x3xf32> to vector<64x3xbf16>
    %c6 = arith.constant 6 : index
    %c0_53 = arith.constant 0 : index
    %c0_54 = arith.constant 0 : index
    %53 = vector.load %arg2[%c6, %c0_53, %c0_54] : memref<9x3x32xbf16, #tpu.memory_space<vmem>>, vector<1x3x32xbf16>
    %54 = vector.shape_cast %53 : vector<1x3x32xbf16> to vector<3x32xbf16>
    %cst_55 = arith.constant dense<0.000000e+00> : vector<64x32xf32>
    %55 = tpu.matmul %52, %54, %cst_55 {dimension_numbers = #tpu.dot_dimension_numbers<[1], [0], [0], [1], [0, 0, 1, 1], [], []>} : vector<64x3xbf16>, vector<3x32xbf16>, vector<64x32xf32> -> vector<64x32xf32>
    %56 = arith.addf %48, %55 : vector<64x32xf32>
    %c0_56 = arith.constant 0 : index
    %c1_57 = arith.constant 1 : index
    %c1_58 = arith.constant 1 : index
    %c0_59 = arith.constant 0 : index
    %c0_60 = arith.constant 0 : index
    %57 = vector.load %arg1[%c0_56, %c1_57, %c1_58, %c0_59, %c0_60] : memref<1x4x9x9x3xf32, #tpu.memory_space<vmem>>, vector<1x1x8x8x3xf32>
    %58 = vector.shape_cast %57 : vector<1x1x8x8x3xf32> to vector<8x8x3xf32>
    %59 = vector.shape_cast %58 : vector<8x8x3xf32> to vector<64x3xf32>
    %60 = arith.truncf %59 : vector<64x3xf32> to vector<64x3xbf16>
    %c7 = arith.constant 7 : index
    %c0_61 = arith.constant 0 : index
    %c0_62 = arith.constant 0 : index
    %61 = vector.load %arg2[%c7, %c0_61, %c0_62] : memref<9x3x32xbf16, #tpu.memory_space<vmem>>, vector<1x3x32xbf16>
    %62 = vector.shape_cast %61 : vector<1x3x32xbf16> to vector<3x32xbf16>
    %cst_63 = arith.constant dense<0.000000e+00> : vector<64x32xf32>
    %63 = tpu.matmul %60, %62, %cst_63 {dimension_numbers = #tpu.dot_dimension_numbers<[1], [0], [0], [1], [0, 0, 1, 1], [], []>} : vector<64x3xbf16>, vector<3x32xbf16>, vector<64x32xf32> -> vector<64x32xf32>
    %64 = arith.addf %56, %63 : vector<64x32xf32>
    %c0_64 = arith.constant 0 : index
    %c0_65 = arith.constant 0 : index
    %c1_66 = arith.constant 1 : index
    %c1_67 = arith.constant 1 : index
    %c0_68 = arith.constant 0 : index
    %65 = vector.load %arg1[%c0_64, %c0_65, %c1_66, %c1_67, %c0_68] : memref<1x4x9x9x3xf32, #tpu.memory_space<vmem>>, vector<1x1x8x8x3xf32>
    %66 = vector.shape_cast %65 : vector<1x1x8x8x3xf32> to vector<8x8x3xf32>
    %67 = vector.shape_cast %66 : vector<8x8x3xf32> to vector<64x3xf32>
    %68 = arith.truncf %67 : vector<64x3xf32> to vector<64x3xbf16>
    %c8 = arith.constant 8 : index
    %c0_69 = arith.constant 0 : index
    %c0_70 = arith.constant 0 : index
    %69 = vector.load %arg2[%c8, %c0_69, %c0_70] : memref<9x3x32xbf16, #tpu.memory_space<vmem>>, vector<1x3x32xbf16>
    %70 = vector.shape_cast %69 : vector<1x3x32xbf16> to vector<3x32xbf16>
    %cst_71 = arith.constant dense<0.000000e+00> : vector<64x32xf32>
    %71 = tpu.matmul %68, %70, %cst_71 {dimension_numbers = #tpu.dot_dimension_numbers<[1], [0], [0], [1], [0, 0, 1, 1], [], []>} : vector<64x3xbf16>, vector<3x32xbf16>, vector<64x32xf32> -> vector<64x32xf32>
    %72 = arith.addf %64, %71 : vector<64x32xf32>
    %c0_72 = arith.constant 0 : index
    %c0_73 = arith.constant 0 : index
    %73 = vector.load %arg3[%c0_72, %c0_73] : memref<1x32xf32, #tpu.memory_space<vmem>>, vector<1x32xf32>
    %74 = vector.broadcast %73 : vector<1x32xf32> to vector<64x32xf32>
    %75 = arith.addf %72, %74 : vector<64x32xf32>
    %76 = vector.shape_cast %75 : vector<64x32xf32> to vector<8x8x32xf32>
    %c0_74 = arith.constant 0 : index
    %c0_75 = arith.constant 0 : index
    %c0_76 = arith.constant 0 : index
    %c0_77 = arith.constant 0 : index
    %77 = vector.load %arg4[%c0_74, %c0_75, %c0_76, %c0_77] : memref<1x8x8x32xf32, #tpu.memory_space<vmem>>, vector<1x8x8x32xf32>
    %78 = vector.shape_cast %77 : vector<1x8x8x32xf32> to vector<8x8x32xf32>
    %79 = vector.shape_cast %76 : vector<8x8x32xf32> to vector<1x8x8x32xf32>
    tpu.vector_store %arg4[%c0_74, %c0_75, %c0_76, %c0_77], %79 {strides = array<i32>} : memref<1x8x8x32xf32, #tpu.memory_space<vmem>>, vector<1x8x8x32xf32>,
    return
  }
  func.func @transform_0(%arg0: i32) -> (i32, i32, i32, i32, i32) {
    %c0_i32 = arith.constant 0 : i32
    %c0_i32_0 = arith.constant 0 : i32
    %c0_i32_1 = arith.constant 0 : i32
    %c0_i32_2 = arith.constant 0 : i32
    %c0_i32_3 = arith.constant 0 : i32
    return %arg0, %c0_i32, %c0_i32_0, %c0_i32_1, %c0_i32_2 : i32, i32, i32, i32, i32
  }
  func.func @transform_1(%arg0: i32) -> (i32, i32, i32) {
    %c0_i32 = arith.constant 0 : i32
    %c0_i32_0 = arith.constant 0 : i32
    %c0_i32_1 = arith.constant 0 : i32
    %c0_i32_2 = arith.constant 0 : i32
    return %c0_i32, %c0_i32_0, %c0_i32_1 : i32, i32, i32
  }
  func.func @transform_2(%arg0: i32) -> (i32, i32) {
    %c0_i32 = arith.constant 0 : i32
    %c0_i32_0 = arith.constant 0 : i32
    %c0_i32_1 = arith.constant 0 : i32
    return %c0_i32, %c0_i32_0 : i32, i32
  }
  func.func @transform_3(%arg0: i32) -> (i32, i32, i32, i32) {
    %c0_i32 = arith.constant 0 : i32
    %c0_i32_0 = arith.constant 0 : i32
    %c0_i32_1 = arith.constant 0 : i32
    %c0_i32_2 = arith.constant 0 : i32
    return %arg0, %c0_i32, %c0_i32_0, %c0_i32_1 : i32, i32, i32, i32
  }
}

module attributes {stable_mosaic.version = 11 : i64} {
  func.func @_conv_tap_kernel(%arg0: i32, %arg1: memref<1x1x10x10x32xf32, #tpu.memory_space<vmem>>, %arg2: memref<9x32x16xbf16, #tpu.memory_space<vmem>>, %arg3: memref<1x16xf32, #tpu.memory_space<vmem>>, %arg4: memref<1x8x8x16xf32, #tpu.memory_space<vmem>>) attributes {dimension_semantics = [#tpu.dimension_semantics<parallel>], iteration_bounds = array<i64: 2>, scalar_prefetch = 0 : i64, scratch_operands = 0 : i64, tpu.core_type = #tpu.core_type<tc>, window_params = [{transform_indices = @transform_0, window_bounds = array<i64: 1, 1, 10, 10, 32>}, {pipeline_mode = #tpu.pipeline_mode<synchronous>, transform_indices = @transform_1, window_bounds = array<i64: 9, 32, 16>}, {pipeline_mode = #tpu.pipeline_mode<synchronous>, transform_indices = @transform_2, window_bounds = array<i64: 1, 16>}, {transform_indices = @transform_3, window_bounds = array<i64: 1, 8, 8, 16>}]} {
    %cst = arith.constant 0.000000e+00 : f32
    %0 = vector.broadcast %cst : f32 to vector<64x16xf32>
    %c0 = arith.constant 0 : index
    %c0_0 = arith.constant 0 : index
    %c0_1 = arith.constant 0 : index
    %c0_2 = arith.constant 0 : index
    %c0_3 = arith.constant 0 : index
    %1 = vector.load %arg1[%c0, %c0_0, %c0_1, %c0_2, %c0_3] : memref<1x1x10x10x32xf32, #tpu.memory_space<vmem>>, vector<1x1x8x8x32xf32>
    %2 = vector.shape_cast %1 : vector<1x1x8x8x32xf32> to vector<8x8x32xf32>
    %3 = vector.shape_cast %2 : vector<8x8x32xf32> to vector<64x32xf32>
    %4 = arith.truncf %3 : vector<64x32xf32> to vector<64x32xbf16>
    %c0_4 = arith.constant 0 : index
    %c0_5 = arith.constant 0 : index
    %c0_6 = arith.constant 0 : index
    %5 = vector.load %arg2[%c0_4, %c0_5, %c0_6] : memref<9x32x16xbf16, #tpu.memory_space<vmem>>, vector<1x32x16xbf16>
    %6 = vector.shape_cast %5 : vector<1x32x16xbf16> to vector<32x16xbf16>
    %cst_7 = arith.constant dense<0.000000e+00> : vector<64x16xf32>
    %7 = tpu.matmul %4, %6, %cst_7 {dimension_numbers = #tpu.dot_dimension_numbers<[1], [0], [0], [1], [0, 0, 1, 1], [], []>} : vector<64x32xbf16>, vector<32x16xbf16>, vector<64x16xf32> -> vector<64x16xf32>
    %8 = arith.addf %0, %7 : vector<64x16xf32>
    %c0_8 = arith.constant 0 : index
    %c0_9 = arith.constant 0 : index
    %c0_10 = arith.constant 0 : index
    %c1 = arith.constant 1 : index
    %c0_11 = arith.constant 0 : index
    %9 = vector.load %arg1[%c0_8, %c0_9, %c0_10, %c1, %c0_11] : memref<1x1x10x10x32xf32, #tpu.memory_space<vmem>>, vector<1x1x8x8x32xf32>
    %10 = vector.shape_cast %9 : vector<1x1x8x8x32xf32> to vector<8x8x32xf32>
    %11 = vector.shape_cast %10 : vector<8x8x32xf32> to vector<64x32xf32>
    %12 = arith.truncf %11 : vector<64x32xf32> to vector<64x32xbf16>
    %c1_12 = arith.constant 1 : index
    %c0_13 = arith.constant 0 : index
    %c0_14 = arith.constant 0 : index
    %13 = vector.load %arg2[%c1_12, %c0_13, %c0_14] : memref<9x32x16xbf16, #tpu.memory_space<vmem>>, vector<1x32x16xbf16>
    %14 = vector.shape_cast %13 : vector<1x32x16xbf16> to vector<32x16xbf16>
    %cst_15 = arith.constant dense<0.000000e+00> : vector<64x16xf32>
    %15 = tpu.matmul %12, %14, %cst_15 {dimension_numbers = #tpu.dot_dimension_numbers<[1], [0], [0], [1], [0, 0, 1, 1], [], []>} : vector<64x32xbf16>, vector<32x16xbf16>, vector<64x16xf32> -> vector<64x16xf32>
    %16 = arith.addf %8, %15 : vector<64x16xf32>
    %c0_16 = arith.constant 0 : index
    %c0_17 = arith.constant 0 : index
    %c0_18 = arith.constant 0 : index
    %c2 = arith.constant 2 : index
    %c0_19 = arith.constant 0 : index
    %17 = vector.load %arg1[%c0_16, %c0_17, %c0_18, %c2, %c0_19] : memref<1x1x10x10x32xf32, #tpu.memory_space<vmem>>, vector<1x1x8x8x32xf32>
    %18 = vector.shape_cast %17 : vector<1x1x8x8x32xf32> to vector<8x8x32xf32>
    %19 = vector.shape_cast %18 : vector<8x8x32xf32> to vector<64x32xf32>
    %20 = arith.truncf %19 : vector<64x32xf32> to vector<64x32xbf16>
    %c2_20 = arith.constant 2 : index
    %c0_21 = arith.constant 0 : index
    %c0_22 = arith.constant 0 : index
    %21 = vector.load %arg2[%c2_20, %c0_21, %c0_22] : memref<9x32x16xbf16, #tpu.memory_space<vmem>>, vector<1x32x16xbf16>
    %22 = vector.shape_cast %21 : vector<1x32x16xbf16> to vector<32x16xbf16>
    %cst_23 = arith.constant dense<0.000000e+00> : vector<64x16xf32>
    %23 = tpu.matmul %20, %22, %cst_23 {dimension_numbers = #tpu.dot_dimension_numbers<[1], [0], [0], [1], [0, 0, 1, 1], [], []>} : vector<64x32xbf16>, vector<32x16xbf16>, vector<64x16xf32> -> vector<64x16xf32>
    %24 = arith.addf %16, %23 : vector<64x16xf32>
    %c0_24 = arith.constant 0 : index
    %c0_25 = arith.constant 0 : index
    %c1_26 = arith.constant 1 : index
    %c0_27 = arith.constant 0 : index
    %c0_28 = arith.constant 0 : index
    %25 = vector.load %arg1[%c0_24, %c0_25, %c1_26, %c0_27, %c0_28] : memref<1x1x10x10x32xf32, #tpu.memory_space<vmem>>, vector<1x1x8x8x32xf32>
    %26 = vector.shape_cast %25 : vector<1x1x8x8x32xf32> to vector<8x8x32xf32>
    %27 = vector.shape_cast %26 : vector<8x8x32xf32> to vector<64x32xf32>
    %28 = arith.truncf %27 : vector<64x32xf32> to vector<64x32xbf16>
    %c3 = arith.constant 3 : index
    %c0_29 = arith.constant 0 : index
    %c0_30 = arith.constant 0 : index
    %29 = vector.load %arg2[%c3, %c0_29, %c0_30] : memref<9x32x16xbf16, #tpu.memory_space<vmem>>, vector<1x32x16xbf16>
    %30 = vector.shape_cast %29 : vector<1x32x16xbf16> to vector<32x16xbf16>
    %cst_31 = arith.constant dense<0.000000e+00> : vector<64x16xf32>
    %31 = tpu.matmul %28, %30, %cst_31 {dimension_numbers = #tpu.dot_dimension_numbers<[1], [0], [0], [1], [0, 0, 1, 1], [], []>} : vector<64x32xbf16>, vector<32x16xbf16>, vector<64x16xf32> -> vector<64x16xf32>
    %32 = arith.addf %24, %31 : vector<64x16xf32>
    %c0_32 = arith.constant 0 : index
    %c0_33 = arith.constant 0 : index
    %c1_34 = arith.constant 1 : index
    %c1_35 = arith.constant 1 : index
    %c0_36 = arith.constant 0 : index
    %33 = vector.load %arg1[%c0_32, %c0_33, %c1_34, %c1_35, %c0_36] : memref<1x1x10x10x32xf32, #tpu.memory_space<vmem>>, vector<1x1x8x8x32xf32>
    %34 = vector.shape_cast %33 : vector<1x1x8x8x32xf32> to vector<8x8x32xf32>
    %35 = vector.shape_cast %34 : vector<8x8x32xf32> to vector<64x32xf32>
    %36 = arith.truncf %35 : vector<64x32xf32> to vector<64x32xbf16>
    %c4 = arith.constant 4 : index
    %c0_37 = arith.constant 0 : index
    %c0_38 = arith.constant 0 : index
    %37 = vector.load %arg2[%c4, %c0_37, %c0_38] : memref<9x32x16xbf16, #tpu.memory_space<vmem>>, vector<1x32x16xbf16>
    %38 = vector.shape_cast %37 : vector<1x32x16xbf16> to vector<32x16xbf16>
    %cst_39 = arith.constant dense<0.000000e+00> : vector<64x16xf32>
    %39 = tpu.matmul %36, %38, %cst_39 {dimension_numbers = #tpu.dot_dimension_numbers<[1], [0], [0], [1], [0, 0, 1, 1], [], []>} : vector<64x32xbf16>, vector<32x16xbf16>, vector<64x16xf32> -> vector<64x16xf32>
    %40 = arith.addf %32, %39 : vector<64x16xf32>
    %c0_40 = arith.constant 0 : index
    %c0_41 = arith.constant 0 : index
    %c1_42 = arith.constant 1 : index
    %c2_43 = arith.constant 2 : index
    %c0_44 = arith.constant 0 : index
    %41 = vector.load %arg1[%c0_40, %c0_41, %c1_42, %c2_43, %c0_44] : memref<1x1x10x10x32xf32, #tpu.memory_space<vmem>>, vector<1x1x8x8x32xf32>
    %42 = vector.shape_cast %41 : vector<1x1x8x8x32xf32> to vector<8x8x32xf32>
    %43 = vector.shape_cast %42 : vector<8x8x32xf32> to vector<64x32xf32>
    %44 = arith.truncf %43 : vector<64x32xf32> to vector<64x32xbf16>
    %c5 = arith.constant 5 : index
    %c0_45 = arith.constant 0 : index
    %c0_46 = arith.constant 0 : index
    %45 = vector.load %arg2[%c5, %c0_45, %c0_46] : memref<9x32x16xbf16, #tpu.memory_space<vmem>>, vector<1x32x16xbf16>
    %46 = vector.shape_cast %45 : vector<1x32x16xbf16> to vector<32x16xbf16>
    %cst_47 = arith.constant dense<0.000000e+00> : vector<64x16xf32>
    %47 = tpu.matmul %44, %46, %cst_47 {dimension_numbers = #tpu.dot_dimension_numbers<[1], [0], [0], [1], [0, 0, 1, 1], [], []>} : vector<64x32xbf16>, vector<32x16xbf16>, vector<64x16xf32> -> vector<64x16xf32>
    %48 = arith.addf %40, %47 : vector<64x16xf32>
    %c0_48 = arith.constant 0 : index
    %c0_49 = arith.constant 0 : index
    %c2_50 = arith.constant 2 : index
    %c0_51 = arith.constant 0 : index
    %c0_52 = arith.constant 0 : index
    %49 = vector.load %arg1[%c0_48, %c0_49, %c2_50, %c0_51, %c0_52] : memref<1x1x10x10x32xf32, #tpu.memory_space<vmem>>, vector<1x1x8x8x32xf32>
    %50 = vector.shape_cast %49 : vector<1x1x8x8x32xf32> to vector<8x8x32xf32>
    %51 = vector.shape_cast %50 : vector<8x8x32xf32> to vector<64x32xf32>
    %52 = arith.truncf %51 : vector<64x32xf32> to vector<64x32xbf16>
    %c6 = arith.constant 6 : index
    %c0_53 = arith.constant 0 : index
    %c0_54 = arith.constant 0 : index
    %53 = vector.load %arg2[%c6, %c0_53, %c0_54] : memref<9x32x16xbf16, #tpu.memory_space<vmem>>, vector<1x32x16xbf16>
    %54 = vector.shape_cast %53 : vector<1x32x16xbf16> to vector<32x16xbf16>
    %cst_55 = arith.constant dense<0.000000e+00> : vector<64x16xf32>
    %55 = tpu.matmul %52, %54, %cst_55 {dimension_numbers = #tpu.dot_dimension_numbers<[1], [0], [0], [1], [0, 0, 1, 1], [], []>} : vector<64x32xbf16>, vector<32x16xbf16>, vector<64x16xf32> -> vector<64x16xf32>
    %56 = arith.addf %48, %55 : vector<64x16xf32>
    %c0_56 = arith.constant 0 : index
    %c0_57 = arith.constant 0 : index
    %c2_58 = arith.constant 2 : index
    %c1_59 = arith.constant 1 : index
    %c0_60 = arith.constant 0 : index
    %57 = vector.load %arg1[%c0_56, %c0_57, %c2_58, %c1_59, %c0_60] : memref<1x1x10x10x32xf32, #tpu.memory_space<vmem>>, vector<1x1x8x8x32xf32>
    %58 = vector.shape_cast %57 : vector<1x1x8x8x32xf32> to vector<8x8x32xf32>
    %59 = vector.shape_cast %58 : vector<8x8x32xf32> to vector<64x32xf32>
    %60 = arith.truncf %59 : vector<64x32xf32> to vector<64x32xbf16>
    %c7 = arith.constant 7 : index
    %c0_61 = arith.constant 0 : index
    %c0_62 = arith.constant 0 : index
    %61 = vector.load %arg2[%c7, %c0_61, %c0_62] : memref<9x32x16xbf16, #tpu.memory_space<vmem>>, vector<1x32x16xbf16>
    %62 = vector.shape_cast %61 : vector<1x32x16xbf16> to vector<32x16xbf16>
    %cst_63 = arith.constant dense<0.000000e+00> : vector<64x16xf32>
    %63 = tpu.matmul %60, %62, %cst_63 {dimension_numbers = #tpu.dot_dimension_numbers<[1], [0], [0], [1], [0, 0, 1, 1], [], []>} : vector<64x32xbf16>, vector<32x16xbf16>, vector<64x16xf32> -> vector<64x16xf32>
    %64 = arith.addf %56, %63 : vector<64x16xf32>
    %c0_64 = arith.constant 0 : index
    %c0_65 = arith.constant 0 : index
    %c2_66 = arith.constant 2 : index
    %c2_67 = arith.constant 2 : index
    %c0_68 = arith.constant 0 : index
    %65 = vector.load %arg1[%c0_64, %c0_65, %c2_66, %c2_67, %c0_68] : memref<1x1x10x10x32xf32, #tpu.memory_space<vmem>>, vector<1x1x8x8x32xf32>
    %66 = vector.shape_cast %65 : vector<1x1x8x8x32xf32> to vector<8x8x32xf32>
    %67 = vector.shape_cast %66 : vector<8x8x32xf32> to vector<64x32xf32>
    %68 = arith.truncf %67 : vector<64x32xf32> to vector<64x32xbf16>
    %c8 = arith.constant 8 : index
    %c0_69 = arith.constant 0 : index
    %c0_70 = arith.constant 0 : index
    %69 = vector.load %arg2[%c8, %c0_69, %c0_70] : memref<9x32x16xbf16, #tpu.memory_space<vmem>>, vector<1x32x16xbf16>
    %70 = vector.shape_cast %69 : vector<1x32x16xbf16> to vector<32x16xbf16>
    %cst_71 = arith.constant dense<0.000000e+00> : vector<64x16xf32>
    %71 = tpu.matmul %68, %70, %cst_71 {dimension_numbers = #tpu.dot_dimension_numbers<[1], [0], [0], [1], [0, 0, 1, 1], [], []>} : vector<64x32xbf16>, vector<32x16xbf16>, vector<64x16xf32> -> vector<64x16xf32>
    %72 = arith.addf %64, %71 : vector<64x16xf32>
    %c0_72 = arith.constant 0 : index
    %c0_73 = arith.constant 0 : index
    %73 = vector.load %arg3[%c0_72, %c0_73] : memref<1x16xf32, #tpu.memory_space<vmem>>, vector<1x16xf32>
    %74 = vector.broadcast %73 : vector<1x16xf32> to vector<64x16xf32>
    %75 = arith.addf %72, %74 : vector<64x16xf32>
    %cst_74 = arith.constant 0.000000e+00 : f32
    %76 = vector.broadcast %cst_74 : f32 to vector<64x16xf32>
    %77 = arith.cmpf ogt, %75, %76 : vector<64x16xf32>
    %cst_75 = arith.constant 2.000000e-01 : f32
    %78 = vector.broadcast %cst_75 : f32 to vector<64x16xf32>
    %79 = arith.mulf %78, %75 : vector<64x16xf32>
    %80 = arith.select %77, %75, %79 : vector<64x16xi1>, vector<64x16xf32>
    %81 = vector.shape_cast %80 : vector<64x16xf32> to vector<8x8x16xf32>
    %c0_76 = arith.constant 0 : index
    %c0_77 = arith.constant 0 : index
    %c0_78 = arith.constant 0 : index
    %c0_79 = arith.constant 0 : index
    %82 = vector.load %arg4[%c0_76, %c0_77, %c0_78, %c0_79] : memref<1x8x8x16xf32, #tpu.memory_space<vmem>>, vector<1x8x8x16xf32>
    %83 = vector.shape_cast %82 : vector<1x8x8x16xf32> to vector<8x8x16xf32>
    %84 = vector.shape_cast %81 : vector<8x8x16xf32> to vector<1x8x8x16xf32>
    tpu.vector_store %arg4[%c0_76, %c0_77, %c0_78, %c0_79], %84 {strides = array<i32>} : memref<1x8x8x16xf32, #tpu.memory_space<vmem>>, vector<1x8x8x16xf32>,
    return
  }
  func.func @transform_0(%arg0: i32) -> (i32, i32, i32, i32, i32) {
    %c0_i32 = arith.constant 0 : i32
    %c0_i32_0 = arith.constant 0 : i32
    %c0_i32_1 = arith.constant 0 : i32
    %c0_i32_2 = arith.constant 0 : i32
    %c0_i32_3 = arith.constant 0 : i32
    return %arg0, %c0_i32, %c0_i32_0, %c0_i32_1, %c0_i32_2 : i32, i32, i32, i32, i32
  }
  func.func @transform_1(%arg0: i32) -> (i32, i32, i32) {
    %c0_i32 = arith.constant 0 : i32
    %c0_i32_0 = arith.constant 0 : i32
    %c0_i32_1 = arith.constant 0 : i32
    %c0_i32_2 = arith.constant 0 : i32
    return %c0_i32, %c0_i32_0, %c0_i32_1 : i32, i32, i32
  }
  func.func @transform_2(%arg0: i32) -> (i32, i32) {
    %c0_i32 = arith.constant 0 : i32
    %c0_i32_0 = arith.constant 0 : i32
    %c0_i32_1 = arith.constant 0 : i32
    return %c0_i32, %c0_i32_0 : i32, i32
  }
  func.func @transform_3(%arg0: i32) -> (i32, i32, i32, i32) {
    %c0_i32 = arith.constant 0 : i32
    %c0_i32_0 = arith.constant 0 : i32
    %c0_i32_1 = arith.constant 0 : i32
    %c0_i32_2 = arith.constant 0 : i32
    return %arg0, %c0_i32, %c0_i32_0, %c0_i32_1 : i32, i32, i32, i32
  }
}

module attributes {stable_mosaic.version = 11 : i64} {
  func.func @_ca_residual_kernel(%arg0: i32, %arg1: memref<1x64x32xf32, #tpu.memory_space<vmem>>, %arg2: memref<1x64x32xf32, #tpu.memory_space<vmem>>, %arg3: memref<32x2xf32, #tpu.memory_space<vmem>>, %arg4: memref<1x2xf32, #tpu.memory_space<vmem>>, %arg5: memref<2x32xf32, #tpu.memory_space<vmem>>, %arg6: memref<1x32xf32, #tpu.memory_space<vmem>>, %arg7: memref<1x64x32xf32, #tpu.memory_space<vmem>>) attributes {dimension_semantics = [#tpu.dimension_semantics<parallel>], iteration_bounds = array<i64: 2>, scalar_prefetch = 0 : i64, scratch_operands = 0 : i64, tpu.core_type = #tpu.core_type<tc>, window_params = [{transform_indices = @transform_0, window_bounds = array<i64: 1, 64, 32>}, {transform_indices = @transform_1, window_bounds = array<i64: 1, 64, 32>}, {pipeline_mode = #tpu.pipeline_mode<synchronous>, transform_indices = @transform_2, window_bounds = array<i64: 32, 2>}, {pipeline_mode = #tpu.pipeline_mode<synchronous>, transform_indices = @transform_3, window_bounds = array<i64: 1, 2>}, {pipeline_mode = #tpu.pipeline_mode<synchronous>, transform_indices = @transform_4, window_bounds = array<i64: 2, 32>}, {pipeline_mode = #tpu.pipeline_mode<synchronous>, transform_indices = @transform_5, window_bounds = array<i64: 1, 32>}, {transform_indices = @transform_6, window_bounds = array<i64: 1, 64, 32>}]} {
    %c0 = arith.constant 0 : index
    %c0_0 = arith.constant 0 : index
    %c0_1 = arith.constant 0 : index
    %0 = vector.load %arg2[%c0, %c0_0, %c0_1] : memref<1x64x32xf32, #tpu.memory_space<vmem>>, vector<1x64x32xf32>
    %1 = vector.shape_cast %0 : vector<1x64x32xf32> to vector<64x32xf32>
    %cst = arith.constant dense<0.000000e+00> : vector<32xf32>
    %2 = vector.multi_reduction <add>, %1, %cst [0] : vector<64x32xf32> to vector<32xf32>
    %3 = vector.shape_cast %2 : vector<32xf32> to vector<1x32xf32>
    %cst_2 = arith.constant 6.400000e+01 : f32
    %4 = vector.broadcast %cst_2 : f32 to vector<1x32xf32>
    %5 = arith.divf %3, %4 : vector<1x32xf32>
    %c0_3 = arith.constant 0 : index
    %c0_4 = arith.constant 0 : index
    %6 = vector.load %arg3[%c0_3, %c0_4] : memref<32x2xf32, #tpu.memory_space<vmem>>, vector<32x2xf32>
    %cst_5 = arith.constant dense<0.000000e+00> : vector<1x2xf32>
    %7 = tpu.matmul %5, %6, %cst_5 {dimension_numbers = #tpu.dot_dimension_numbers<[1], [0], [0], [1], [0, 0, 1, 1], [], []>} : vector<1x32xf32>, vector<32x2xf32>, vector<1x2xf32> -> vector<1x2xf32>
    %c0_6 = arith.constant 0 : index
    %c0_7 = arith.constant 0 : index
    %8 = vector.load %arg4[%c0_6, %c0_7] : memref<1x2xf32, #tpu.memory_space<vmem>>, vector<1x2xf32>
    %9 = arith.addf %7, %8 : vector<1x2xf32>
    %cst_8 = arith.constant 0.000000e+00 : f32
    %10 = vector.broadcast %cst_8 : f32 to vector<1x2xf32>
    %11 = arith.maximumf %9, %10 : vector<1x2xf32>
    %c0_9 = arith.constant 0 : index
    %c0_10 = arith.constant 0 : index
    %12 = vector.load %arg5[%c0_9, %c0_10] : memref<2x32xf32, #tpu.memory_space<vmem>>, vector<2x32xf32>
    %cst_11 = arith.constant dense<0.000000e+00> : vector<1x32xf32>
    %13 = tpu.matmul %11, %12, %cst_11 {dimension_numbers = #tpu.dot_dimension_numbers<[1], [0], [0], [1], [0, 0, 1, 1], [], []>} : vector<1x2xf32>, vector<2x32xf32>, vector<1x32xf32> -> vector<1x32xf32>
    %c0_12 = arith.constant 0 : index
    %c0_13 = arith.constant 0 : index
    %14 = vector.load %arg6[%c0_12, %c0_13] : memref<1x32xf32, #tpu.memory_space<vmem>>, vector<1x32xf32>
    %15 = arith.addf %13, %14 : vector<1x32xf32>
    %16 = arith.negf %15 : vector<1x32xf32>
    %17 = math.exp %16 : vector<1x32xf32>
    %cst_14 = arith.constant 1.000000e+00 : f32
    %18 = vector.broadcast %cst_14 : f32 to vector<1x32xf32>
    %19 = arith.addf %18, %17 : vector<1x32xf32>
    %20 = arith.divf %18, %19 : vector<1x32xf32>
    %c0_15 = arith.constant 0 : index
    %c0_16 = arith.constant 0 : index
    %c0_17 = arith.constant 0 : index
    %21 = vector.load %arg1[%c0_15, %c0_16, %c0_17] : memref<1x64x32xf32, #tpu.memory_space<vmem>>, vector<1x64x32xf32>
    %22 = vector.shape_cast %21 : vector<1x64x32xf32> to vector<64x32xf32>
    %23 = vector.broadcast %20 : vector<1x32xf32> to vector<64x32xf32>
    %24 = arith.mulf %23, %1 : vector<64x32xf32>
    %25 = arith.addf %22, %24 : vector<64x32xf32>
    %c0_18 = arith.constant 0 : index
    %c0_19 = arith.constant 0 : index
    %c0_20 = arith.constant 0 : index
    %26 = vector.load %arg7[%c0_18, %c0_19, %c0_20] : memref<1x64x32xf32, #tpu.memory_space<vmem>>, vector<1x64x32xf32>
    %27 = vector.shape_cast %26 : vector<1x64x32xf32> to vector<64x32xf32>
    %28 = vector.shape_cast %25 : vector<64x32xf32> to vector<1x64x32xf32>
    tpu.vector_store %arg7[%c0_18, %c0_19, %c0_20], %28 {strides = array<i32>} : memref<1x64x32xf32, #tpu.memory_space<vmem>>, vector<1x64x32xf32>,
    return
  }
  func.func @transform_0(%arg0: i32) -> (i32, i32, i32) {
    %c0_i32 = arith.constant 0 : i32
    %c0_i32_0 = arith.constant 0 : i32
    %c0_i32_1 = arith.constant 0 : i32
    return %arg0, %c0_i32, %c0_i32_0 : i32, i32, i32
  }
  func.func @transform_1(%arg0: i32) -> (i32, i32, i32) {
    %c0_i32 = arith.constant 0 : i32
    %c0_i32_0 = arith.constant 0 : i32
    %c0_i32_1 = arith.constant 0 : i32
    return %arg0, %c0_i32, %c0_i32_0 : i32, i32, i32
  }
  func.func @transform_2(%arg0: i32) -> (i32, i32) {
    %c0_i32 = arith.constant 0 : i32
    %c0_i32_0 = arith.constant 0 : i32
    %c0_i32_1 = arith.constant 0 : i32
    return %c0_i32, %c0_i32_0 : i32, i32
  }
  func.func @transform_3(%arg0: i32) -> (i32, i32) {
    %c0_i32 = arith.constant 0 : i32
    %c0_i32_0 = arith.constant 0 : i32
    %c0_i32_1 = arith.constant 0 : i32
    return %c0_i32, %c0_i32_0 : i32, i32
  }
  func.func @transform_4(%arg0: i32) -> (i32, i32) {
    %c0_i32 = arith.constant 0 : i32
    %c0_i32_0 = arith.constant 0 : i32
    %c0_i32_1 = arith.constant 0 : i32
    return %c0_i32, %c0_i32_0 : i32, i32
  }
  func.func @transform_5(%arg0: i32) -> (i32, i32) {
    %c0_i32 = arith.constant 0 : i32
    %c0_i32_0 = arith.constant 0 : i32
    %c0_i32_1 = arith.constant 0 : i32
    return %c0_i32, %c0_i32_0 : i32, i32
  }
  func.func @transform_6(%arg0: i32) -> (i32, i32, i32) {
    %c0_i32 = arith.constant 0 : i32
    %c0_i32_0 = arith.constant 0 : i32
    %c0_i32_1 = arith.constant 0 : i32
    return %arg0, %c0_i32, %c0_i32_0 : i32, i32, i32
  }
}

module attributes {stable_mosaic.version = 11 : i64} {
  func.func @_conv_tap_kernel(%arg0: i32, %arg1: memref<1x1x10x10x16xf32, #tpu.memory_space<vmem>>, %arg2: memref<9x16x32xbf16, #tpu.memory_space<vmem>>, %arg3: memref<1x32xf32, #tpu.memory_space<vmem>>, %arg4: memref<1x8x8x32xf32, #tpu.memory_space<vmem>>, %arg5: memref<1x8x8x32xf32, #tpu.memory_space<vmem>>) attributes {dimension_semantics = [#tpu.dimension_semantics<parallel>], iteration_bounds = array<i64: 2>, scalar_prefetch = 0 : i64, scratch_operands = 0 : i64, tpu.core_type = #tpu.core_type<tc>, window_params = [{transform_indices = @transform_0, window_bounds = array<i64: 1, 1, 10, 10, 16>}, {pipeline_mode = #tpu.pipeline_mode<synchronous>, transform_indices = @transform_1, window_bounds = array<i64: 9, 16, 32>}, {pipeline_mode = #tpu.pipeline_mode<synchronous>, transform_indices = @transform_2, window_bounds = array<i64: 1, 32>}, {transform_indices = @transform_3, window_bounds = array<i64: 1, 8, 8, 32>}, {transform_indices = @transform_4, window_bounds = array<i64: 1, 8, 8, 32>}]} {
    %cst = arith.constant 0.000000e+00 : f32
    %0 = vector.broadcast %cst : f32 to vector<64x32xf32>
    %c0 = arith.constant 0 : index
    %c0_0 = arith.constant 0 : index
    %c0_1 = arith.constant 0 : index
    %c0_2 = arith.constant 0 : index
    %c0_3 = arith.constant 0 : index
    %1 = vector.load %arg1[%c0, %c0_0, %c0_1, %c0_2, %c0_3] : memref<1x1x10x10x16xf32, #tpu.memory_space<vmem>>, vector<1x1x8x8x16xf32>
    %2 = vector.shape_cast %1 : vector<1x1x8x8x16xf32> to vector<8x8x16xf32>
    %3 = vector.shape_cast %2 : vector<8x8x16xf32> to vector<64x16xf32>
    %4 = arith.truncf %3 : vector<64x16xf32> to vector<64x16xbf16>
    %c0_4 = arith.constant 0 : index
    %c0_5 = arith.constant 0 : index
    %c0_6 = arith.constant 0 : index
    %5 = vector.load %arg2[%c0_4, %c0_5, %c0_6] : memref<9x16x32xbf16, #tpu.memory_space<vmem>>, vector<1x16x32xbf16>
    %6 = vector.shape_cast %5 : vector<1x16x32xbf16> to vector<16x32xbf16>
    %cst_7 = arith.constant dense<0.000000e+00> : vector<64x32xf32>
    %7 = tpu.matmul %4, %6, %cst_7 {dimension_numbers = #tpu.dot_dimension_numbers<[1], [0], [0], [1], [0, 0, 1, 1], [], []>} : vector<64x16xbf16>, vector<16x32xbf16>, vector<64x32xf32> -> vector<64x32xf32>
    %8 = arith.addf %0, %7 : vector<64x32xf32>
    %c0_8 = arith.constant 0 : index
    %c0_9 = arith.constant 0 : index
    %c0_10 = arith.constant 0 : index
    %c1 = arith.constant 1 : index
    %c0_11 = arith.constant 0 : index
    %9 = vector.load %arg1[%c0_8, %c0_9, %c0_10, %c1, %c0_11] : memref<1x1x10x10x16xf32, #tpu.memory_space<vmem>>, vector<1x1x8x8x16xf32>
    %10 = vector.shape_cast %9 : vector<1x1x8x8x16xf32> to vector<8x8x16xf32>
    %11 = vector.shape_cast %10 : vector<8x8x16xf32> to vector<64x16xf32>
    %12 = arith.truncf %11 : vector<64x16xf32> to vector<64x16xbf16>
    %c1_12 = arith.constant 1 : index
    %c0_13 = arith.constant 0 : index
    %c0_14 = arith.constant 0 : index
    %13 = vector.load %arg2[%c1_12, %c0_13, %c0_14] : memref<9x16x32xbf16, #tpu.memory_space<vmem>>, vector<1x16x32xbf16>
    %14 = vector.shape_cast %13 : vector<1x16x32xbf16> to vector<16x32xbf16>
    %cst_15 = arith.constant dense<0.000000e+00> : vector<64x32xf32>
    %15 = tpu.matmul %12, %14, %cst_15 {dimension_numbers = #tpu.dot_dimension_numbers<[1], [0], [0], [1], [0, 0, 1, 1], [], []>} : vector<64x16xbf16>, vector<16x32xbf16>, vector<64x32xf32> -> vector<64x32xf32>
    %16 = arith.addf %8, %15 : vector<64x32xf32>
    %c0_16 = arith.constant 0 : index
    %c0_17 = arith.constant 0 : index
    %c0_18 = arith.constant 0 : index
    %c2 = arith.constant 2 : index
    %c0_19 = arith.constant 0 : index
    %17 = vector.load %arg1[%c0_16, %c0_17, %c0_18, %c2, %c0_19] : memref<1x1x10x10x16xf32, #tpu.memory_space<vmem>>, vector<1x1x8x8x16xf32>
    %18 = vector.shape_cast %17 : vector<1x1x8x8x16xf32> to vector<8x8x16xf32>
    %19 = vector.shape_cast %18 : vector<8x8x16xf32> to vector<64x16xf32>
    %20 = arith.truncf %19 : vector<64x16xf32> to vector<64x16xbf16>
    %c2_20 = arith.constant 2 : index
    %c0_21 = arith.constant 0 : index
    %c0_22 = arith.constant 0 : index
    %21 = vector.load %arg2[%c2_20, %c0_21, %c0_22] : memref<9x16x32xbf16, #tpu.memory_space<vmem>>, vector<1x16x32xbf16>
    %22 = vector.shape_cast %21 : vector<1x16x32xbf16> to vector<16x32xbf16>
    %cst_23 = arith.constant dense<0.000000e+00> : vector<64x32xf32>
    %23 = tpu.matmul %20, %22, %cst_23 {dimension_numbers = #tpu.dot_dimension_numbers<[1], [0], [0], [1], [0, 0, 1, 1], [], []>} : vector<64x16xbf16>, vector<16x32xbf16>, vector<64x32xf32> -> vector<64x32xf32>
    %24 = arith.addf %16, %23 : vector<64x32xf32>
    %c0_24 = arith.constant 0 : index
    %c0_25 = arith.constant 0 : index
    %c1_26 = arith.constant 1 : index
    %c0_27 = arith.constant 0 : index
    %c0_28 = arith.constant 0 : index
    %25 = vector.load %arg1[%c0_24, %c0_25, %c1_26, %c0_27, %c0_28] : memref<1x1x10x10x16xf32, #tpu.memory_space<vmem>>, vector<1x1x8x8x16xf32>
    %26 = vector.shape_cast %25 : vector<1x1x8x8x16xf32> to vector<8x8x16xf32>
    %27 = vector.shape_cast %26 : vector<8x8x16xf32> to vector<64x16xf32>
    %28 = arith.truncf %27 : vector<64x16xf32> to vector<64x16xbf16>
    %c3 = arith.constant 3 : index
    %c0_29 = arith.constant 0 : index
    %c0_30 = arith.constant 0 : index
    %29 = vector.load %arg2[%c3, %c0_29, %c0_30] : memref<9x16x32xbf16, #tpu.memory_space<vmem>>, vector<1x16x32xbf16>
    %30 = vector.shape_cast %29 : vector<1x16x32xbf16> to vector<16x32xbf16>
    %cst_31 = arith.constant dense<0.000000e+00> : vector<64x32xf32>
    %31 = tpu.matmul %28, %30, %cst_31 {dimension_numbers = #tpu.dot_dimension_numbers<[1], [0], [0], [1], [0, 0, 1, 1], [], []>} : vector<64x16xbf16>, vector<16x32xbf16>, vector<64x32xf32> -> vector<64x32xf32>
    %32 = arith.addf %24, %31 : vector<64x32xf32>
    %c0_32 = arith.constant 0 : index
    %c0_33 = arith.constant 0 : index
    %c1_34 = arith.constant 1 : index
    %c1_35 = arith.constant 1 : index
    %c0_36 = arith.constant 0 : index
    %33 = vector.load %arg1[%c0_32, %c0_33, %c1_34, %c1_35, %c0_36] : memref<1x1x10x10x16xf32, #tpu.memory_space<vmem>>, vector<1x1x8x8x16xf32>
    %34 = vector.shape_cast %33 : vector<1x1x8x8x16xf32> to vector<8x8x16xf32>
    %35 = vector.shape_cast %34 : vector<8x8x16xf32> to vector<64x16xf32>
    %36 = arith.truncf %35 : vector<64x16xf32> to vector<64x16xbf16>
    %c4 = arith.constant 4 : index
    %c0_37 = arith.constant 0 : index
    %c0_38 = arith.constant 0 : index
    %37 = vector.load %arg2[%c4, %c0_37, %c0_38] : memref<9x16x32xbf16, #tpu.memory_space<vmem>>, vector<1x16x32xbf16>
    %38 = vector.shape_cast %37 : vector<1x16x32xbf16> to vector<16x32xbf16>
    %cst_39 = arith.constant dense<0.000000e+00> : vector<64x32xf32>
    %39 = tpu.matmul %36, %38, %cst_39 {dimension_numbers = #tpu.dot_dimension_numbers<[1], [0], [0], [1], [0, 0, 1, 1], [], []>} : vector<64x16xbf16>, vector<16x32xbf16>, vector<64x32xf32> -> vector<64x32xf32>
    %40 = arith.addf %32, %39 : vector<64x32xf32>
    %c0_40 = arith.constant 0 : index
    %c0_41 = arith.constant 0 : index
    %c1_42 = arith.constant 1 : index
    %c2_43 = arith.constant 2 : index
    %c0_44 = arith.constant 0 : index
    %41 = vector.load %arg1[%c0_40, %c0_41, %c1_42, %c2_43, %c0_44] : memref<1x1x10x10x16xf32, #tpu.memory_space<vmem>>, vector<1x1x8x8x16xf32>
    %42 = vector.shape_cast %41 : vector<1x1x8x8x16xf32> to vector<8x8x16xf32>
    %43 = vector.shape_cast %42 : vector<8x8x16xf32> to vector<64x16xf32>
    %44 = arith.truncf %43 : vector<64x16xf32> to vector<64x16xbf16>
    %c5 = arith.constant 5 : index
    %c0_45 = arith.constant 0 : index
    %c0_46 = arith.constant 0 : index
    %45 = vector.load %arg2[%c5, %c0_45, %c0_46] : memref<9x16x32xbf16, #tpu.memory_space<vmem>>, vector<1x16x32xbf16>
    %46 = vector.shape_cast %45 : vector<1x16x32xbf16> to vector<16x32xbf16>
    %cst_47 = arith.constant dense<0.000000e+00> : vector<64x32xf32>
    %47 = tpu.matmul %44, %46, %cst_47 {dimension_numbers = #tpu.dot_dimension_numbers<[1], [0], [0], [1], [0, 0, 1, 1], [], []>} : vector<64x16xbf16>, vector<16x32xbf16>, vector<64x32xf32> -> vector<64x32xf32>
    %48 = arith.addf %40, %47 : vector<64x32xf32>
    %c0_48 = arith.constant 0 : index
    %c0_49 = arith.constant 0 : index
    %c2_50 = arith.constant 2 : index
    %c0_51 = arith.constant 0 : index
    %c0_52 = arith.constant 0 : index
    %49 = vector.load %arg1[%c0_48, %c0_49, %c2_50, %c0_51, %c0_52] : memref<1x1x10x10x16xf32, #tpu.memory_space<vmem>>, vector<1x1x8x8x16xf32>
    %50 = vector.shape_cast %49 : vector<1x1x8x8x16xf32> to vector<8x8x16xf32>
    %51 = vector.shape_cast %50 : vector<8x8x16xf32> to vector<64x16xf32>
    %52 = arith.truncf %51 : vector<64x16xf32> to vector<64x16xbf16>
    %c6 = arith.constant 6 : index
    %c0_53 = arith.constant 0 : index
    %c0_54 = arith.constant 0 : index
    %53 = vector.load %arg2[%c6, %c0_53, %c0_54] : memref<9x16x32xbf16, #tpu.memory_space<vmem>>, vector<1x16x32xbf16>
    %54 = vector.shape_cast %53 : vector<1x16x32xbf16> to vector<16x32xbf16>
    %cst_55 = arith.constant dense<0.000000e+00> : vector<64x32xf32>
    %55 = tpu.matmul %52, %54, %cst_55 {dimension_numbers = #tpu.dot_dimension_numbers<[1], [0], [0], [1], [0, 0, 1, 1], [], []>} : vector<64x16xbf16>, vector<16x32xbf16>, vector<64x32xf32> -> vector<64x32xf32>
    %56 = arith.addf %48, %55 : vector<64x32xf32>
    %c0_56 = arith.constant 0 : index
    %c0_57 = arith.constant 0 : index
    %c2_58 = arith.constant 2 : index
    %c1_59 = arith.constant 1 : index
    %c0_60 = arith.constant 0 : index
    %57 = vector.load %arg1[%c0_56, %c0_57, %c2_58, %c1_59, %c0_60] : memref<1x1x10x10x16xf32, #tpu.memory_space<vmem>>, vector<1x1x8x8x16xf32>
    %58 = vector.shape_cast %57 : vector<1x1x8x8x16xf32> to vector<8x8x16xf32>
    %59 = vector.shape_cast %58 : vector<8x8x16xf32> to vector<64x16xf32>
    %60 = arith.truncf %59 : vector<64x16xf32> to vector<64x16xbf16>
    %c7 = arith.constant 7 : index
    %c0_61 = arith.constant 0 : index
    %c0_62 = arith.constant 0 : index
    %61 = vector.load %arg2[%c7, %c0_61, %c0_62] : memref<9x16x32xbf16, #tpu.memory_space<vmem>>, vector<1x16x32xbf16>
    %62 = vector.shape_cast %61 : vector<1x16x32xbf16> to vector<16x32xbf16>
    %cst_63 = arith.constant dense<0.000000e+00> : vector<64x32xf32>
    %63 = tpu.matmul %60, %62, %cst_63 {dimension_numbers = #tpu.dot_dimension_numbers<[1], [0], [0], [1], [0, 0, 1, 1], [], []>} : vector<64x16xbf16>, vector<16x32xbf16>, vector<64x32xf32> -> vector<64x32xf32>
    %64 = arith.addf %56, %63 : vector<64x32xf32>
    %c0_64 = arith.constant 0 : index
    %c0_65 = arith.constant 0 : index
    %c2_66 = arith.constant 2 : index
    %c2_67 = arith.constant 2 : index
    %c0_68 = arith.constant 0 : index
    %65 = vector.load %arg1[%c0_64, %c0_65, %c2_66, %c2_67, %c0_68] : memref<1x1x10x10x16xf32, #tpu.memory_space<vmem>>, vector<1x1x8x8x16xf32>
    %66 = vector.shape_cast %65 : vector<1x1x8x8x16xf32> to vector<8x8x16xf32>
    %67 = vector.shape_cast %66 : vector<8x8x16xf32> to vector<64x16xf32>
    %68 = arith.truncf %67 : vector<64x16xf32> to vector<64x16xbf16>
    %c8 = arith.constant 8 : index
    %c0_69 = arith.constant 0 : index
    %c0_70 = arith.constant 0 : index
    %69 = vector.load %arg2[%c8, %c0_69, %c0_70] : memref<9x16x32xbf16, #tpu.memory_space<vmem>>, vector<1x16x32xbf16>
    %70 = vector.shape_cast %69 : vector<1x16x32xbf16> to vector<16x32xbf16>
    %cst_71 = arith.constant dense<0.000000e+00> : vector<64x32xf32>
    %71 = tpu.matmul %68, %70, %cst_71 {dimension_numbers = #tpu.dot_dimension_numbers<[1], [0], [0], [1], [0, 0, 1, 1], [], []>} : vector<64x16xbf16>, vector<16x32xbf16>, vector<64x32xf32> -> vector<64x32xf32>
    %72 = arith.addf %64, %71 : vector<64x32xf32>
    %c0_72 = arith.constant 0 : index
    %c0_73 = arith.constant 0 : index
    %73 = vector.load %arg3[%c0_72, %c0_73] : memref<1x32xf32, #tpu.memory_space<vmem>>, vector<1x32xf32>
    %74 = vector.broadcast %73 : vector<1x32xf32> to vector<64x32xf32>
    %75 = arith.addf %72, %74 : vector<64x32xf32>
    %c0_74 = arith.constant 0 : index
    %c0_75 = arith.constant 0 : index
    %c0_76 = arith.constant 0 : index
    %c0_77 = arith.constant 0 : index
    %76 = vector.load %arg4[%c0_74, %c0_75, %c0_76, %c0_77] : memref<1x8x8x32xf32, #tpu.memory_space<vmem>>, vector<1x8x8x32xf32>
    %77 = vector.shape_cast %76 : vector<1x8x8x32xf32> to vector<8x8x32xf32>
    %78 = vector.shape_cast %77 : vector<8x8x32xf32> to vector<64x32xf32>
    %cst_78 = arith.constant 2.000000e-01 : f32
    %79 = vector.broadcast %cst_78 : f32 to vector<64x32xf32>
    %80 = arith.mulf %79, %78 : vector<64x32xf32>
    %81 = arith.addf %75, %80 : vector<64x32xf32>
    %82 = vector.shape_cast %81 : vector<64x32xf32> to vector<8x8x32xf32>
    %c0_79 = arith.constant 0 : index
    %c0_80 = arith.constant 0 : index
    %c0_81 = arith.constant 0 : index
    %c0_82 = arith.constant 0 : index
    %83 = vector.load %arg5[%c0_79, %c0_80, %c0_81, %c0_82] : memref<1x8x8x32xf32, #tpu.memory_space<vmem>>, vector<1x8x8x32xf32>
    %84 = vector.shape_cast %83 : vector<1x8x8x32xf32> to vector<8x8x32xf32>
    %85 = vector.shape_cast %82 : vector<8x8x32xf32> to vector<1x8x8x32xf32>
    tpu.vector_store %arg5[%c0_79, %c0_80, %c0_81, %c0_82], %85 {strides = array<i32>} : memref<1x8x8x32xf32, #tpu.memory_space<vmem>>, vector<1x8x8x32xf32>,
    return
  }
  func.func @transform_0(%arg0: i32) -> (i32, i32, i32, i32, i32) {
    %c0_i32 = arith.constant 0 : i32
    %c0_i32_0 = arith.constant 0 : i32
    %c0_i32_1 = arith.constant 0 : i32
    %c0_i32_2 = arith.constant 0 : i32
    %c0_i32_3 = arith.constant 0 : i32
    return %arg0, %c0_i32, %c0_i32_0, %c0_i32_1, %c0_i32_2 : i32, i32, i32, i32, i32
  }
  func.func @transform_1(%arg0: i32) -> (i32, i32, i32) {
    %c0_i32 = arith.constant 0 : i32
    %c0_i32_0 = arith.constant 0 : i32
    %c0_i32_1 = arith.constant 0 : i32
    %c0_i32_2 = arith.constant 0 : i32
    return %c0_i32, %c0_i32_0, %c0_i32_1 : i32, i32, i32
  }
  func.func @transform_2(%arg0: i32) -> (i32, i32) {
    %c0_i32 = arith.constant 0 : i32
    %c0_i32_0 = arith.constant 0 : i32
    %c0_i32_1 = arith.constant 0 : i32
    return %c0_i32, %c0_i32_0 : i32, i32
  }
  func.func @transform_3(%arg0: i32) -> (i32, i32, i32, i32) {
    %c0_i32 = arith.constant 0 : i32
    %c0_i32_0 = arith.constant 0 : i32
    %c0_i32_1 = arith.constant 0 : i32
    %c0_i32_2 = arith.constant 0 : i32
    return %arg0, %c0_i32, %c0_i32_0, %c0_i32_1 : i32, i32, i32, i32
  }
  func.func @transform_4(%arg0: i32) -> (i32, i32, i32, i32) {
    %c0_i32 = arith.constant 0 : i32
    %c0_i32_0 = arith.constant 0 : i32
    %c0_i32_1 = arith.constant 0 : i32
    %c0_i32_2 = arith.constant 0 : i32
    return %arg0, %c0_i32, %c0_i32_0, %c0_i32_1 : i32, i32, i32, i32
  }
}

module attributes {stable_mosaic.version = 11 : i64} {
  func.func @_conv_tap_kernel(%arg0: i32, %arg1: memref<1x1x18x18x32xf32, #tpu.memory_space<vmem>>, %arg2: memref<9x32x3xbf16, #tpu.memory_space<vmem>>, %arg3: memref<1x3xf32, #tpu.memory_space<vmem>>, %arg4: memref<1x16x16x3xf32, #tpu.memory_space<vmem>>) attributes {dimension_semantics = [#tpu.dimension_semantics<parallel>], iteration_bounds = array<i64: 2>, scalar_prefetch = 0 : i64, scratch_operands = 0 : i64, tpu.core_type = #tpu.core_type<tc>, window_params = [{transform_indices = @transform_0, window_bounds = array<i64: 1, 1, 18, 18, 32>}, {pipeline_mode = #tpu.pipeline_mode<synchronous>, transform_indices = @transform_1, window_bounds = array<i64: 9, 32, 3>}, {pipeline_mode = #tpu.pipeline_mode<synchronous>, transform_indices = @transform_2, window_bounds = array<i64: 1, 3>}, {transform_indices = @transform_3, window_bounds = array<i64: 1, 16, 16, 3>}]} {
    %cst = arith.constant 0.000000e+00 : f32
    %0 = vector.broadcast %cst : f32 to vector<256x3xf32>
    %c0 = arith.constant 0 : index
    %c0_0 = arith.constant 0 : index
    %c0_1 = arith.constant 0 : index
    %c0_2 = arith.constant 0 : index
    %c0_3 = arith.constant 0 : index
    %1 = vector.load %arg1[%c0, %c0_0, %c0_1, %c0_2, %c0_3] : memref<1x1x18x18x32xf32, #tpu.memory_space<vmem>>, vector<1x1x16x16x32xf32>
    %2 = vector.shape_cast %1 : vector<1x1x16x16x32xf32> to vector<16x16x32xf32>
    %3 = vector.shape_cast %2 : vector<16x16x32xf32> to vector<256x32xf32>
    %4 = arith.truncf %3 : vector<256x32xf32> to vector<256x32xbf16>
    %c0_4 = arith.constant 0 : index
    %c0_5 = arith.constant 0 : index
    %c0_6 = arith.constant 0 : index
    %5 = vector.load %arg2[%c0_4, %c0_5, %c0_6] : memref<9x32x3xbf16, #tpu.memory_space<vmem>>, vector<1x32x3xbf16>
    %6 = vector.shape_cast %5 : vector<1x32x3xbf16> to vector<32x3xbf16>
    %cst_7 = arith.constant dense<0.000000e+00> : vector<256x3xf32>
    %7 = tpu.matmul %4, %6, %cst_7 {dimension_numbers = #tpu.dot_dimension_numbers<[1], [0], [0], [1], [0, 0, 1, 1], [], []>} : vector<256x32xbf16>, vector<32x3xbf16>, vector<256x3xf32> -> vector<256x3xf32>
    %8 = arith.addf %0, %7 : vector<256x3xf32>
    %c0_8 = arith.constant 0 : index
    %c0_9 = arith.constant 0 : index
    %c0_10 = arith.constant 0 : index
    %c1 = arith.constant 1 : index
    %c0_11 = arith.constant 0 : index
    %9 = vector.load %arg1[%c0_8, %c0_9, %c0_10, %c1, %c0_11] : memref<1x1x18x18x32xf32, #tpu.memory_space<vmem>>, vector<1x1x16x16x32xf32>
    %10 = vector.shape_cast %9 : vector<1x1x16x16x32xf32> to vector<16x16x32xf32>
    %11 = vector.shape_cast %10 : vector<16x16x32xf32> to vector<256x32xf32>
    %12 = arith.truncf %11 : vector<256x32xf32> to vector<256x32xbf16>
    %c1_12 = arith.constant 1 : index
    %c0_13 = arith.constant 0 : index
    %c0_14 = arith.constant 0 : index
    %13 = vector.load %arg2[%c1_12, %c0_13, %c0_14] : memref<9x32x3xbf16, #tpu.memory_space<vmem>>, vector<1x32x3xbf16>
    %14 = vector.shape_cast %13 : vector<1x32x3xbf16> to vector<32x3xbf16>
    %cst_15 = arith.constant dense<0.000000e+00> : vector<256x3xf32>
    %15 = tpu.matmul %12, %14, %cst_15 {dimension_numbers = #tpu.dot_dimension_numbers<[1], [0], [0], [1], [0, 0, 1, 1], [], []>} : vector<256x32xbf16>, vector<32x3xbf16>, vector<256x3xf32> -> vector<256x3xf32>
    %16 = arith.addf %8, %15 : vector<256x3xf32>
    %c0_16 = arith.constant 0 : index
    %c0_17 = arith.constant 0 : index
    %c0_18 = arith.constant 0 : index
    %c2 = arith.constant 2 : index
    %c0_19 = arith.constant 0 : index
    %17 = vector.load %arg1[%c0_16, %c0_17, %c0_18, %c2, %c0_19] : memref<1x1x18x18x32xf32, #tpu.memory_space<vmem>>, vector<1x1x16x16x32xf32>
    %18 = vector.shape_cast %17 : vector<1x1x16x16x32xf32> to vector<16x16x32xf32>
    %19 = vector.shape_cast %18 : vector<16x16x32xf32> to vector<256x32xf32>
    %20 = arith.truncf %19 : vector<256x32xf32> to vector<256x32xbf16>
    %c2_20 = arith.constant 2 : index
    %c0_21 = arith.constant 0 : index
    %c0_22 = arith.constant 0 : index
    %21 = vector.load %arg2[%c2_20, %c0_21, %c0_22] : memref<9x32x3xbf16, #tpu.memory_space<vmem>>, vector<1x32x3xbf16>
    %22 = vector.shape_cast %21 : vector<1x32x3xbf16> to vector<32x3xbf16>
    %cst_23 = arith.constant dense<0.000000e+00> : vector<256x3xf32>
    %23 = tpu.matmul %20, %22, %cst_23 {dimension_numbers = #tpu.dot_dimension_numbers<[1], [0], [0], [1], [0, 0, 1, 1], [], []>} : vector<256x32xbf16>, vector<32x3xbf16>, vector<256x3xf32> -> vector<256x3xf32>
    %24 = arith.addf %16, %23 : vector<256x3xf32>
    %c0_24 = arith.constant 0 : index
    %c0_25 = arith.constant 0 : index
    %c1_26 = arith.constant 1 : index
    %c0_27 = arith.constant 0 : index
    %c0_28 = arith.constant 0 : index
    %25 = vector.load %arg1[%c0_24, %c0_25, %c1_26, %c0_27, %c0_28] : memref<1x1x18x18x32xf32, #tpu.memory_space<vmem>>, vector<1x1x16x16x32xf32>
    %26 = vector.shape_cast %25 : vector<1x1x16x16x32xf32> to vector<16x16x32xf32>
    %27 = vector.shape_cast %26 : vector<16x16x32xf32> to vector<256x32xf32>
    %28 = arith.truncf %27 : vector<256x32xf32> to vector<256x32xbf16>
    %c3 = arith.constant 3 : index
    %c0_29 = arith.constant 0 : index
    %c0_30 = arith.constant 0 : index
    %29 = vector.load %arg2[%c3, %c0_29, %c0_30] : memref<9x32x3xbf16, #tpu.memory_space<vmem>>, vector<1x32x3xbf16>
    %30 = vector.shape_cast %29 : vector<1x32x3xbf16> to vector<32x3xbf16>
    %cst_31 = arith.constant dense<0.000000e+00> : vector<256x3xf32>
    %31 = tpu.matmul %28, %30, %cst_31 {dimension_numbers = #tpu.dot_dimension_numbers<[1], [0], [0], [1], [0, 0, 1, 1], [], []>} : vector<256x32xbf16>, vector<32x3xbf16>, vector<256x3xf32> -> vector<256x3xf32>
    %32 = arith.addf %24, %31 : vector<256x3xf32>
    %c0_32 = arith.constant 0 : index
    %c0_33 = arith.constant 0 : index
    %c1_34 = arith.constant 1 : index
    %c1_35 = arith.constant 1 : index
    %c0_36 = arith.constant 0 : index
    %33 = vector.load %arg1[%c0_32, %c0_33, %c1_34, %c1_35, %c0_36] : memref<1x1x18x18x32xf32, #tpu.memory_space<vmem>>, vector<1x1x16x16x32xf32>
    %34 = vector.shape_cast %33 : vector<1x1x16x16x32xf32> to vector<16x16x32xf32>
    %35 = vector.shape_cast %34 : vector<16x16x32xf32> to vector<256x32xf32>
    %36 = arith.truncf %35 : vector<256x32xf32> to vector<256x32xbf16>
    %c4 = arith.constant 4 : index
    %c0_37 = arith.constant 0 : index
    %c0_38 = arith.constant 0 : index
    %37 = vector.load %arg2[%c4, %c0_37, %c0_38] : memref<9x32x3xbf16, #tpu.memory_space<vmem>>, vector<1x32x3xbf16>
    %38 = vector.shape_cast %37 : vector<1x32x3xbf16> to vector<32x3xbf16>
    %cst_39 = arith.constant dense<0.000000e+00> : vector<256x3xf32>
    %39 = tpu.matmul %36, %38, %cst_39 {dimension_numbers = #tpu.dot_dimension_numbers<[1], [0], [0], [1], [0, 0, 1, 1], [], []>} : vector<256x32xbf16>, vector<32x3xbf16>, vector<256x3xf32> -> vector<256x3xf32>
    %40 = arith.addf %32, %39 : vector<256x3xf32>
    %c0_40 = arith.constant 0 : index
    %c0_41 = arith.constant 0 : index
    %c1_42 = arith.constant 1 : index
    %c2_43 = arith.constant 2 : index
    %c0_44 = arith.constant 0 : index
    %41 = vector.load %arg1[%c0_40, %c0_41, %c1_42, %c2_43, %c0_44] : memref<1x1x18x18x32xf32, #tpu.memory_space<vmem>>, vector<1x1x16x16x32xf32>
    %42 = vector.shape_cast %41 : vector<1x1x16x16x32xf32> to vector<16x16x32xf32>
    %43 = vector.shape_cast %42 : vector<16x16x32xf32> to vector<256x32xf32>
    %44 = arith.truncf %43 : vector<256x32xf32> to vector<256x32xbf16>
    %c5 = arith.constant 5 : index
    %c0_45 = arith.constant 0 : index
    %c0_46 = arith.constant 0 : index
    %45 = vector.load %arg2[%c5, %c0_45, %c0_46] : memref<9x32x3xbf16, #tpu.memory_space<vmem>>, vector<1x32x3xbf16>
    %46 = vector.shape_cast %45 : vector<1x32x3xbf16> to vector<32x3xbf16>
    %cst_47 = arith.constant dense<0.000000e+00> : vector<256x3xf32>
    %47 = tpu.matmul %44, %46, %cst_47 {dimension_numbers = #tpu.dot_dimension_numbers<[1], [0], [0], [1], [0, 0, 1, 1], [], []>} : vector<256x32xbf16>, vector<32x3xbf16>, vector<256x3xf32> -> vector<256x3xf32>
    %48 = arith.addf %40, %47 : vector<256x3xf32>
    %c0_48 = arith.constant 0 : index
    %c0_49 = arith.constant 0 : index
    %c2_50 = arith.constant 2 : index
    %c0_51 = arith.constant 0 : index
    %c0_52 = arith.constant 0 : index
    %49 = vector.load %arg1[%c0_48, %c0_49, %c2_50, %c0_51, %c0_52] : memref<1x1x18x18x32xf32, #tpu.memory_space<vmem>>, vector<1x1x16x16x32xf32>
    %50 = vector.shape_cast %49 : vector<1x1x16x16x32xf32> to vector<16x16x32xf32>
    %51 = vector.shape_cast %50 : vector<16x16x32xf32> to vector<256x32xf32>
    %52 = arith.truncf %51 : vector<256x32xf32> to vector<256x32xbf16>
    %c6 = arith.constant 6 : index
    %c0_53 = arith.constant 0 : index
    %c0_54 = arith.constant 0 : index
    %53 = vector.load %arg2[%c6, %c0_53, %c0_54] : memref<9x32x3xbf16, #tpu.memory_space<vmem>>, vector<1x32x3xbf16>
    %54 = vector.shape_cast %53 : vector<1x32x3xbf16> to vector<32x3xbf16>
    %cst_55 = arith.constant dense<0.000000e+00> : vector<256x3xf32>
    %55 = tpu.matmul %52, %54, %cst_55 {dimension_numbers = #tpu.dot_dimension_numbers<[1], [0], [0], [1], [0, 0, 1, 1], [], []>} : vector<256x32xbf16>, vector<32x3xbf16>, vector<256x3xf32> -> vector<256x3xf32>
    %56 = arith.addf %48, %55 : vector<256x3xf32>
    %c0_56 = arith.constant 0 : index
    %c0_57 = arith.constant 0 : index
    %c2_58 = arith.constant 2 : index
    %c1_59 = arith.constant 1 : index
    %c0_60 = arith.constant 0 : index
    %57 = vector.load %arg1[%c0_56, %c0_57, %c2_58, %c1_59, %c0_60] : memref<1x1x18x18x32xf32, #tpu.memory_space<vmem>>, vector<1x1x16x16x32xf32>
    %58 = vector.shape_cast %57 : vector<1x1x16x16x32xf32> to vector<16x16x32xf32>
    %59 = vector.shape_cast %58 : vector<16x16x32xf32> to vector<256x32xf32>
    %60 = arith.truncf %59 : vector<256x32xf32> to vector<256x32xbf16>
    %c7 = arith.constant 7 : index
    %c0_61 = arith.constant 0 : index
    %c0_62 = arith.constant 0 : index
    %61 = vector.load %arg2[%c7, %c0_61, %c0_62] : memref<9x32x3xbf16, #tpu.memory_space<vmem>>, vector<1x32x3xbf16>
    %62 = vector.shape_cast %61 : vector<1x32x3xbf16> to vector<32x3xbf16>
    %cst_63 = arith.constant dense<0.000000e+00> : vector<256x3xf32>
    %63 = tpu.matmul %60, %62, %cst_63 {dimension_numbers = #tpu.dot_dimension_numbers<[1], [0], [0], [1], [0, 0, 1, 1], [], []>} : vector<256x32xbf16>, vector<32x3xbf16>, vector<256x3xf32> -> vector<256x3xf32>
    %64 = arith.addf %56, %63 : vector<256x3xf32>
    %c0_64 = arith.constant 0 : index
    %c0_65 = arith.constant 0 : index
    %c2_66 = arith.constant 2 : index
    %c2_67 = arith.constant 2 : index
    %c0_68 = arith.constant 0 : index
    %65 = vector.load %arg1[%c0_64, %c0_65, %c2_66, %c2_67, %c0_68] : memref<1x1x18x18x32xf32, #tpu.memory_space<vmem>>, vector<1x1x16x16x32xf32>
    %66 = vector.shape_cast %65 : vector<1x1x16x16x32xf32> to vector<16x16x32xf32>
    %67 = vector.shape_cast %66 : vector<16x16x32xf32> to vector<256x32xf32>
    %68 = arith.truncf %67 : vector<256x32xf32> to vector<256x32xbf16>
    %c8 = arith.constant 8 : index
    %c0_69 = arith.constant 0 : index
    %c0_70 = arith.constant 0 : index
    %69 = vector.load %arg2[%c8, %c0_69, %c0_70] : memref<9x32x3xbf16, #tpu.memory_space<vmem>>, vector<1x32x3xbf16>
    %70 = vector.shape_cast %69 : vector<1x32x3xbf16> to vector<32x3xbf16>
    %cst_71 = arith.constant dense<0.000000e+00> : vector<256x3xf32>
    %71 = tpu.matmul %68, %70, %cst_71 {dimension_numbers = #tpu.dot_dimension_numbers<[1], [0], [0], [1], [0, 0, 1, 1], [], []>} : vector<256x32xbf16>, vector<32x3xbf16>, vector<256x3xf32> -> vector<256x3xf32>
    %72 = arith.addf %64, %71 : vector<256x3xf32>
    %c0_72 = arith.constant 0 : index
    %c0_73 = arith.constant 0 : index
    %73 = vector.load %arg3[%c0_72, %c0_73] : memref<1x3xf32, #tpu.memory_space<vmem>>, vector<1x3xf32>
    %74 = vector.broadcast %73 : vector<1x3xf32> to vector<256x3xf32>
    %75 = arith.addf %72, %74 : vector<256x3xf32>
    %76 = arith.negf %75 : vector<256x3xf32>
    %77 = math.exp %76 : vector<256x3xf32>
    %cst_74 = arith.constant 1.000000e+00 : f32
    %78 = vector.broadcast %cst_74 : f32 to vector<256x3xf32>
    %79 = arith.addf %78, %77 : vector<256x3xf32>
    %80 = arith.divf %78, %79 : vector<256x3xf32>
    %81 = vector.shape_cast %80 : vector<256x3xf32> to vector<16x16x3xf32>
    %c0_75 = arith.constant 0 : index
    %c0_76 = arith.constant 0 : index
    %c0_77 = arith.constant 0 : index
    %c0_78 = arith.constant 0 : index
    %82 = vector.load %arg4[%c0_75, %c0_76, %c0_77, %c0_78] : memref<1x16x16x3xf32, #tpu.memory_space<vmem>>, vector<1x16x16x3xf32>
    %83 = vector.shape_cast %82 : vector<1x16x16x3xf32> to vector<16x16x3xf32>
    %84 = vector.shape_cast %81 : vector<16x16x3xf32> to vector<1x16x16x3xf32>
    tpu.vector_store %arg4[%c0_75, %c0_76, %c0_77, %c0_78], %84 {strides = array<i32>} : memref<1x16x16x3xf32, #tpu.memory_space<vmem>>, vector<1x16x16x3xf32>,
    return
  }
  func.func @transform_0(%arg0: i32) -> (i32, i32, i32, i32, i32) {
    %c0_i32 = arith.constant 0 : i32
    %c0_i32_0 = arith.constant 0 : i32
    %c0_i32_1 = arith.constant 0 : i32
    %c0_i32_2 = arith.constant 0 : i32
    %c0_i32_3 = arith.constant 0 : i32
    return %arg0, %c0_i32, %c0_i32_0, %c0_i32_1, %c0_i32_2 : i32, i32, i32, i32, i32
  }
  func.func @transform_1(%arg0: i32) -> (i32, i32, i32) {
    %c0_i32 = arith.constant 0 : i32
    %c0_i32_0 = arith.constant 0 : i32
    %c0_i32_1 = arith.constant 0 : i32
    %c0_i32_2 = arith.constant 0 : i32
    return %c0_i32, %c0_i32_0, %c0_i32_1 : i32, i32, i32
  }
  func.func @transform_2(%arg0: i32) -> (i32, i32) {
    %c0_i32 = arith.constant 0 : i32
    %c0_i32_0 = arith.constant 0 : i32
    %c0_i32_1 = arith.constant 0 : i32
    return %c0_i32, %c0_i32_0 : i32, i32
  }
  func.func @transform_3(%arg0: i32) -> (i32, i32, i32, i32) {
    %c0_i32 = arith.constant 0 : i32
    %c0_i32_0 = arith.constant 0 : i32
    %c0_i32_1 = arith.constant 0 : i32
    %c0_i32_2 = arith.constant 0 : i32
    return %arg0, %c0_i32, %c0_i32_0, %c0_i32_1 : i32, i32, i32, i32
  }
}

</mosaic_0001>

<bundles_post_ra>
// kernel: fwd.16
= control target key start
LH: loop header
LB: loop body
LE: loop exit
PB: predicated region body
PF: predicated region fallthrough
CT: control target
= control target key end

     0   :  { %s682_s21 = smov 0   ;;  %s761_s0 = inlined_call_operand.vmem [shape: f32[2,64,32], index: 0, kind: input, shape index: {}]   ;;  %s762_s1 = inlined_call_operand.vmem [shape: f32[2,64,32], index: 1, kind: input, shape index: {}]   ;;  %s763_s2 = inlined_call_operand.vmem [shape: f32[32,2], index: 2, kind: input, shape index: {}]   ;;  %s764_s3 = inlined_call_operand.vmem [shape: f32[1,2], index: 3, kind: input, shape index: {}]   ;;  %s765_s4 = inlined_call_operand.vmem [shape: f32[2,32], index: 4, kind: input, shape index: {}]   ;;  %s766_s5 = inlined_call_operand.vmem [shape: f32[1,32], index: 5, kind: input, shape index: {}]   ;;  %s767_s6 = inlined_call_operand.vmem [shape: f32[2,64,32], index: 6, kind: output, shape index: {}]  }
   0x1 LB: > { %s572_s22 = sadd.s32 4294967295, %s642_s21   ;;  %p576_p0 = scmp.ge.s32.totalorder %s642_s21, 1  ;;  %s642_s21 = sphi %s682_s21, %s16_s21  }
   0x2   : > { %p222_p1 = scmp.lt.s32.totalorder %s642_s21, 3 }
   0x4   : > { %p223_p2 = pnand %p576_p0, %p222_p1 }
   0x5   : > { %v304_v0 = vld [vmem:[%s763_s2] sm:$0xff] (!%p223_p2)  ;;  %v305_v1 = vld [vmem:[%s763_s2 + $0x8] sm:$0xff] (!%p223_p2)  ;;  %v306_v2 = vld [vmem:[%s763_s2 + $0x10] sm:$0xff] (!%p223_p2)  ;;  %v644_v3 = vmov (!%p223_p2), 0.0|0.0   ;;  %vm645_vm0 = vmmov (!%p223_p2), 0   ;;  %v646_v6 = vmov (!%p223_p2), 0.0   ;;  %v477_v51 = vlaneseq (!%p223_p2) }
   0x6   : > { %226 = sbr.rel (%p223_p2) target bundleno = 512 (0x200), region = 44  ;;  %615 = vmatprep.subr.bf16.mxu0 (!%p223_p2), %v644_v3  ;;  %v616_v4 = vpack.c.bf16 (!%p223_p2), %v305_v1, %v304_v0  ;;  %v307_v5 = vld [vmem:[%s763_s2 + $0x18] sm:$0xff] (!%p223_p2)  ;;  %607 = vmatprep.mubr.msk.f32.mxu0 (!%p223_p2), %vm645_vm0, %v646_v6  ;;  %p257_p3 = scmp.lt.s32.totalorder (!%p223_p2), %s572_s22, 1  ;;  %vm280_vm1 = vcmask (!%p223_p2), 261120   ;;  %v383_v38 = vld [vmem:[%s765_s4] sm:$0x3] (!%p223_p2) }
   0x7   : > { %610 = vmatprep.subr.mxu1 (!%p223_p2), %v646_v6  ;;  %612 = vmatprep.mubr.msk.f32.mxu1 (!%p223_p2), %vm645_vm0, %v646_v6  ;;  %v619_v7 = vpack.c.bf16 (!%p223_p2), %v307_v5, %v306_v2  ;;  %vm389_vm2 = vcmask (!%p223_p2), 1041408   ;;  %v308_v39 = vld [vmem:[%s764_s3] sm:$0x1] (!%p223_p2)  ;;  %vm385_vm3 = vcmask (!%p223_p2), 15360   ;;  %v478_v52 = vshrl.u32 (!%p223_p2), %v477_v51, 7 }
   0x8   : > { %617 = vmatpush3.bf16.msra.mxu0 (!%p223_p2), %v616_v4  ;;  %611 = vmatpush3.msk.msra.mxu1 (!%p223_p2), %vm389_vm2, %v383_v38  ;;  %v384_v44 = vld [vmem:[%s766_s5] sm:$0x1] (!%p223_p2) }
   0x9   : > { %618 = vmatprep.subr.bf16.mxu0 (!%p223_p2), %v644_v3  ;;  %v479_v53 = vsub.s32 (!%p223_p2), 0, %v478_v52 }
   0xc   : > { %620 = vmatpush3.bf16.msra.mxu0 (!%p223_p2), %v619_v7 }
   0xd   : > { %s769_s22 = smov (!%p257_p3, %s572_s22), 1 }
   0xe   : > { %s702_s7 = sshll.u32 %s769_s22, 6 }
   0xf   : > { %s266_s10 = scalar_lea.vmem %s762_s1, %s702_s7  ;;  %s261_s19 = scalar_lea.vmem %s761_s0, %s702_s7 }
  0x10   : > { %v708_v8 = vld [vmem:[%s266_s10] sm:$0xff]  ;;  %v710_v9 = vld [vmem:[%s266_s10 + $0x8] sm:$0xff]  ;;  %v712_v10 = vld [vmem:[%s266_s10 + $0x10] sm:$0xff]  ;;  %s271_s23 = scalar_lea.vmem %s767_s6, %s702_s7 }
  0x11   : > { %v714_v11 = vld [vmem:[%s266_s10 + $0x18] sm:$0xff]  ;;  %v281_v12 = vsel %vm280_vm1, %v708_v8, 0.0  ;;  %v282_v13 = vsel %vm280_vm1, %v710_v9, 0.0  ;;  %v284_v14 = vsel %vm280_vm1, %v712_v10, 0.0  ;;  %v276_v15 = vld [vmem:[%s266_s10 + $0x20] sm:$0xff]  ;;  %v277_v18 = vld [vmem:[%s266_s10 + $0x28] sm:$0xff] }
  0x12   : > { %v283_v16 = vadd.f32 %v282_v13, %v281_v12  ;;  %v286_v17 = vsel %vm280_vm1, %v714_v11, 0.0  ;;  %v288_v20 = vsel %vm280_vm1, %v276_v15, 0.0  ;;  %v278_v21 = vld [vmem:[%s266_s10 + $0x30] sm:$0xff]  ;;  %v290_v23 = vsel %vm280_vm1, %v277_v18, 0.0  ;;  %v279_v24 = vld [vmem:[%s266_s10 + $0x38] sm:$0xff]  ;;  %v469_v55 = vld [vmem:[%s261_s19] sm:$0xff] }
  0x13   : > { %v292_v26 = vsel %vm280_vm1, %v278_v21, 0.0  ;;  %v294_v28 = vsel %vm280_vm1, %v279_v24, 0.0  ;;  %v470_v56 = vld [vmem:[%s261_s19 + $0x8] sm:$0xff]  ;;  %v471_v58 = vld [vmem:[%s261_s19 + $0x10] sm:$0xff]  ;;  %v472_v59 = vld [vmem:[%s261_s19 + $0x18] sm:$0xff] }
  0x14   : > { %v285_v19 = vadd.f32 %v284_v14, %v283_v16  ;;  %v473_v60 = vld [vmem:[%s261_s19 + $0x20] sm:$0xff]  ;;  %v474_v61 = vld [vmem:[%s261_s19 + $0x28] sm:$0xff]  ;;  %v475_v62 = vld [vmem:[%s261_s19 + $0x30] sm:$0xff] }
  0x15   : > { %v476_v63 = vld [vmem:[%s261_s19 + $0x38] sm:$0xff] }
  0x16   : > { %v287_v22 = vadd.f32 %v286_v17, %v285_v19 }
  0x18   : > { %v289_v25 = vadd.f32 %v288_v20, %v287_v22 }
  0x1a   : > { %v291_v27 = vadd.f32 %v290_v23, %v289_v25 }
  0x1c   : > { %v293_v29 = vadd.f32 %v292_v26, %v291_v27 }
  0x1e   : > { %v295_v30 = vadd.f32 %v294_v28, %v293_v29 }
  0x20   : > { %v296_v31 = vrot.slane %v295_v30, 4 }
  0x22   : > { %v297_v32 = vadd.f32 %v296_v31, %v295_v30 }
  0x24   : > { %v298_v33 = vrot.slane %v297_v32, 2 }
  0x26   : > { %v299_v34 = vadd.f32 %v298_v33, %v297_v32 }
  0x28   : > { %v300_v35 = vrot.slane %v299_v34, 1 }
  0x2a   : > { %v301_v36 = vadd.f32 %v300_v35, %v299_v34 }
  0x2c   : > { %v303_v37 = vmul.f32 0.015625, %v301_v36 }
  0x2e   : > { %608 = vmatmul.mubr.msk.f32.vlgmr.msra.gmra.mrb[0].mxu0 %vm280_vm1, %v303_v37 }
 0x101   : > { %v378_v40 = vpop.f32.mrb[0].mxu0 }
 0x102   : > { %v379_v41 = vadd.f32 %v378_v40, %v308_v39  ;;  %v609_v42 = vpop.f32.mrb[1].mxu0 }
 0x104   : > { %v382_v43 = vmax.f32 %v379_v41, 0.0 }
 0x106   : > { %613 = vmatmul.mubr.msk.f32.vlgmr.msra.gmra.mrb[0].mxu1 %vm385_vm3, %v382_v43 }
 0x1d9   : > { %v459_v45 = vpop.f32.mrb[0].mxu1 }
 0x1da   : > { %v460_v46 = vadd.f32 %v459_v45, %v384_v44  ;;  %v614_v47 = vpop.f32.mrb[1].mxu1 }
 0x1dc   : > { %v586_v48 = vmul.f32 -1.442695, %v460_v46 }
 0x1de   : > { %632 = vpow2.f32 %v586_v48 }
 0x1e8   : > { %v633_v49 = vpop.eup %632 }
 0x1e9   : > { %v466_v50 = vadd.f32 1.0, %v633_v49 }
 0x1eb   : > { %634 = vrcp.f32 %v466_v50 }
 0x1f5   : > { %v635_v54 = vpop.eup %634 }
 0x1f6   : > { %v480_v57 = vrot.slane %v635_v54, %v479_v53 }
 0x1f8   : > { %v481_v0 = vmul.f32 %v480_v57, %v708_v8  ;;  %v482_v1 = vmul.f32 %v480_v57, %v710_v9  ;;  %v483_v2 = vmul.f32 %v480_v57, %v712_v10  ;;  %v484_v3 = vmul.f32 %v480_v57, %v714_v11 }
 0x1f9   : > { %v485_v4 = vmul.f32 %v480_v57, %v276_v15  ;;  %v486_v5 = vmul.f32 %v480_v57, %v277_v18  ;;  %v487_v6 = vmul.f32 %v480_v57, %v278_v21  ;;  %v488_v7 = vmul.f32 %v480_v57, %v279_v24 }
 0x1fa   : > { %v489_v12 = vadd.f32 %v481_v0, %v469_v55  ;;  %v490_v13 = vadd.f32 %v482_v1, %v470_v56  ;;  %v491_v14 = vadd.f32 %v483_v2, %v471_v58  ;;  %v492_v16 = vadd.f32 %v484_v3, %v472_v59 }
 0x1fb   : > { %v493_v17 = vadd.f32 %v485_v4, %v473_v60  ;;  %v494_v8 = vadd.f32 %v486_v5, %v474_v61  ;;  %v495_v19 = vadd.f32 %v487_v6, %v475_v62  ;;  %v496_v9 = vadd.f32 %v488_v7, %v476_v63 }
 0x1fc   : > { %497 = vst.msk [vmem:[%s271_s23] sm:$0xff] %vm280_vm1, %v489_v12  ;;  %498 = vst.msk [vmem:[%s271_s23 + $0x8] sm:$0xff] %vm280_vm1, %v490_v13 }
 0x1fd   : > { %499 = vst.msk [vmem:[%s271_s23 + $0x10] sm:$0xff] %vm280_vm1, %v491_v14  ;;  %500 = vst.msk [vmem:[%s271_s23 + $0x18] sm:$0xff] %vm280_vm1, %v492_v16 }
 0x1fe   : > { %501 = vst.msk [vmem:[%s271_s23 + $0x20] sm:$0xff] %vm280_vm1, %v493_v17  ;;  %502 = vst.msk [vmem:[%s271_s23 + $0x28] sm:$0xff] %vm280_vm1, %v494_v8 }
 0x1ff   : > { %503 = vst.msk [vmem:[%s271_s23 + $0x30] sm:$0xff] %vm280_vm1, %v495_v19  ;;  %504 = vst.msk [vmem:[%s271_s23 + $0x38] sm:$0xff] %vm280_vm1, %v496_v9 }
 0x200 PF: > { %s16_s21 = sadd.s32 1, %s642_s21  }
 0x201   : > { %p13_p4 = scmp.ge.s32.totalorder %s16_s21, 4  }
 0x203   :  { %15 = sbr.rel (!%p13_p4) target bundleno = 1 (0x1), region = 77 }

// kernel: fwd.9
= control target key start
LH: loop header
LB: loop body
LE: loop exit
PB: predicated region body
PF: predicated region fallthrough
CT: control target
= control target key end

     0   :  { %s1514_s12 = smov 0   ;;  %s1721_s0 = inlined_call_operand.vmem [shape: f32[2,4,9,9,3], index: 0, kind: input, shape index: {}]   ;;  %s1722_s1 = inlined_call_operand.vmem [shape: bf16[9,3,32], index: 1, kind: input, shape index: {}]   ;;  %s1723_s2 = inlined_call_operand.vmem [shape: f32[1,32], index: 2, kind: input, shape index: {}]   ;;  %s1724_s3 = inlined_call_operand.vmem [shape: f32[2,8,8,32], index: 3, kind: output, shape index: {}]  }
   0x1 LB: > { %s1162_s13 = sadd.s32 4294967295, %s1491_s12   ;;  %p1166_p0 = scmp.ge.s32.totalorder %s1491_s12, 1  ;;  %s1491_s12 = sphi %s1514_s12, %s13_s12  }
   0x2   : > { %p137_p1 = scmp.lt.s32.totalorder %s1491_s12, 3 }
   0x4   : > { %p138_p2 = pnand %p1166_p0, %p137_p1 }
   0x5   : > { %v1178_v0 = vld [vmem:[%s1722_s1 + $0x2] sm:$0x3] (!%p138_p2)  ;;  %vm213_vm0 = vcmask (!%p138_p2), 1040384   ;;  %vm214_vm1 = vcmask (!%p138_p2), 1041408   ;;  %p161_p3 = scmp.lt.s32.totalorder (!%p138_p2), %s1162_s13, 1  ;;  %v1493_v1 = vmov (!%p138_p2), 65535  }
   0x6   : > { %141 = sbr.rel (%p138_p2) target bundleno = 311 (0x137), region = 32  ;;  %v215_v2 = vsel (!%p138_p2), %vm213_vm0, 4294967295, %v1493_v1  ;;  %v1213_v3 = vld [vmem:[%s1722_s1 + $0x8] sm:$0x3] (!%p138_p2)  ;;  %v184_v4 = vld [vmem:[%s1722_s1] sm:$0x3] (!%p138_p2) }
   0x7   : > { %v1531_v5 = vsel (!%p138_p2), %vm214_vm1, %v215_v2, 0  ;;  %v1226_v6 = vld [vmem:[%s1722_s1 + $0xa] sm:$0x3] (!%p138_p2)  ;;  %v1239_v11 = vld [vmem:[%s1722_s1 + $0xc] sm:$0x3] (!%p138_p2)  ;;  %vm200_vm2 = vcmask (!%p138_p2), 23552  }
   0x8   : > { %v218_v7 = vand.u32 (!%p138_p2), %v1178_v0, %v1531_v5  ;;  %v1540_v8 = vand.u32 (!%p138_p2), %v1213_v3, %v1531_v5  ;;  %v298_v9 = vand.u32 (!%p138_p2), %v1531_v5, %v184_v4  ;;  %v700_v10 = vand.u32 (!%p138_p2), %v1226_v6, %v1531_v5  ;;  %v1187_v12 = vld [vmem:[%s1722_s1 + $0x4] sm:$0x3] (!%p138_p2)  ;;  %v1252_v43 = vld [vmem:[%s1722_s1 + $0xe] sm:$0x3] (!%p138_p2)  ;;  %v1200_v51 = vld [vmem:[%s1722_s1 + $0x6] sm:$0x3] (!%p138_p2) }
   0x9   : > { %v803_v27 = vand.u32 (!%p138_p2), %v1239_v11, %v1531_v5  ;;  %v392_v31 = vand.u32 (!%p138_p2), %v1187_v12, %v1531_v5  ;;  %v906_v50 = vand.u32 (!%p138_p2), %v1252_v43, %v1531_v5  ;;  %v495_v56 = vand.u32 (!%p138_p2), %v1200_v51, %v1531_v5  ;;  %v1265_v1 = vld [vmem:[%s1722_s1 + $0x10] sm:$0x3] (!%p138_p2) }
   0xa   : > { %1319 = vmatprep.subr.bf16.mxu1 (!%p138_p2), %v218_v7  ;;  %1359 = vmatprep.subr.bf16.mxu0 (!%p138_p2), %v1540_v8  ;;  %vm1098_vm3 = vcmask (!%p138_p2), 261120  }
   0xb   : > { %1320 = vmatpush3.bf16.msra.mxu1 (!%p138_p2), %v218_v7  ;;  %1360 = vmatpush3.bf16.msra.mxu0 (!%p138_p2), %v1540_v8 }
   0xc   : > { %1329 = vmatprep.subr.bf16.mxu1 (!%p138_p2), %v298_v9  ;;  %1369 = vmatprep.subr.bf16.mxu0 (!%p138_p2), %v700_v10 }
   0xd   : > { %s1726_s13 = smov (!%p161_p3, %s1162_s13), 1 }
   0xe   : > { %s1475_s22 = smul.u32 576, %s1726_s13  ;;  %s1273_s9 = sshll.u32 %s1726_s13, 6 }
   0xf   : > { %s1700_s16 = scalar_lea.vmem %s1724_s3, %s1273_s9 }
  0x10   : > { %s1550_s25 = scalar_lea.vmem %s1721_s0, %s1475_s22 }
  0x11   : > { %v1170_v13 = vld [vmem:[%s1550_s25 + $0x90] sm:$0xff]  ;;  %v1560_v14 = vld [vmem:[%s1550_s25 + $0xa0] sm:$0xff] }
  0x12   : > { %v1205_v15 = vld [vmem:[%s1550_s25 + $0x1b0] sm:$0xff]  ;;  %v194_v16 = vpack.c.bf16 %v1560_v14, %v1170_v13  ;;  %v1206_v17 = vld [vmem:[%s1550_s25 + $0x1c0] sm:$0xff] }
  0x13   : > { %v1566_v18 = vld [vmem:[%s1550_s25 + $0xb0] sm:$0xff]  ;;  %v1569_v19 = vld [vmem:[%s1550_s25 + $0xc0] sm:$0xff]  ;;  %v579_v20 = vpack.c.bf16 %v1206_v17, %v1205_v15 }
  0x14   : > { %v195_v21 = vpack.c.bf16 %v1569_v19, %v1566_v18  ;;  %v1207_v22 = vld [vmem:[%s1550_s25 + $0x1d0] sm:$0xff]  ;;  %v1208_v23 = vld [vmem:[%s1550_s25 + $0x1e0] sm:$0xff]  ;;  %1321 = vmatprep.mubr.msk.bf16.mxu1 %vm200_vm2, %v194_v16  ;;  %v887_v17 = vpack.c.bf16 %v1566_v18, %v1560_v14 }
  0x15   : > { %v1576_v24 = vld [vmem:[%s1550_s25 + $0xd0] sm:$0xff]  ;;  %v580_v25 = vpack.c.bf16 %v1208_v23, %v1207_v22  ;;  %v1580_v26 = vld [vmem:[%s1550_s25 + $0xe0] sm:$0xff]  ;;  %1361 = vmatprep.mubr.msk.bf16.mxu0 %vm200_vm2, %v579_v20 }
  0x16   : > { %1322 = vmatmul.mubr.msk.bf16.vlgmr.msra.gmra.mrb[0].mxu1 %vm200_vm2, %v195_v21  ;;  %v196_v28 = vpack.c.bf16 %v1580_v26, %v1576_v24  ;;  %v1218_v29 = vld [vmem:[%s1550_s25 + $0x121] sm:$0xff]  ;;  %v1219_v30 = vld [vmem:[%s1550_s25 + $0x131] sm:$0xff] }
  0x17   : > { %1330 = vmatpush3.bf16.msra.mxu1 %v298_v9  ;;  %1362 = vmatmul.mubr.msk.bf16.vlgmr.msra.gmra.mrb[0].mxu0 %vm200_vm2, %v580_v25  ;;  %v1592_v32 = vld [vmem:[%s1550_s25 + $0xf0] sm:$0xff]  ;;  %v1595_v33 = vld [vmem:[%s1550_s25 + $0x100] sm:$0xff]  ;;  %v681_v34 = vpack.c.bf16 %v1219_v30, %v1218_v29  ;;  %v888_v25 = vpack.c.bf16 %v1576_v24, %v1569_v19 }
  0x18   : > { %1370 = vmatpush3.bf16.msra.mxu0 %v700_v10  ;;  %1325 = vmatprep.mubr.msk.bf16.mxu1 %vm200_vm2, %v196_v28  ;;  %v172_v35 = vld [vmem:[%s1550_s25] sm:$0xff]  ;;  %v173_v36 = vld [vmem:[%s1550_s25 + $0x10] sm:$0xff]  ;;  %v197_v37 = vpack.c.bf16 %v1595_v33, %v1592_v32  ;;  %v1008_v10 = vand.u32 %v1265_v1, %v1531_v5 }
  0x19   : > { %1371 = vmatprep.mubr.msk.bf16.mxu0 %vm200_vm2, %v681_v34  ;;  %1379 = vmatprep.subr.bf16.mxu0 %v803_v27  ;;  %v180_v38 = vpack.c.bf16 %v173_v36, %v172_v35  ;;  %v1220_v39 = vld [vmem:[%s1550_s25 + $0x141] sm:$0xff]  ;;  %v1221_v40 = vld [vmem:[%s1550_s25 + $0x151] sm:$0xff] }
  0x1a   : > { %1339 = vmatprep.subr.bf16.mxu1 %v392_v31  ;;  %v1222_v41 = vld [vmem:[%s1550_s25 + $0x161] sm:$0xff]  ;;  %v1223_v42 = vld [vmem:[%s1550_s25 + $0x171] sm:$0xff]  ;;  %v682_v44 = vpack.c.bf16 %v1221_v40, %v1220_v39 }
  0x1b   : > { %v174_v45 = vld [vmem:[%s1550_s25 + $0x20] sm:$0xff]  ;;  %v175_v46 = vld [vmem:[%s1550_s25 + $0x30] sm:$0xff]  ;;  %v683_v47 = vpack.c.bf16 %v1223_v42, %v1222_v41 }
  0x1c   : > { %v176_v48 = vld [vmem:[%s1550_s25 + $0x40] sm:$0xff]  ;;  %v177_v49 = vld [vmem:[%s1550_s25 + $0x50] sm:$0xff]  ;;  %v181_v52 = vpack.c.bf16 %v175_v46, %v174_v45  ;;  %v784_v60 = vpack.c.bf16 %v174_v45, %v173_v36 }
  0x1d   : > { %v182_v53 = vpack.c.bf16 %v177_v49, %v176_v48  ;;  %v1224_v54 = vld [vmem:[%s1550_s25 + $0x181] sm:$0xff]  ;;  %v1225_v55 = vld [vmem:[%s1550_s25 + $0x191] sm:$0xff]  ;;  %v785_v2 = vpack.c.bf16 %v176_v48, %v175_v46 }
  0x1e   : > { %1326 = vmatmul.mubr.msk.bf16.gmra.mrb[4].mxu1 %vm200_vm2, %v197_v37  ;;  %v684_v57 = vpack.c.bf16 %v1225_v55, %v1224_v54  ;;  %v178_v58 = vld [vmem:[%s1550_s25 + $0x60] sm:$0xff]  ;;  %v179_v59 = vld [vmem:[%s1550_s25 + $0x70] sm:$0xff] }
  0x1f   : > { %1331 = vmatprep.mubr.msk.bf16.mxu1 %vm200_vm2, %v180_v38  ;;  %v365_v61 = vld [vmem:[%s1550_s25 + $0x1] sm:$0xff]  ;;  %v1631_v62 = vld [vmem:[%s1550_s25 + $0x11] sm:$0xff]  ;;  %v183_v63 = vpack.c.bf16 %v179_v59, %v178_v58  ;;  %v786_v6 = vpack.c.bf16 %v178_v58, %v177_v49  ;;  %v1270_v49 = vld [vmem:[%s1723_s2] ss:$0 sm:$0xff] }
  0x20   : > { %v373_v0 = vpack.c.bf16 %v1631_v62, %v365_v61  ;;  %v367_v3 = vld [vmem:[%s1550_s25 + $0x21] sm:$0xff]  ;;  %v368_v4 = vld [vmem:[%s1550_s25 + $0x31] sm:$0xff] }
  0x21   : > { %v369_v7 = vld [vmem:[%s1550_s25 + $0x41] sm:$0xff]  ;;  %v370_v9 = vld [vmem:[%s1550_s25 + $0x51] sm:$0xff]  ;;  %v374_v11 = vpack.c.bf16 %v368_v4, %v367_v3  ;;  %v989_v34 = vpack.c.bf16 %v367_v3, %v1631_v62 }
  0x22   : > { %v375_v12 = vpack.c.bf16 %v370_v9, %v369_v7  ;;  %v1238_v13 = vld [vmem:[%s1550_s25 + $0x80] sm:$0xff]  ;;  %v372_v5 = vld [vmem:[%s1550_s25 + $0x71] sm:$0xff] }
  0x23   : > { %1372 = vmatmul.mubr.msk.bf16.vlgmr.msra.gmra.mrb[0].mxu0 %vm200_vm2, %v682_v44  ;;  %v787_v15 = vpack.c.bf16 %v1238_v13, %v179_v59  ;;  %v371_v16 = vld [vmem:[%s1550_s25 + $0x61] sm:$0xff]  ;;  %v1193_v21 = vld [vmem:[%s1550_s25 + $0x130] sm:$0xff] }
  0x24   : > { %1380 = vmatpush3.bf16.msra.mxu0 %v803_v27  ;;  %1375 = vmatprep.mubr.msk.bf16.mxu0 %vm200_vm2, %v683_v47  ;;  %v1192_v20 = vld [vmem:[%s1550_s25 + $0x120] sm:$0xff]  ;;  %v376_v22 = vpack.c.bf16 %v372_v5, %v371_v16  ;;  %v1195_v18 = vld [vmem:[%s1550_s25 + $0x150] sm:$0xff]  ;;  %v889_v27 = vpack.c.bf16 %v1592_v32, %v1580_v26 }
  0x25   : > { %1389 = vmatprep.subr.bf16.mxu0 %v906_v50  ;;  %v476_v23 = vpack.c.bf16 %v1193_v21, %v1192_v20  ;;  %v1194_v14 = vld [vmem:[%s1550_s25 + $0x140] sm:$0xff]  ;;  %v1197_v29 = vld [vmem:[%s1550_s25 + $0x170] sm:$0xff] }
  0x26   : > { %1332 = vmatmul.mubr.msk.bf16.vlgmr.msra.gmra.mrb[0].mxu1 %vm200_vm2, %v181_v52  ;;  %v1196_v28 = vld [vmem:[%s1550_s25 + $0x160] sm:$0xff]  ;;  %v477_v30 = vpack.c.bf16 %v1195_v18, %v1194_v14  ;;  %v1251_v19 = vld [vmem:[%s1550_s25 + $0x110] sm:$0xff] }
  0x27   : > { %1340 = vmatpush3.bf16.msra.mxu1 %v392_v31  ;;  %1335 = vmatprep.mubr.msk.bf16.mxu1 %vm200_vm2, %v182_v53  ;;  %v478_v31 = vpack.c.bf16 %v1197_v29, %v1196_v28  ;;  %v890_v24 = vpack.c.bf16 %v1251_v19, %v1595_v33  ;;  %v1198_v26 = vld [vmem:[%s1550_s25 + $0x180] sm:$0xff]  ;;  %v1199_v32 = vld [vmem:[%s1550_s25 + $0x190] sm:$0xff]  ;;  %v991_v33 = vpack.c.bf16 %v371_v16, %v370_v9 }
  0x28   : > { %1349 = vmatprep.subr.bf16.mxu1 %v495_v56  ;;  %v1209_v35 = vld [vmem:[%s1550_s25 + $0x1f0] sm:$0xff]  ;;  %v1210_v36 = vld [vmem:[%s1550_s25 + $0x200] sm:$0xff]  ;;  %v479_v37 = vpack.c.bf16 %v1199_v32, %v1198_v26 }
  0x29   : > { %v581_v38 = vpack.c.bf16 %v1210_v36, %v1209_v35  ;;  %v1211_v39 = vld [vmem:[%s1550_s25 + $0x210] sm:$0xff]  ;;  %v1212_v40 = vld [vmem:[%s1550_s25 + $0x220] sm:$0xff] }
  0x2a   : > { %v1264_v41 = vld [vmem:[%s1550_s25 + $0x81] sm:$0xff]  ;;  %v582_v42 = vpack.c.bf16 %v1212_v40, %v1211_v39 }
  0x2b   : > { %1376 = vmatmul.mubr.msk.bf16.gmra.mrb[4].mxu0 %vm200_vm2, %v684_v57  ;;  %v992_v43 = vpack.c.bf16 %v1264_v41, %v372_v5 }
  0x2c   : > { %1381 = vmatprep.mubr.msk.bf16.mxu0 %vm200_vm2, %v784_v60 }
  0x2e   : > { %1336 = vmatmul.mubr.msk.bf16.gmra.mrb[4].mxu1 %vm200_vm2, %v183_v63 }
  0x2f   : > { %1341 = vmatprep.mubr.msk.bf16.mxu1 %vm200_vm2, %v373_v0 }
  0x33   : > { %1382 = vmatmul.mubr.msk.bf16.vlgmr.msra.gmra.mrb[0].mxu0 %vm200_vm2, %v785_v2 }
  0x34   : > { %1390 = vmatpush3.bf16.msra.mxu0 %v906_v50  ;;  %1385 = vmatprep.mubr.msk.bf16.mxu0 %vm200_vm2, %v786_v6 }
  0x35   : > { %1399 = vmatprep.subr.bf16.mxu0 %v1008_v10 }
  0x36   : > { %1342 = vmatmul.mubr.msk.bf16.vlgmr.msra.gmra.mrb[0].mxu1 %vm200_vm2, %v374_v11 }
  0x37   : > { %1350 = vmatpush3.bf16.msra.mxu1 %v495_v56  ;;  %1345 = vmatprep.mubr.msk.bf16.mxu1 %vm200_vm2, %v375_v12 }
  0x38   : > { %1409 = vmatprep.subr.bf16.mxu1 %v1540_v8 }
  0x3b   : > { %1386 = vmatmul.mubr.msk.bf16.gmra.mrb[4].mxu0 %vm200_vm2, %v787_v15 }
  0x3c   : > { %1391 = vmatprep.mubr.msk.bf16.mxu0 %vm200_vm2, %v887_v17 }
  0x3e   : > { %1346 = vmatmul.mubr.msk.bf16.gmra.mrb[4].mxu1 %vm200_vm2, %v376_v22 }
  0x3f   : > { %1351 = vmatprep.mubr.msk.bf16.mxu1 %vm200_vm2, %v476_v23 }
  0x43   : > { %1392 = vmatmul.mubr.msk.bf16.vlgmr.msra.gmra.mrb[0].mxu0 %vm200_vm2, %v888_v25 }
  0x44   : > { %1400 = vmatpush3.bf16.msra.mxu0 %v1008_v10  ;;  %1395 = vmatprep.mubr.msk.bf16.mxu0 %vm200_vm2, %v889_v27 }
  0x46   : > { %1352 = vmatmul.mubr.msk.bf16.vlgmr.msra.gmra.mrb[0].mxu1 %vm200_vm2, %v477_v30 }
  0x47   : > { %1410 = vmatpush3.bf16.msra.mxu1 %v1540_v8  ;;  %1355 = vmatprep.mubr.msk.bf16.mxu1 %vm200_vm2, %v478_v31  ;;  %v990_v8 = vpack.c.bf16 %v369_v7, %v368_v4 }
  0x4b   : > { %1396 = vmatmul.mubr.msk.bf16.gmra.mrb[4].mxu0 %vm200_vm2, %v890_v24 }
  0x4c   : > { %1401 = vmatprep.mubr.msk.bf16.mxu0 %vm200_vm2, %v989_v34 }
  0x4e   : > { %1356 = vmatmul.mubr.msk.bf16.gmra.mrb[4].mxu1 %vm200_vm2, %v479_v37 }
  0x4f   : > { %1365 = vmatprep.mubr.msk.bf16.mxu1 %vm200_vm2, %v581_v38 }
  0x53   : > { %1402 = vmatmul.mubr.msk.bf16.vlgmr.msra.gmra.mrb[0].mxu0 %vm200_vm2, %v990_v8 }
  0x54   : > { %1405 = vmatprep.mubr.msk.bf16.mxu0 %vm200_vm2, %v991_v33 }
  0x5a   : > { %1366 = vmatmul.mubr.msk.bf16.vlgmr.msra.gmra.mrb[4].mxu1 %vm200_vm2, %v582_v42 }
  0x5b   : > { %1406 = vmatmul.mubr.msk.bf16.gmra.mrb[4].mxu0 %vm200_vm2, %v992_v43 }
 0x119   : > { %v1353_v44 = vpop.f32.mrb[0].mxu1 }
 0x11a   : > { %v531_v45 = vpop.f32.mrb[1].mxu1 }
 0x11b   : > { %v1354_v46 = vpop.f32.mrb[2].mxu1 }
 0x11c   : > { %v534_v47 = vpop.f32.mrb[3].mxu1 }
 0x126   : > { %v1403_v48 = vpop.f32.mrb[0].mxu0 }
 0x127   : > { %v1411_v50 = vadd.f32 %v1403_v48, %v1353_v44  ;;  %v1044_v51 = vpop.f32.mrb[1].mxu0 }
 0x128   : > { %v1412_v52 = vadd.f32 %v1044_v51, %v531_v45  ;;  %v1404_v53 = vpop.f32.mrb[2].mxu0 }
 0x129   : > { %v1092_v54 = vadd.f32 %v1411_v50, %v1270_v49  ;;  %v1413_v55 = vadd.f32 %v1404_v53, %v1354_v46  ;;  %v1047_v56 = vpop.f32.mrb[3].mxu0 }
 0x12a   : > { %v1090_v57 = vadd.f32 %v1412_v52, %v1270_v49  ;;  %v1414_v58 = vadd.f32 %v1047_v56, %v534_v47 }
 0x12b   : > { %1101 = vst.msk [vmem:[%s1700_s16 + $0x10] sm:$0xff] %vm1098_vm3, %v1092_v54  ;;  %v1093_v59 = vadd.f32 %v1413_v55, %v1270_v49 }
 0x12c   : > { %1099 = vst.msk [vmem:[%s1700_s16] sm:$0xff] %vm1098_vm3, %v1090_v57  ;;  %v1091_v60 = vadd.f32 %v1414_v58, %v1270_v49 }
 0x12d   : > { %1102 = vst.msk [vmem:[%s1700_s16 + $0x18] sm:$0xff] %vm1098_vm3, %v1093_v59  ;;  %v1367_v61 = vpop.f32.mrb[4].mxu1 }
 0x12e   : > { %1100 = vst.msk [vmem:[%s1700_s16 + $0x8] sm:$0xff] %vm1098_vm3, %v1091_v60  ;;  %v1407_v62 = vpop.f32.mrb[4].mxu0  ;;  %v650_v63 = vpop.f32.mrb[5].mxu1 }
 0x12f   : > { %v1415_v0 = vadd.f32 %v1407_v62, %v1367_v61  ;;  %v1060_v1 = vpop.f32.mrb[5].mxu0  ;;  %v1368_v2 = vpop.f32.mrb[6].mxu1 }
 0x130   : > { %v1416_v3 = vadd.f32 %v1060_v1, %v650_v63  ;;  %v1408_v4 = vpop.f32.mrb[6].mxu0  ;;  %v653_v6 = vpop.f32.mrb[7].mxu1 }
 0x131   : > { %v1096_v7 = vadd.f32 %v1415_v0, %v1270_v49  ;;  %v1417_v9 = vadd.f32 %v1408_v4, %v1368_v2  ;;  %v1063_v10 = vpop.f32.mrb[7].mxu0 }
 0x132   : > { %v1094_v11 = vadd.f32 %v1416_v3, %v1270_v49  ;;  %v1418_v12 = vadd.f32 %v1063_v10, %v653_v6 }
 0x133   : > { %1105 = vst.msk [vmem:[%s1700_s16 + $0x30] sm:$0xff] %vm1098_vm3, %v1096_v7  ;;  %v1097_v13 = vadd.f32 %v1417_v9, %v1270_v49 }
 0x134   : > { %1103 = vst.msk [vmem:[%s1700_s16 + $0x20] sm:$0xff] %vm1098_vm3, %v1094_v11  ;;  %v1095_v15 = vadd.f32 %v1418_v12, %v1270_v49 }
 0x135   : > { %1106 = vst.msk [vmem:[%s1700_s16 + $0x38] sm:$0xff] %vm1098_vm3, %v1097_v13 }
 0x136   : > { %1104 = vst.msk [vmem:[%s1700_s16 + $0x28] sm:$0xff] %vm1098_vm3, %v1095_v15 }
 0x137 PF: > { %s13_s12 = sadd.s32 1, %s1491_s12  }
 0x138   : > { %p10_p4 = scmp.ge.s32.totalorder %s13_s12, 4  }
 0x13a   :  { %12 = sbr.rel (!%p10_p4) target bundleno = 1 (0x1), region = 75 }

// kernel: fwd.11
= control target key start
LH: loop header
LB: loop body
LE: loop exit
PB: predicated region body
PF: predicated region fallthrough
CT: control target
= control target key end

     0   :  { %s1650_s15 = smov 0   ;;  %s1826_s0 = inlined_call_operand.vmem [shape: f32[2,1,10,10,16], index: 0, kind: input, shape index: {}]   ;;  %s1827_s1 = inlined_call_operand.vmem [shape: bf16[9,16,32], index: 1, kind: input, shape index: {}]   ;;  %s1828_s2 = inlined_call_operand.vmem [shape: f32[1,32], index: 2, kind: input, shape index: {}]   ;;  %s1829_s3 = inlined_call_operand.vmem [shape: f32[2,8,8,32], index: 3, kind: input, shape index: {}]   ;;  %s1830_s4 = inlined_call_operand.vmem [shape: f32[2,8,8,32], index: 4, kind: output, shape index: {}]  }
   0x1 LB: > { %s1274_s16 = sadd.s32 4294967295, %s1623_s15   ;;  %p1278_p0 = scmp.ge.s32.totalorder %s1623_s15, 1  ;;  %s1623_s15 = sphi %s1650_s15, %s14_s15  }
   0x2   : > { %p172_p1 = scmp.lt.s32.totalorder %s1623_s15, 3 }
   0x4   : > { %p173_p2 = pnand %p1278_p0, %p172_p1 }
   0x5   : > { %v1608_v0 = vld [vmem:[%s1827_s1 + $0x8] sm:$0xff] (!%p173_p2)   ;;  %p203_p3 = scmp.lt.s32.totalorder (!%p173_p2), %s1274_s16, 1  ;;  %v1664_v1 = vld [vmem:[%s1827_s1 + $0x20] sm:$0xff] (!%p173_p2)   ;;  %vm254_vm0 = vcmask (!%p173_p2), 130048   ;;  %v1612_v17 = vld [vmem:[%s1827_s1 + $0x30] sm:$0xff] (!%p173_p2)   ;;  %vm1198_vm1 = vcmask (!%p173_p2), 261120  }
   0x6   : > { %176 = sbr.rel (%p173_p2) target bundleno = 312 (0x138), region = 36  ;;  %1443 = vmatprep.subr.bf16.mxu1 (!%p173_p2), %v1608_v0  ;;  %v1610_v2 = vld [vmem:[%s1827_s1] sm:$0xff] (!%p173_p2)   ;;  %1483 = vmatprep.subr.bf16.mxu0 (!%p173_p2), %v1664_v1  ;;  %v1611_v3 = vld [vmem:[%s1827_s1 + $0x28] sm:$0xff] (!%p173_p2)   ;;  %v1613_v18 = vld [vmem:[%s1827_s1 + $0x10] sm:$0xff] (!%p173_p2)  }
   0x7   : > { %1444 = vmatpush3.bf16.msra.mxu1 (!%p173_p2), %v1608_v0  ;;  %1484 = vmatpush3.bf16.msra.mxu0 (!%p173_p2), %v1664_v1  ;;  %v1614_v36 = vld [vmem:[%s1827_s1 + $0x38] sm:$0xff] (!%p173_p2)   ;;  %v1616_v48 = vld [vmem:[%s1827_s1 + $0x40] sm:$0xff] (!%p173_p2)  }
   0x8   : > { %1453 = vmatprep.subr.bf16.mxu1 (!%p173_p2), %v1610_v2  ;;  %1493 = vmatprep.subr.bf16.mxu0 (!%p173_p2), %v1611_v3  ;;  %v1615_v41 = vld [vmem:[%s1827_s1 + $0x18] sm:$0xff] (!%p173_p2)  }
   0xd   : > { %s1832_s16 = smov (!%p203_p3, %s1274_s16), 1 }
   0xe   : > { %s1599_s25 = smul.u32 160, %s1832_s16  ;;  %s1396_s13 = sshll.u32 %s1832_s16, 6 }
   0xf   : > { %s1789_s18 = scalar_lea.vmem %s1829_s3, %s1396_s13  ;;  %s1801_s22 = scalar_lea.vmem %s1830_s4, %s1396_s13 }
  0x10   : > { %s1680_s28 = scalar_lea.vmem %s1826_s0, %s1599_s25 }
  0x11   : > { %v233_v4 = vld [vmem:[%s1680_s28 + $0x1] sm:$0xff]  ;;  %v234_v5 = vld [vmem:[%s1680_s28 + $0x11] sm:$0xff] }
  0x12   : > { %v1319_v6 = vld [vmem:[%s1680_s28 + $0x21] sm:$0xff]  ;;  %v241_v7 = vpack.c.bf16 %v234_v5, %v233_v4  ;;  %v236_v9 = vld [vmem:[%s1680_s28 + $0x31] sm:$0xff] }
  0x13   : > { %v636_v8 = vpack.c.bf16 %v1319_v6, %v234_v5  ;;  %v1321_v10 = vld [vmem:[%s1680_s28 + $0x41] sm:$0xff]  ;;  %v1688_v11 = vld [vmem:[%s1680_s28 + $0x51] sm:$0xff]  ;;  %v1690_v12 = vpack.c.bf16 %v236_v9, %v1319_v6 }
  0x14   : > { %v637_v13 = vpack.c.bf16 %v1321_v10, %v236_v9  ;;  %v1693_v14 = vpack.c.bf16 %v1688_v11, %v1321_v10  ;;  %v1333_v15 = vld [vmem:[%s1680_s28 + $0x12] sm:$0xff]  ;;  %1445 = vmatprep.mubr.msk.bf16.mxu1 %vm254_vm0, %v241_v7  ;;  %v1334_v16 = vld [vmem:[%s1680_s28 + $0x22] sm:$0xff]  ;;  %v1393_v9 = vld [vmem:[%s1828_s2] ss:$0 sm:$0xff] }
  0x15   : > { %1485 = vmatprep.mubr.msk.bf16.mxu0 %vm254_vm0, %v636_v8  ;;  %1446 = vmatmul.mubr.msk.bf16.vlgmr.msra.gmra.mrb[0].mxu1 %vm254_vm0, %v1690_v12  ;;  %v742_v19 = vpack.c.bf16 %v1334_v16, %v1333_v15  ;;  %v1709_v20 = vld [vmem:[%s1680_s28 + $0x61] sm:$0xff]  ;;  %v1712_v21 = vld [vmem:[%s1680_s28 + $0x71] sm:$0xff] }
  0x16   : > { %1486 = vmatmul.mubr.msk.bf16.vlgmr.msra.gmra.mrb[0].mxu0 %vm254_vm0, %v637_v13  ;;  %1454 = vmatpush3.bf16.msra.mxu1 %v1610_v2  ;;  %v219_v22 = vld [vmem:[%s1680_s28] sm:$0xff]  ;;  %v220_v23 = vld [vmem:[%s1680_s28 + $0x10] sm:$0xff]  ;;  %v244_v24 = vpack.c.bf16 %v1712_v21, %v1709_v20  ;;  %v638_v62 = vpack.c.bf16 %v1709_v20, %v1688_v11  ;;  %v1177_v10 = vld [vmem:[%s1789_s18 + $0x18] sm:$0xff] }
  0x17   : > { %1494 = vmatpush3.bf16.msra.mxu0 %v1611_v3  ;;  %1449 = vmatprep.mubr.msk.bf16.mxu1 %vm254_vm0, %v1693_v14  ;;  %v1335_v25 = vld [vmem:[%s1680_s28 + $0x32] sm:$0xff]  ;;  %v1336_v26 = vld [vmem:[%s1680_s28 + $0x42] sm:$0xff]  ;;  %v227_v27 = vpack.c.bf16 %v220_v23, %v219_v22  ;;  %v1185_v20 = vmul.f32 0.2, %v1177_v10 }
  0x18   : > { %1495 = vmatprep.mubr.msk.bf16.mxu0 %vm254_vm0, %v742_v19  ;;  %1503 = vmatprep.subr.bf16.mxu0 %v1612_v17  ;;  %v1337_v28 = vld [vmem:[%s1680_s28 + $0x52] sm:$0xff]  ;;  %v1338_v29 = vld [vmem:[%s1680_s28 + $0x62] sm:$0xff]  ;;  %v743_v30 = vpack.c.bf16 %v1336_v26, %v1335_v25  ;;  %v424_v49 = vpack.c.bf16 %v1335_v25, %v1334_v16 }
  0x19   : > { %1463 = vmatprep.subr.bf16.mxu1 %v1613_v18  ;;  %v221_v31 = vld [vmem:[%s1680_s28 + $0x20] sm:$0xff]  ;;  %v222_v32 = vld [vmem:[%s1680_s28 + $0x30] sm:$0xff]  ;;  %v744_v33 = vpack.c.bf16 %v1338_v29, %v1337_v28  ;;  %v425_v52 = vpack.c.bf16 %v1337_v28, %v1336_v26 }
  0x1a   : > { %v223_v34 = vld [vmem:[%s1680_s28 + $0x40] sm:$0xff]  ;;  %v224_v35 = vld [vmem:[%s1680_s28 + $0x50] sm:$0xff]  ;;  %v228_v37 = vpack.c.bf16 %v222_v32, %v221_v31  ;;  %v530_v55 = vpack.c.bf16 %v221_v31, %v220_v23 }
  0x1b   : > { %v1339_v38 = vld [vmem:[%s1680_s28 + $0x72] sm:$0xff]  ;;  %v1340_v39 = vld [vmem:[%s1680_s28 + $0x82] sm:$0xff]  ;;  %v229_v40 = vpack.c.bf16 %v224_v35, %v223_v34  ;;  %v531_v56 = vpack.c.bf16 %v223_v34, %v222_v32 }
  0x1c   : > { %v745_v42 = vpack.c.bf16 %v1340_v39, %v1339_v38  ;;  %v225_v43 = vld [vmem:[%s1680_s28 + $0x60] sm:$0xff]  ;;  %v226_v44 = vld [vmem:[%s1680_s28 + $0x70] sm:$0xff]  ;;  %v426_v54 = vpack.c.bf16 %v1339_v38, %v1338_v29 }
  0x1d   : > { %1450 = vmatmul.mubr.msk.bf16.gmra.mrb[4].mxu1 %vm254_vm0, %v244_v24  ;;  %v415_v45 = vld [vmem:[%s1680_s28 + $0x2] sm:$0xff]  ;;  %v230_v46 = vpack.c.bf16 %v226_v44, %v225_v43  ;;  %v1355_v51 = vld [vmem:[%s1680_s28 + $0x90] sm:$0xff]  ;;  %v532_v59 = vpack.c.bf16 %v225_v43, %v224_v35  ;;  %v1181_v35 = vld [vmem:[%s1789_s18 + $0x38] sm:$0xff] }
  0x1e   : > { %1455 = vmatprep.mubr.msk.bf16.mxu1 %vm254_vm0, %v227_v27  ;;  %v423_v47 = vpack.c.bf16 %v1333_v15, %v415_v45  ;;  %v1354_v50 = vld [vmem:[%s1680_s28 + $0x80] sm:$0xff]  ;;  %v1370_v58 = vld [vmem:[%s1680_s28 + $0x91] sm:$0xff] }
  0x1f   : > { %v852_v53 = vpack.c.bf16 %v1355_v51, %v1354_v50  ;;  %v1369_v57 = vld [vmem:[%s1680_s28 + $0x81] sm:$0xff]  ;;  %v533_v61 = vpack.c.bf16 %v1354_v50, %v226_v44  ;;  %v1385_v63 = vld [vmem:[%s1680_s28 + $0x92] sm:$0xff] }
  0x20   : > { %v958_v60 = vpack.c.bf16 %v1370_v58, %v1369_v57  ;;  %v639_v0 = vpack.c.bf16 %v1369_v57, %v1712_v21  ;;  %v1176_v6 = vld [vmem:[%s1789_s18 + $0x10] sm:$0xff]  ;;  %v1174_v7 = vld [vmem:[%s1789_s18] sm:$0xff] }
  0x21   : > { %v1182_v16 = vmul.f32 0.2, %v1174_v7  ;;  %v1180_v29 = vld [vmem:[%s1789_s18 + $0x30] sm:$0xff]  ;;  %v1178_v31 = vld [vmem:[%s1789_s18 + $0x20] sm:$0xff] }
  0x22   : > { %1496 = vmatmul.mubr.msk.bf16.vlgmr.msra.gmra.mrb[0].mxu0 %vm254_vm0, %v743_v30 }
  0x23   : > { %1504 = vmatpush3.bf16.msra.mxu0 %v1612_v17  ;;  %1499 = vmatprep.mubr.msk.bf16.mxu0 %vm254_vm0, %v744_v33 }
  0x24   : > { %1513 = vmatprep.subr.bf16.mxu0 %v1614_v36 }
  0x25   : > { %1456 = vmatmul.mubr.msk.bf16.vlgmr.msra.gmra.mrb[0].mxu1 %vm254_vm0, %v228_v37 }
  0x26   : > { %1464 = vmatpush3.bf16.msra.mxu1 %v1613_v18  ;;  %1459 = vmatprep.mubr.msk.bf16.mxu1 %vm254_vm0, %v229_v40 }
  0x27   : > { %1473 = vmatprep.subr.bf16.mxu1 %v1615_v41 }
  0x2a   : > { %1500 = vmatmul.mubr.msk.bf16.gmra.mrb[4].mxu0 %vm254_vm0, %v745_v42  ;;  %v1186_v42 = vmul.f32 0.2, %v1178_v31 }
  0x2b   : > { %1505 = vmatprep.mubr.msk.bf16.mxu0 %vm254_vm0, %v228_v37  ;;  %v1188_v37 = vmul.f32 0.2, %v1180_v29 }
  0x2d   : > { %1460 = vmatmul.mubr.msk.bf16.gmra.mrb[4].mxu1 %vm254_vm0, %v230_v46 }
  0x2e   : > { %1465 = vmatprep.mubr.msk.bf16.mxu1 %vm254_vm0, %v423_v47  ;;  %v1189_v47 = vmul.f32 0.2, %v1181_v35 }
  0x32   : > { %1506 = vmatmul.mubr.msk.bf16.vlgmr.msra.gmra.mrb[0].mxu0 %vm254_vm0, %v229_v40  ;;  %v1179_v40 = vld [vmem:[%s1789_s18 + $0x28] sm:$0xff] }
  0x33   : > { %1514 = vmatpush3.bf16.msra.mxu0 %v1614_v36  ;;  %1509 = vmatprep.mubr.msk.bf16.mxu0 %vm254_vm0, %v230_v46 }
  0x34   : > { %1523 = vmatprep.subr.bf16.mxu0 %v1616_v48 }
  0x35   : > { %1466 = vmatmul.mubr.msk.bf16.vlgmr.msra.gmra.mrb[0].mxu1 %vm254_vm0, %v424_v49 }
  0x36   : > { %1474 = vmatpush3.bf16.msra.mxu1 %v1615_v41  ;;  %1469 = vmatprep.mubr.msk.bf16.mxu1 %vm254_vm0, %v425_v52 }
  0x37   : > { %1533 = vmatprep.subr.bf16.mxu1 %v1664_v1 }
  0x3a   : > { %1510 = vmatmul.mubr.msk.bf16.gmra.mrb[4].mxu0 %vm254_vm0, %v852_v53 }
  0x3b   : > { %1515 = vmatprep.mubr.msk.bf16.mxu0 %vm254_vm0, %v1690_v12  ;;  %v1184_v12 = vmul.f32 0.2, %v1176_v6 }
  0x3d   : > { %1470 = vmatmul.mubr.msk.bf16.gmra.mrb[4].mxu1 %vm254_vm0, %v426_v54 }
  0x3e   : > { %1475 = vmatprep.mubr.msk.bf16.mxu1 %vm254_vm0, %v530_v55 }
  0x42   : > { %1516 = vmatmul.mubr.msk.bf16.vlgmr.msra.gmra.mrb[0].mxu0 %vm254_vm0, %v1693_v14  ;;  %v1175_v14 = vld [vmem:[%s1789_s18 + $0x8] sm:$0xff] }
  0x43   : > { %1524 = vmatpush3.bf16.msra.mxu0 %v1616_v48  ;;  %1519 = vmatprep.mubr.msk.bf16.mxu0 %vm254_vm0, %v244_v24  ;;  %v1183_v24 = vmul.f32 0.2, %v1175_v14 }
  0x45   : > { %1476 = vmatmul.mubr.msk.bf16.vlgmr.msra.gmra.mrb[0].mxu1 %vm254_vm0, %v531_v56 }
  0x46   : > { %1534 = vmatpush3.bf16.msra.mxu1 %v1664_v1  ;;  %1479 = vmatprep.mubr.msk.bf16.mxu1 %vm254_vm0, %v532_v59  ;;  %v1064_v1 = vpack.c.bf16 %v1385_v63, %v1340_v39 }
  0x4a   : > { %1520 = vmatmul.mubr.msk.bf16.gmra.mrb[4].mxu0 %vm254_vm0, %v958_v60 }
  0x4b   : > { %1525 = vmatprep.mubr.msk.bf16.mxu0 %vm254_vm0, %v424_v49 }
  0x4d   : > { %1480 = vmatmul.mubr.msk.bf16.gmra.mrb[4].mxu1 %vm254_vm0, %v533_v61 }
  0x4e   : > { %1489 = vmatprep.mubr.msk.bf16.mxu1 %vm254_vm0, %v638_v62 }
  0x52   : > { %1526 = vmatmul.mubr.msk.bf16.vlgmr.msra.gmra.mrb[0].mxu0 %vm254_vm0, %v425_v52  ;;  %v1187_v52 = vmul.f32 0.2, %v1179_v40 }
  0x53   : > { %1529 = vmatprep.mubr.msk.bf16.mxu0 %vm254_vm0, %v426_v54 }
  0x59   : > { %1490 = vmatmul.mubr.msk.bf16.vlgmr.msra.gmra.mrb[4].mxu1 %vm254_vm0, %v639_v0 }
  0x5a   : > { %1530 = vmatmul.mubr.msk.bf16.gmra.mrb[4].mxu0 %vm254_vm0, %v1064_v1 }
 0x118   : > { %v1477_v2 = vpop.f32.mrb[0].mxu1 }
 0x119   : > { %v589_v3 = vpop.f32.mrb[1].mxu1 }
 0x11a   : > { %v1478_v4 = vpop.f32.mrb[2].mxu1 }
 0x11b   : > { %v592_v5 = vpop.f32.mrb[3].mxu1 }
 0x125   : > { %v1527_v8 = vpop.f32.mrb[0].mxu0 }
 0x126   : > { %v1535_v11 = vadd.f32 %v1527_v8, %v1477_v2  ;;  %v1120_v13 = vpop.f32.mrb[1].mxu0 }
 0x127   : > { %v1536_v15 = vadd.f32 %v1120_v13, %v589_v3  ;;  %v1528_v17 = vpop.f32.mrb[2].mxu0 }
 0x128   : > { %v1168_v18 = vadd.f32 %v1535_v11, %v1393_v9  ;;  %v1537_v19 = vadd.f32 %v1528_v17, %v1478_v4  ;;  %v1123_v21 = vpop.f32.mrb[3].mxu0 }
 0x129   : > { %v1166_v22 = vadd.f32 %v1536_v15, %v1393_v9  ;;  %v1538_v23 = vadd.f32 %v1123_v21, %v592_v5 }
 0x12a   : > { %v1192_v25 = vadd.f32 %v1184_v12, %v1168_v18  ;;  %v1169_v26 = vadd.f32 %v1537_v19, %v1393_v9 }
 0x12b   : > { %v1190_v27 = vadd.f32 %v1182_v16, %v1166_v22  ;;  %v1167_v28 = vadd.f32 %v1538_v23, %v1393_v9 }
 0x12c   : > { %1201 = vst.msk [vmem:[%s1801_s22 + $0x10] sm:$0xff] %vm1198_vm1, %v1192_v25  ;;  %v1193_v30 = vadd.f32 %v1185_v20, %v1169_v26  ;;  %v1491_v33 = vpop.f32.mrb[4].mxu1 }
 0x12d   : > { %1199 = vst.msk [vmem:[%s1801_s22] sm:$0xff] %vm1198_vm1, %v1190_v27  ;;  %v1191_v32 = vadd.f32 %v1183_v24, %v1167_v28  ;;  %v1531_v34 = vpop.f32.mrb[4].mxu0  ;;  %v711_v38 = vpop.f32.mrb[5].mxu1 }
 0x12e   : > { %1202 = vst.msk [vmem:[%s1801_s22 + $0x18] sm:$0xff] %vm1198_vm1, %v1193_v30  ;;  %v1539_v36 = vadd.f32 %v1531_v34, %v1491_v33  ;;  %v1136_v39 = vpop.f32.mrb[5].mxu0  ;;  %v1492_v43 = vpop.f32.mrb[6].mxu1 }
 0x12f   : > { %1200 = vst.msk [vmem:[%s1801_s22 + $0x8] sm:$0xff] %vm1198_vm1, %v1191_v32  ;;  %v1540_v41 = vadd.f32 %v1136_v39, %v711_v38  ;;  %v1532_v44 = vpop.f32.mrb[6].mxu0  ;;  %v714_v48 = vpop.f32.mrb[7].mxu1 }
 0x130   : > { %v1172_v45 = vadd.f32 %v1539_v36, %v1393_v9  ;;  %v1541_v46 = vadd.f32 %v1532_v44, %v1492_v43  ;;  %v1139_v49 = vpop.f32.mrb[7].mxu0 }
 0x131   : > { %v1170_v50 = vadd.f32 %v1540_v41, %v1393_v9  ;;  %v1542_v51 = vadd.f32 %v1139_v49, %v714_v48 }
 0x132   : > { %v1196_v53 = vadd.f32 %v1188_v37, %v1172_v45  ;;  %v1173_v54 = vadd.f32 %v1541_v46, %v1393_v9 }
 0x133   : > { %v1194_v55 = vadd.f32 %v1186_v42, %v1170_v50  ;;  %v1171_v56 = vadd.f32 %v1542_v51, %v1393_v9 }
 0x134   : > { %1205 = vst.msk [vmem:[%s1801_s22 + $0x30] sm:$0xff] %vm1198_vm1, %v1196_v53  ;;  %v1197_v57 = vadd.f32 %v1189_v47, %v1173_v54 }
 0x135   : > { %1203 = vst.msk [vmem:[%s1801_s22 + $0x20] sm:$0xff] %vm1198_vm1, %v1194_v55  ;;  %v1195_v58 = vadd.f32 %v1187_v52, %v1171_v56 }
 0x136   : > { %1206 = vst.msk [vmem:[%s1801_s22 + $0x38] sm:$0xff] %vm1198_vm1, %v1197_v57 }
 0x137   : > { %1204 = vst.msk [vmem:[%s1801_s22 + $0x28] sm:$0xff] %vm1198_vm1, %v1195_v58 }
 0x138 PF: > { %s14_s15 = sadd.s32 1, %s1623_s15  }
 0x139   : > { %p11_p4 = scmp.ge.s32.totalorder %s14_s15, 4  }
 0x13b   :  { %13 = sbr.rel (!%p11_p4) target bundleno = 1 (0x1), region = 79 }

// kernel: fwd.10
= control target key start
LH: loop header
LB: loop body
LE: loop exit
PB: predicated region body
PF: predicated region fallthrough
CT: control target
= control target key end

     0   :  { %s1718_s12 = smov 0   ;;  %s1946_s0 = inlined_call_operand.vmem [shape: f32[2,1,10,10,32], index: 0, kind: input, shape index: {}]   ;;  %s1947_s1 = inlined_call_operand.vmem [shape: bf16[9,32,16], index: 1, kind: input, shape index: {}]   ;;  %s1948_s2 = inlined_call_operand.vmem [shape: f32[1,16], index: 2, kind: input, shape index: {}]   ;;  %s1949_s3 = inlined_call_operand.vmem [shape: f32[2,8,8,16], index: 3, kind: output, shape index: {}]  }
   0x1 LB: > { %s1287_s13 = sadd.s32 4294967295, %s1696_s12   ;;  %p1291_p0 = scmp.ge.s32.totalorder %s1696_s12, 1  ;;  %s1696_s12 = sphi %s1718_s12, %s13_s12  }
   0x2   : > { %p137_p1 = scmp.lt.s32.totalorder %s1696_s12, 3 }
   0x4   : > { %p138_p2 = pnand %p1291_p0, %p137_p1 }
   0x5   : > { %v1672_v0 = vld [vmem:[%s1947_s1 + $0x10] sm:$0xff] (!%p138_p2)   ;;  %p161_p3 = scmp.lt.s32.totalorder (!%p138_p2), %s1287_s13, 1  ;;  %v1732_v1 = vld [vmem:[%s1947_s1 + $0x40] sm:$0xff] (!%p138_p2)   ;;  %v1674_v2 = vld [vmem:[%s1947_s1 + $0x18] sm:$0xff] (!%p138_p2)   ;;  %vm217_vm0 = vcmask (!%p138_p2), 261120   ;;  %vm1223_vm2 = vcmask (!%p138_p2), 130048  }
   0x6   : > { %141 = sbr.rel (%p138_p2) target bundleno = 313 (0x139), region = 32  ;;  %1487 = vmatprep.subr.bf16.mxu1 (!%p138_p2), %v1672_v0  ;;  %1535 = vmatprep.subr.bf16.mxu0 (!%p138_p2), %v1732_v1  ;;  %v1743_v3 = vld [vmem:[%s1947_s1 + $0x48] sm:$0xff] (!%p138_p2)   ;;  %v1676_v4 = vld [vmem:[%s1947_s1] sm:$0xff] (!%p138_p2)   ;;  %v1677_v5 = vld [vmem:[%s1947_s1 + $0x50] sm:$0xff] (!%p138_p2)  }
   0x7   : > { %1488 = vmatpush3.bf16.msra.mxu1 (!%p138_p2), %v1672_v0  ;;  %1536 = vmatpush3.bf16.msra.mxu0 (!%p138_p2), %v1732_v1  ;;  %v1678_v16 = vld [vmem:[%s1947_s1 + $0x58] sm:$0xff] (!%p138_p2)   ;;  %v1679_v18 = vld [vmem:[%s1947_s1 + $0x8] sm:$0xff] (!%p138_p2)   ;;  %v1680_v24 = vld [vmem:[%s1947_s1 + $0x60] sm:$0xff] (!%p138_p2)  }
   0x8   : > { %1489 = vmatprep.subr.bf16.mxu1 (!%p138_p2), %v1674_v2  ;;  %1537 = vmatprep.subr.bf16.mxu0 (!%p138_p2), %v1743_v3  ;;  %v1681_v28 = vld [vmem:[%s1947_s1 + $0x20] sm:$0xff] (!%p138_p2)   ;;  %v1682_v38 = vld [vmem:[%s1947_s1 + $0x68] sm:$0xff] (!%p138_p2)   ;;  %v1684_v46 = vld [vmem:[%s1947_s1 + $0x70] sm:$0xff] (!%p138_p2)  }
   0x9   : > { %v1683_v45 = vld [vmem:[%s1947_s1 + $0x28] sm:$0xff] (!%p138_p2)   ;;  %v1685_v51 = vld [vmem:[%s1947_s1 + $0x30] sm:$0xff] (!%p138_p2)   ;;  %v1686_v54 = vld [vmem:[%s1947_s1 + $0x78] sm:$0xff] (!%p138_p2)  }
   0xa   : > { %v1687_v59 = vld [vmem:[%s1947_s1 + $0x38] sm:$0xff] (!%p138_p2)   ;;  %v1688_v60 = vld [vmem:[%s1947_s1 + $0x80] sm:$0xff] (!%p138_p2)   ;;  %v1689_v0 = vld [vmem:[%s1947_s1 + $0x88] sm:$0xff] (!%p138_p2)  }
   0xb   : > { %1490 = vmatpush3.bf16.msra.mxu1 (!%p138_p2), %v1674_v2  ;;  %1538 = vmatpush3.bf16.msra.mxu0 (!%p138_p2), %v1743_v3 }
   0xc   : > { %1499 = vmatprep.subr.bf16.mxu1 (!%p138_p2), %v1676_v4  ;;  %1547 = vmatprep.subr.bf16.mxu0 (!%p138_p2), %v1677_v5 }
   0xd   : > { %s1951_s13 = smov (!%p161_p3, %s1287_s13), 1 }
   0xe   : > { %s1663_s22 = smul.u32 160, %s1951_s13 }
  0x10   : > { %s1757_s29 = scalar_lea.vmem %s1946_s0, %s1663_s22 }
  0x11   : > { %v188_v6 = vld [vmem:[%s1757_s29 + $0x1] sm:$0xff]  ;;  %v189_v7 = vld [vmem:[%s1757_s29 + $0x11] sm:$0xff] }
  0x12   : > { %v1340_v8 = vld [vmem:[%s1757_s29 + $0x21] sm:$0xff]  ;;  %v196_v9 = vpack.c.bf16 %v189_v7, %v188_v6  ;;  %v191_v11 = vld [vmem:[%s1757_s29 + $0x31] sm:$0xff] }
  0x13   : > { %v621_v10 = vpack.c.bf16 %v1340_v8, %v189_v7  ;;  %v1342_v12 = vld [vmem:[%s1757_s29 + $0x41] sm:$0xff]  ;;  %v1766_v13 = vld [vmem:[%s1757_s29 + $0x51] sm:$0xff]  ;;  %v1768_v14 = vpack.c.bf16 %v191_v11, %v1340_v8 }
  0x14   : > { %v622_v15 = vpack.c.bf16 %v1342_v12, %v191_v11  ;;  %v1774_v17 = vpack.c.bf16 %v1766_v13, %v1342_v12  ;;  %1491 = vmatprep.mubr.msk.bf16.mxu1 %vm217_vm0, %v196_v9  ;;  %v1782_v19 = vld [vmem:[%s1757_s29 + $0x12] sm:$0xff]  ;;  %v1788_v20 = vld [vmem:[%s1757_s29 + $0x61] sm:$0xff] }
  0x15   : > { %1539 = vmatprep.mubr.msk.bf16.mxu0 %vm217_vm0, %v621_v10  ;;  %1492 = vmatmul.mubr.msk.bf16.vlgmr.msra.gmra.mrb[0].mxu1 %vm217_vm0, %v1768_v14  ;;  %v1791_v21 = vld [vmem:[%s1757_s29 + $0x22] sm:$0xff]  ;;  %v1794_v22 = vld [vmem:[%s1757_s29 + $0x71] sm:$0xff]  ;;  %v623_v9 = vpack.c.bf16 %v1788_v20, %v1766_v13 }
  0x16   : > { %1540 = vmatmul.mubr.msk.bf16.vlgmr.msra.gmra.mrb[0].mxu0 %vm217_vm0, %v622_v15  ;;  %1500 = vmatpush3.bf16.msra.mxu1 %v1676_v4  ;;  %v735_v23 = vpack.c.bf16 %v1791_v21, %v1782_v19  ;;  %v172_v25 = vld [vmem:[%s1757_s29] sm:$0xff]  ;;  %v1805_v26 = vld [vmem:[%s1757_s29 + $0x10] sm:$0xff]  ;;  %v1810_v27 = vpack.c.bf16 %v1794_v22, %v1788_v20 }
  0x17   : > { %1548 = vmatpush3.bf16.msra.mxu0 %v1677_v5  ;;  %1495 = vmatprep.mubr.msk.bf16.mxu1 %vm217_vm0, %v1774_v17  ;;  %v1359_v29 = vld [vmem:[%s1757_s29 + $0x32] sm:$0xff]  ;;  %v1360_v30 = vld [vmem:[%s1757_s29 + $0x42] sm:$0xff]  ;;  %v180_v31 = vpack.c.bf16 %v1805_v26, %v172_v25 }
  0x18   : > { %1549 = vmatprep.subr.bf16.mxu0 %v1678_v16  ;;  %1501 = vmatprep.subr.bf16.mxu1 %v1679_v18  ;;  %v1361_v32 = vld [vmem:[%s1757_s29 + $0x52] sm:$0xff]  ;;  %v1362_v33 = vld [vmem:[%s1757_s29 + $0x62] sm:$0xff]  ;;  %v736_v34 = vpack.c.bf16 %v1360_v30, %v1359_v29  ;;  %v393_v55 = vpack.c.bf16 %v1359_v29, %v1791_v21 }
  0x19   : > { %1551 = vmatprep.mubr.msk.bf16.mxu0 %vm217_vm0, %v735_v23  ;;  %v174_v35 = vld [vmem:[%s1757_s29 + $0x20] sm:$0xff]  ;;  %v1825_v36 = vld [vmem:[%s1757_s29 + $0x30] sm:$0xff]  ;;  %v737_v37 = vpack.c.bf16 %v1362_v33, %v1361_v32  ;;  %v394_v58 = vpack.c.bf16 %v1361_v32, %v1360_v30 }
  0x1a   : > { %1502 = vmatpush3.bf16.msra.mxu1 %v1679_v18  ;;  %v1831_v39 = vld [vmem:[%s1757_s29 + $0x40] sm:$0xff]  ;;  %v1834_v40 = vld [vmem:[%s1757_s29 + $0x50] sm:$0xff]  ;;  %v181_v41 = vpack.c.bf16 %v1825_v36, %v174_v35  ;;  %v507_v63 = vpack.c.bf16 %v174_v35, %v1805_v26 }
  0x1b   : > { %1550 = vmatpush3.bf16.msra.mxu0 %v1678_v16  ;;  %1511 = vmatprep.subr.bf16.mxu1 %v1681_v28  ;;  %v1363_v42 = vld [vmem:[%s1757_s29 + $0x72] sm:$0xff]  ;;  %v1841_v43 = vld [vmem:[%s1757_s29 + $0x82] sm:$0xff]  ;;  %v182_v44 = vpack.c.bf16 %v1834_v40, %v1831_v39  ;;  %v508_v2 = vpack.c.bf16 %v1831_v39, %v1825_v36  ;;  %v1429_v16 = vld [vmem:[%s1948_s2] ss:$0 sm:$0xff] }
  0x1c   : > { %1559 = vmatprep.subr.bf16.mxu0 %v1680_v24  ;;  %v738_v47 = vpack.c.bf16 %v1841_v43, %v1363_v42  ;;  %v178_v48 = vld [vmem:[%s1757_s29 + $0x60] sm:$0xff]  ;;  %v179_v49 = vld [vmem:[%s1757_s29 + $0x70] sm:$0xff]  ;;  %v395_v62 = vpack.c.bf16 %v1363_v42, %v1362_v33 }
  0x1d   : > { %1496 = vmatmul.mubr.msk.bf16.gmra.mrb[4].mxu1 %vm217_vm0, %v1810_v27  ;;  %v384_v50 = vld [vmem:[%s1757_s29 + $0x2] sm:$0xff]  ;;  %v183_v52 = vpack.c.bf16 %v179_v49, %v178_v48  ;;  %v1382_v57 = vld [vmem:[%s1757_s29 + $0x90] sm:$0xff]  ;;  %v509_v6 = vpack.c.bf16 %v178_v48, %v1834_v40 }
  0x1e   : > { %1503 = vmatprep.mubr.msk.bf16.mxu1 %vm217_vm0, %v180_v31  ;;  %v392_v53 = vpack.c.bf16 %v1782_v19, %v384_v50  ;;  %v1381_v56 = vld [vmem:[%s1757_s29 + $0x80] sm:$0xff]  ;;  %v1400_v5 = vld [vmem:[%s1757_s29 + $0x91] sm:$0xff] }
  0x1f   : > { %v853_v61 = vpack.c.bf16 %v1382_v57, %v1381_v56  ;;  %v1399_v4 = vld [vmem:[%s1757_s29 + $0x81] sm:$0xff]  ;;  %v510_v8 = vpack.c.bf16 %v1381_v56, %v179_v49 }
  0x20   : > { %v967_v7 = vpack.c.bf16 %v1400_v5, %v1399_v4  ;;  %v624_v10 = vpack.c.bf16 %v1399_v4, %v1794_v22 }
  0x22   : > { %1552 = vmatmul.mubr.msk.bf16.vlgmr.msra.gmra.mrb[0].mxu0 %vm217_vm0, %v736_v34 }
  0x23   : > { %1560 = vmatpush3.bf16.msra.mxu0 %v1680_v24  ;;  %1555 = vmatprep.mubr.msk.bf16.mxu0 %vm217_vm0, %v737_v37 }
  0x24   : > { %1561 = vmatprep.subr.bf16.mxu0 %v1682_v38 }
  0x25   : > { %1504 = vmatmul.mubr.msk.bf16.vlgmr.msra.gmra.mrb[0].mxu1 %vm217_vm0, %v181_v41 }
  0x26   : > { %1512 = vmatpush3.bf16.msra.mxu1 %v1681_v28  ;;  %1507 = vmatprep.mubr.msk.bf16.mxu1 %vm217_vm0, %v182_v44 }
  0x27   : > { %1562 = vmatpush3.bf16.msra.mxu0 %v1682_v38  ;;  %1513 = vmatprep.subr.bf16.mxu1 %v1683_v45 }
  0x28   : > { %1571 = vmatprep.subr.bf16.mxu0 %v1684_v46 }
  0x2a   : > { %1556 = vmatmul.mubr.msk.bf16.gmra.mrb[4].mxu0 %vm217_vm0, %v738_v47  ;;  %1514 = vmatpush3.bf16.msra.mxu1 %v1683_v45 }
  0x2b   : > { %1563 = vmatprep.mubr.msk.bf16.mxu0 %vm217_vm0, %v181_v41  ;;  %1523 = vmatprep.subr.bf16.mxu1 %v1685_v51 }
  0x2d   : > { %1508 = vmatmul.mubr.msk.bf16.gmra.mrb[4].mxu1 %vm217_vm0, %v183_v52 }
  0x2e   : > { %1515 = vmatprep.mubr.msk.bf16.mxu1 %vm217_vm0, %v392_v53 }
  0x32   : > { %1564 = vmatmul.mubr.msk.bf16.vlgmr.msra.gmra.mrb[0].mxu0 %vm217_vm0, %v182_v44 }
  0x33   : > { %1572 = vmatpush3.bf16.msra.mxu0 %v1684_v46  ;;  %1567 = vmatprep.mubr.msk.bf16.mxu0 %vm217_vm0, %v183_v52 }
  0x34   : > { %1573 = vmatprep.subr.bf16.mxu0 %v1686_v54 }
  0x35   : > { %1516 = vmatmul.mubr.msk.bf16.vlgmr.msra.gmra.mrb[0].mxu1 %vm217_vm0, %v393_v55 }
  0x36   : > { %1524 = vmatpush3.bf16.msra.mxu1 %v1685_v51  ;;  %1519 = vmatprep.mubr.msk.bf16.mxu1 %vm217_vm0, %v394_v58 }
  0x37   : > { %1574 = vmatpush3.bf16.msra.mxu0 %v1686_v54  ;;  %1525 = vmatprep.subr.bf16.mxu1 %v1687_v59 }
  0x38   : > { %1583 = vmatprep.subr.bf16.mxu0 %v1688_v60 }
  0x3a   : > { %1568 = vmatmul.mubr.msk.bf16.gmra.mrb[4].mxu0 %vm217_vm0, %v853_v61  ;;  %1526 = vmatpush3.bf16.msra.mxu1 %v1687_v59 }
  0x3b   : > { %1575 = vmatprep.mubr.msk.bf16.mxu0 %vm217_vm0, %v1768_v14  ;;  %1595 = vmatprep.subr.bf16.mxu1 %v1732_v1 }
  0x3d   : > { %1520 = vmatmul.mubr.msk.bf16.gmra.mrb[4].mxu1 %vm217_vm0, %v395_v62 }
  0x3e   : > { %1527 = vmatprep.mubr.msk.bf16.mxu1 %vm217_vm0, %v507_v63 }
  0x42   : > { %1576 = vmatmul.mubr.msk.bf16.vlgmr.msra.gmra.mrb[0].mxu0 %vm217_vm0, %v1774_v17 }
  0x43   : > { %1584 = vmatpush3.bf16.msra.mxu0 %v1688_v60  ;;  %1579 = vmatprep.mubr.msk.bf16.mxu0 %vm217_vm0, %v1810_v27 }
  0x44   : > { %1585 = vmatprep.subr.bf16.mxu0 %v1689_v0 }
  0x45   : > { %1528 = vmatmul.mubr.msk.bf16.vlgmr.msra.gmra.mrb[0].mxu1 %vm217_vm0, %v508_v2 }
  0x46   : > { %1597 = vmatpush3.bf16.msra.mxu1 %v1732_v1  ;;  %1531 = vmatprep.mubr.msk.bf16.mxu1 %vm217_vm0, %v509_v6  ;;  %v1418_v1 = vld [vmem:[%s1757_s29 + $0x92] sm:$0xff]  ;;  %s1432_s29 = sshll.u32 %s1951_s13, 6 }
  0x47   : > { %1586 = vmatpush3.bf16.msra.mxu0 %v1689_v0  ;;  %1596 = vmatprep.subr.bf16.mxu1 %v1743_v3  ;;  %v1081_v11 = vpack.c.bf16 %v1418_v1, %v1841_v43  ;;  %s1925_s7 = scalar_lea.vmem %s1949_s3, %s1432_s29 }
  0x4a   : > { %1580 = vmatmul.mubr.msk.bf16.gmra.mrb[4].mxu0 %vm217_vm0, %v967_v7  ;;  %1598 = vmatpush3.bf16.msra.mxu1 %v1743_v3 }
  0x4b   : > { %1587 = vmatprep.mubr.msk.bf16.mxu0 %vm217_vm0, %v393_v55 }
  0x4d   : > { %1532 = vmatmul.mubr.msk.bf16.gmra.mrb[4].mxu1 %vm217_vm0, %v510_v8 }
  0x4e   : > { %1543 = vmatprep.mubr.msk.bf16.mxu1 %vm217_vm0, %v623_v9 }
  0x52   : > { %1588 = vmatmul.mubr.msk.bf16.vlgmr.msra.gmra.mrb[0].mxu0 %vm217_vm0, %v394_v58 }
  0x53   : > { %1591 = vmatprep.mubr.msk.bf16.mxu0 %vm217_vm0, %v395_v62 }
  0x59   : > { %1544 = vmatmul.mubr.msk.bf16.vlgmr.msra.gmra.mrb[4].mxu1 %vm217_vm0, %v624_v10 }
  0x5a   : > { %1592 = vmatmul.mubr.msk.bf16.gmra.mrb[4].mxu0 %vm217_vm0, %v1081_v11 }
 0x118   : > { %v1529_v3 = vpop.f32.mrb[0].mxu1 }
 0x119   : > { %v574_v12 = vpop.f32.mrb[1].mxu1 }
 0x11a   : > { %v1530_v13 = vpop.f32.mrb[2].mxu1 }
 0x11b   : > { %v577_v14 = vpop.f32.mrb[3].mxu1 }
 0x125   : > { %v1589_v15 = vpop.f32.mrb[0].mxu0 }
 0x126   : > { %v1599_v17 = vadd.f32 %v1589_v15, %v1529_v3  ;;  %v1145_v18 = vpop.f32.mrb[1].mxu0 }
 0x127   : > { %v1600_v19 = vadd.f32 %v1145_v18, %v574_v12  ;;  %v1590_v20 = vpop.f32.mrb[2].mxu0 }
 0x128   : > { %v1193_v21 = vadd.f32 %v1599_v17, %v1429_v16  ;;  %v1601_v22 = vadd.f32 %v1590_v20, %v1530_v13  ;;  %v1148_v23 = vpop.f32.mrb[3].mxu0 }
 0x129   : > { %v1191_v24 = vadd.f32 %v1600_v19, %v1429_v16  ;;  %v1602_v25 = vadd.f32 %v1148_v23, %v577_v14 }
 0x12a   : > { %vm1201_vm1 = vcmp.gt.f32.partialorder %v1193_v21, 0.0  ;;  %v1209_v26 = vmul.f32 0.2, %v1193_v21  ;;  %v1194_v27 = vadd.f32 %v1601_v22, %v1429_v16 }
 0x12b   : > { %vm1199_vm3 = vcmp.gt.f32.partialorder %v1191_v24, 0.0  ;;  %v1207_v28 = vmul.f32 0.2, %v1191_v24  ;;  %v1192_v29 = vadd.f32 %v1602_v25, %v1429_v16 }
 0x12c   : > { %v1217_v30 = vsel %vm1201_vm1, %v1193_v21, %v1209_v26  ;;  %vm1202_vm4 = vcmp.gt.f32.partialorder %v1194_v27, 0.0  ;;  %v1210_v31 = vmul.f32 0.2, %v1194_v27  ;;  %v1545_v34 = vpop.f32.mrb[4].mxu1 }
 0x12d   : > { %1226 = vst.msk [vmem:[%s1925_s7 + $0x10] sm:$0xff] %vm1223_vm2, %v1217_v30  ;;  %v1215_v32 = vsel %vm1199_vm3, %v1191_v24, %v1207_v28  ;;  %vm1200_vm5 = vcmp.gt.f32.partialorder %v1192_v29, 0.0  ;;  %v1208_v33 = vmul.f32 0.2, %v1192_v29  ;;  %v1593_v35 = vpop.f32.mrb[4].mxu0  ;;  %v704_v38 = vpop.f32.mrb[5].mxu1 }
 0x12e   : > { %1224 = vst.msk [vmem:[%s1925_s7] sm:$0xff] %vm1223_vm2, %v1215_v32  ;;  %v1218_v36 = vsel %vm1202_vm4, %v1194_v27, %v1210_v31  ;;  %v1603_v37 = vadd.f32 %v1593_v35, %v1545_v34  ;;  %v1161_v39 = vpop.f32.mrb[5].mxu0  ;;  %v1546_v42 = vpop.f32.mrb[6].mxu1 }
 0x12f   : > { %1227 = vst.msk [vmem:[%s1925_s7 + $0x18] sm:$0xff] %vm1223_vm2, %v1218_v36  ;;  %v1216_v40 = vsel %vm1200_vm5, %v1192_v29, %v1208_v33  ;;  %v1604_v41 = vadd.f32 %v1161_v39, %v704_v38  ;;  %v1594_v43 = vpop.f32.mrb[6].mxu0  ;;  %v707_v46 = vpop.f32.mrb[7].mxu1 }
 0x130   : > { %1225 = vst.msk [vmem:[%s1925_s7 + $0x8] sm:$0xff] %vm1223_vm2, %v1216_v40  ;;  %v1197_v44 = vadd.f32 %v1603_v37, %v1429_v16  ;;  %v1605_v45 = vadd.f32 %v1594_v43, %v1546_v42  ;;  %v1164_v47 = vpop.f32.mrb[7].mxu0 }
 0x131   : > { %v1195_v48 = vadd.f32 %v1604_v41, %v1429_v16  ;;  %v1606_v49 = vadd.f32 %v1164_v47, %v707_v46 }
 0x132   : > { %vm1205_vm6 = vcmp.gt.f32.partialorder %v1197_v44, 0.0  ;;  %v1213_v50 = vmul.f32 0.2, %v1197_v44  ;;  %v1198_v51 = vadd.f32 %v1605_v45, %v1429_v16 }
 0x133   : > { %vm1203_vm7 = vcmp.gt.f32.partialorder %v1195_v48, 0.0  ;;  %v1211_v52 = vmul.f32 0.2, %v1195_v48  ;;  %v1196_v53 = vadd.f32 %v1606_v49, %v1429_v16 }
 0x134   : > { %v1221_v54 = vsel %vm1205_vm6, %v1197_v44, %v1213_v50  ;;  %vm1206_vm8 = vcmp.gt.f32.partialorder %v1198_v51, 0.0  ;;  %v1214_v55 = vmul.f32 0.2, %v1198_v51 }
 0x135   : > { %1230 = vst.msk [vmem:[%s1925_s7 + $0x30] sm:$0xff] %vm1223_vm2, %v1221_v54  ;;  %v1219_v56 = vsel %vm1203_vm7, %v1195_v48, %v1211_v52  ;;  %vm1204_vm9 = vcmp.gt.f32.partialorder %v1196_v53, 0.0  ;;  %v1212_v57 = vmul.f32 0.2, %v1196_v53 }
 0x136   : > { %1228 = vst.msk [vmem:[%s1925_s7 + $0x20] sm:$0xff] %vm1223_vm2, %v1219_v56  ;;  %v1222_v58 = vsel %vm1206_vm8, %v1198_v51, %v1214_v55 }
 0x137   : > { %1231 = vst.msk [vmem:[%s1925_s7 + $0x38] sm:$0xff] %vm1223_vm2, %v1222_v58  ;;  %v1220_v59 = vsel %vm1204_vm9, %v1196_v53, %v1212_v57 }
 0x138   : > { %1229 = vst.msk [vmem:[%s1925_s7 + $0x28] sm:$0xff] %vm1223_vm2, %v1220_v59 }
 0x139 PF: > { %s13_s12 = sadd.s32 1, %s1696_s12  }
 0x13a   : > { %p10_p4 = scmp.ge.s32.totalorder %s13_s12, 4  }
 0x13c   :  { %12 = sbr.rel (!%p10_p4) target bundleno = 1 (0x1), region = 72 }

// kernel: fwd.17
= control target key start
LH: loop header
LB: loop body
LE: loop exit
PB: predicated region body
PF: predicated region fallthrough
CT: control target
= control target key end

     0   :  { %s4542_s12 = smov 0   ;;  %s5239_s0 = inlined_call_operand.vmem [shape: f32[2,1,18,18,32], index: 0, kind: input, shape index: {}]   ;;  %s5240_s1 = inlined_call_operand.vmem [shape: bf16[9,32,3], index: 1, kind: input, shape index: {}]   ;;  %s5241_s2 = inlined_call_operand.vmem [shape: f32[1,3], index: 2, kind: input, shape index: {}]   ;;  %s5242_s3 = inlined_call_operand.vmem [shape: f32[2,16,16,3], index: 3, kind: output, shape index: {}]  }
   0x1 LB: > { %s3183_s13 = sadd.s32 4294967295, %s4520_s12   ;;  %p3187_p0 = scmp.ge.s32.totalorder %s4520_s12, 1  ;;  %s4520_s12 = sphi %s4542_s12, %s13_s12  }
   0x2   : > { %p137_p1 = scmp.lt.s32.totalorder %s4520_s12, 3 }
   0x4   : > { %p138_p2 = pnand %p3187_p0, %p137_p1 }
   0x5   : > { %v4368_v0 = vld [vmem:[%s5240_s1 + $0x10] sm:$0xff] (!%p138_p2)   ;;  %p161_p3 = scmp.lt.s32.totalorder (!%p138_p2), %s3183_s13, 1  ;;  %v4556_v1 = vld [vmem:[%s5240_s1 + $0x40] sm:$0xff] (!%p138_p2)   ;;  %v4370_v2 = vld [vmem:[%s5240_s1 + $0x18] sm:$0xff] (!%p138_p2)   ;;  %vm289_vm0 = vcmask (!%p138_p2), 261120   ;;  %vm3095_vm1 = vcmask (!%p138_p2), 23552  }
   0x6   : > { %141 = sbr.rel (%p138_p2) target bundleno = 553 (0x229), region = 32  ;;  %3775 = vmatprep.subr.bf16.mxu1 (!%p138_p2), %v4368_v0  ;;  %3919 = vmatprep.subr.bf16.mxu0 (!%p138_p2), %v4556_v1  ;;  %v4567_v3 = vld [vmem:[%s5240_s1 + $0x48] sm:$0xff] (!%p138_p2)   ;;  %v4372_v4 = vld [vmem:[%s5240_s1] sm:$0xff] (!%p138_p2)   ;;  %v4373_v5 = vld [vmem:[%s5240_s1 + $0x50] sm:$0xff] (!%p138_p2)  }
   0x7   : > { %3776 = vmatpush3.bf16.msra.mxu1 (!%p138_p2), %v4368_v0  ;;  %3920 = vmatpush3.bf16.msra.mxu0 (!%p138_p2), %v4556_v1  ;;  %v4374_v18 = vld [vmem:[%s5240_s1 + $0x58] sm:$0xff] (!%p138_p2)   ;;  %v4375_v23 = vld [vmem:[%s5240_s1 + $0x8] sm:$0xff] (!%p138_p2)   ;;  %v4376_v25 = vld [vmem:[%s5240_s1 + $0x60] sm:$0xff] (!%p138_p2)  }
   0x8   : > { %3777 = vmatprep.subr.bf16.mxu1 (!%p138_p2), %v4370_v2  ;;  %3921 = vmatprep.subr.bf16.mxu0 (!%p138_p2), %v4567_v3  ;;  %v4643_v33 = vld [vmem:[%s5240_s1 + $0x20] sm:$0xff] (!%p138_p2)   ;;  %v4378_v52 = vld [vmem:[%s5240_s1 + $0x68] sm:$0xff] (!%p138_p2)   ;;  %v4706_v61 = vld [vmem:[%s5240_s1 + $0x70] sm:$0xff] (!%p138_p2)  }
   0xb   : > { %3778 = vmatpush3.bf16.msra.mxu1 (!%p138_p2), %v4370_v2  ;;  %3922 = vmatpush3.bf16.msra.mxu0 (!%p138_p2), %v4567_v3 }
   0xc   : > { %3811 = vmatprep.subr.bf16.mxu1 (!%p138_p2), %v4372_v4  ;;  %3955 = vmatprep.subr.bf16.mxu0 (!%p138_p2), %v4373_v5 }
   0xd   : > { %s5244_s13 = smov (!%p161_p3, %s3183_s13), 1 }
   0xe   : > { %s4359_s22 = smul.u32 432, %s5244_s13  ;;  %s3612_s4 = sshll.u32 %s5244_s13, 8 }
   0xf   : > { %s5150_s6 = scalar_lea.vmem %s5242_s3, %s3612_s4 }
  0x10   : > { %s4581_s29 = scalar_lea.vmem %s5239_s0, %s4359_s22 }
  0x11   : > { %v224_v6 = vld [vmem:[%s4581_s29 + $0x1] sm:$0xff]  ;;  %v225_v7 = vld [vmem:[%s4581_s29 + $0x9] sm:$0xff]  ;;  %v3307_v8 = vld [vmem:[%s4581_s29 + $0x19] sm:$0xff] }
  0x12   : > { %v256_v9 = vpack.c.bf16 %v225_v7, %v224_v6  ;;  %v3308_v10 = vld [vmem:[%s4581_s29 + $0x21] sm:$0xff]  ;;  %v3309_v11 = vld [vmem:[%s4581_s29 + $0x31] sm:$0xff]  ;;  %v3310_v12 = vld [vmem:[%s4581_s29 + $0x39] sm:$0xff] }
  0x13   : > { %v1365_v13 = vpack.c.bf16 %v3308_v10, %v3307_v8  ;;  %v4590_v14 = vpack.c.bf16 %v3310_v12, %v3309_v11  ;;  %v3311_v15 = vld [vmem:[%s4581_s29 + $0x49] sm:$0xff]  ;;  %v3312_v16 = vld [vmem:[%s4581_s29 + $0x51] sm:$0xff]  ;;  %v3313_v19 = vld [vmem:[%s4581_s29 + $0x61] sm:$0xff] }
  0x14   : > { %3779 = vmatprep.mubr.msk.bf16.mxu1 %vm289_vm0, %v256_v9  ;;  %v4595_v17 = vpack.c.bf16 %v3312_v16, %v3311_v15  ;;  %v3314_v20 = vld [vmem:[%s4581_s29 + $0x69] sm:$0xff]  ;;  %v3315_v21 = vld [vmem:[%s4581_s29 + $0x79] sm:$0xff]  ;;  %v3316_v22 = vld [vmem:[%s4581_s29 + $0x81] sm:$0xff] }
  0x15   : > { %3923 = vmatprep.mubr.msk.bf16.mxu0 %vm289_vm0, %v1365_v13  ;;  %3780 = vmatmul.mubr.msk.bf16.vlgmr.msra.gmra.mrb[0].mxu1 %vm289_vm0, %v1365_v13  ;;  %v4615_v24 = vpack.c.bf16 %v3314_v20, %v3313_v19  ;;  %v4620_v26 = vpack.c.bf16 %v3316_v22, %v3315_v21  ;;  %v3317_v27 = vld [vmem:[%s4581_s29 + $0x91] sm:$0xff]  ;;  %v3318_v28 = vld [vmem:[%s4581_s29 + $0x99] sm:$0xff]  ;;  %v3319_v29 = vld [vmem:[%s4581_s29 + $0xa9] sm:$0xff] }
  0x16   : > { %3924 = vmatmul.mubr.msk.bf16.vlgmr.msra.gmra.mrb[0].mxu0 %vm289_vm0, %v4590_v14  ;;  %3812 = vmatpush3.bf16.msra.mxu1 %v4372_v4  ;;  %v3320_v30 = vld [vmem:[%s4581_s29 + $0xb1] sm:$0xff]  ;;  %v4634_v31 = vpack.c.bf16 %v3318_v28, %v3317_v27  ;;  %v3321_v34 = vld [vmem:[%s4581_s29 + $0xc1] sm:$0xff]  ;;  %v3322_v35 = vld [vmem:[%s4581_s29 + $0xc9] sm:$0xff] }
  0x17   : > { %3956 = vmatpush3.bf16.msra.mxu0 %v4373_v5  ;;  %3783 = vmatprep.mubr.msk.bf16.mxu1 %vm289_vm0, %v4590_v14  ;;  %v4636_v32 = vpack.c.bf16 %v3320_v30, %v3319_v29  ;;  %v3361_v36 = vld [vmem:[%s4581_s29 + $0x1a] sm:$0xff]  ;;  %v3362_v37 = vld [vmem:[%s4581_s29 + $0x22] sm:$0xff]  ;;  %v4656_v38 = vpack.c.bf16 %v3322_v35, %v3321_v34  ;;  %v3363_v42 = vld [vmem:[%s4581_s29 + $0x32] sm:$0xff] }
  0x18   : > { %3927 = vmatprep.mubr.msk.bf16.mxu0 %vm289_vm0, %v4595_v17  ;;  %3957 = vmatprep.subr.bf16.mxu0 %v4374_v18  ;;  %v4658_v39 = vpack.c.bf16 %v3362_v37, %v3361_v36  ;;  %v242_v40 = vld [vmem:[%s4581_s29 + $0xd9] sm:$0xff]  ;;  %v243_v41 = vld [vmem:[%s4581_s29 + $0xe1] sm:$0xff]  ;;  %v244_v44 = vld [vmem:[%s4581_s29 + $0xf1] sm:$0xff] }
  0x19   : > { %3813 = vmatprep.subr.bf16.mxu1 %v4375_v23  ;;  %v3364_v43 = vld [vmem:[%s4581_s29 + $0x3a] sm:$0xff]  ;;  %v3365_v46 = vld [vmem:[%s4581_s29 + $0x4a] sm:$0xff]  ;;  %v3366_v47 = vld [vmem:[%s4581_s29 + $0x52] sm:$0xff]  ;;  %v4676_v48 = vpack.c.bf16 %v243_v41, %v242_v40 }
  0x1a   : > { %3814 = vmatpush3.bf16.msra.mxu1 %v4375_v23  ;;  %v245_v45 = vld [vmem:[%s4581_s29 + $0xf9] sm:$0xff]  ;;  %v4678_v49 = vpack.c.bf16 %v3364_v43, %v3363_v42  ;;  %v4682_v51 = vpack.c.bf16 %v3366_v47, %v3365_v46  ;;  %v246_v53 = vld [vmem:[%s4581_s29 + $0x109] sm:$0xff]  ;;  %v247_v54 = vld [vmem:[%s4581_s29 + $0x111] sm:$0xff] }
  0x1b   : > { %3958 = vmatpush3.bf16.msra.mxu0 %v4374_v18  ;;  %3847 = vmatprep.subr.bf16.mxu1 %v4643_v33  ;;  %v4680_v50 = vpack.c.bf16 %v245_v45, %v244_v44  ;;  %v3367_v55 = vld [vmem:[%s4581_s29 + $0x62] sm:$0xff]  ;;  %v3368_v56 = vld [vmem:[%s4581_s29 + $0x6a] sm:$0xff]  ;;  %v3369_v59 = vld [vmem:[%s4581_s29 + $0x7a] sm:$0xff]  ;;  %v4708_v62 = vpack.c.bf16 %v247_v54, %v246_v53 }
  0x1c   : > { %3991 = vmatprep.subr.bf16.mxu0 %v4376_v25  ;;  %v248_v57 = vld [vmem:[%s4581_s29 + $0x121] sm:$0xff]  ;;  %v249_v58 = vld [vmem:[%s4581_s29 + $0x129] sm:$0xff]  ;;  %v4710_v63 = vpack.c.bf16 %v3368_v56, %v3367_v55  ;;  %v250_v4 = vld [vmem:[%s4581_s29 + $0x139] sm:$0xff] }
  0x1d   : > { %3784 = vmatmul.mubr.msk.bf16.gmra.mrb[4].mxu1 %vm289_vm0, %v4595_v17  ;;  %v3370_v60 = vld [vmem:[%s4581_s29 + $0x82] sm:$0xff]  ;;  %v4712_v0 = vpack.c.bf16 %v249_v58, %v248_v57  ;;  %v3371_v6 = vld [vmem:[%s4581_s29 + $0x92] sm:$0xff]  ;;  %v3372_v7 = vld [vmem:[%s4581_s29 + $0x9a] sm:$0xff] }
  0x1e   : > { %3928 = vmatmul.mubr.msk.bf16.gmra.mrb[4].mxu0 %vm289_vm0, %v4615_v24  ;;  %3787 = vmatprep.mubr.msk.bf16.mxu1 %vm289_vm0, %v4615_v24  ;;  %v4714_v2 = vpack.c.bf16 %v3370_v60, %v3369_v59  ;;  %v251_v5 = vld [vmem:[%s4581_s29 + $0x141] sm:$0xff]  ;;  %v252_v8 = vld [vmem:[%s4581_s29 + $0x151] sm:$0xff]  ;;  %v253_v9 = vld [vmem:[%s4581_s29 + $0x159] sm:$0xff]  ;;  %v4735_v13 = vpack.c.bf16 %v3372_v7, %v3371_v6 }
  0x1f   : > { %3931 = vmatprep.mubr.msk.bf16.mxu0 %vm289_vm0, %v4620_v26  ;;  %v3373_v10 = vld [vmem:[%s4581_s29 + $0xaa] sm:$0xff]  ;;  %v3374_v11 = vld [vmem:[%s4581_s29 + $0xb2] sm:$0xff]  ;;  %v4733_v12 = vpack.c.bf16 %v251_v5, %v250_v4  ;;  %v4737_v15 = vpack.c.bf16 %v253_v9, %v252_v8  ;;  %v3375_v20 = vld [vmem:[%s4581_s29 + $0xc2] sm:$0xff] }
  0x20   : > { %v4739_v16 = vpack.c.bf16 %v3374_v11, %v3373_v10  ;;  %v254_v18 = vld [vmem:[%s4581_s29 + $0x169] sm:$0xff]  ;;  %v255_v19 = vld [vmem:[%s4581_s29 + $0x171] sm:$0xff]  ;;  %v172_v22 = vld [vmem:[%s4581_s29] sm:$0xff] }
  0x21   : > { %v3376_v21 = vld [vmem:[%s4581_s29 + $0xca] sm:$0xff]  ;;  %v3378_v27 = vld [vmem:[%s4581_s29 + $0xe2] sm:$0xff]  ;;  %v4757_v28 = vpack.c.bf16 %v255_v19, %v254_v18  ;;  %v174_v35 = vld [vmem:[%s4581_s29 + $0x18] sm:$0xff] }
  0x22   : > { %v173_v23 = vld [vmem:[%s4581_s29 + $0x8] sm:$0xff]  ;;  %v4759_v29 = vpack.c.bf16 %v3376_v21, %v3375_v20  ;;  %v175_v36 = vld [vmem:[%s4581_s29 + $0x20] sm:$0xff]  ;;  %v3379_v37 = vld [vmem:[%s4581_s29 + $0xf2] sm:$0xff] }
  0x23   : > { %v204_v30 = vpack.c.bf16 %v173_v23, %v172_v22  ;;  %v3380_v40 = vld [vmem:[%s4581_s29 + $0xfa] sm:$0xff]  ;;  %v176_v41 = vld [vmem:[%s4581_s29 + $0x30] sm:$0xff]  ;;  %v4778_v45 = vpack.c.bf16 %v175_v36, %v174_v35  ;;  %v4379_v53 = vld [vmem:[%s5240_s1 + $0x28] sm:$0xff]  }
  0x24   : > { %v177_v42 = vld [vmem:[%s4581_s29 + $0x38] sm:$0xff]  ;;  %v3381_v43 = vld [vmem:[%s4581_s29 + $0x10a] sm:$0xff]  ;;  %v4780_v46 = vpack.c.bf16 %v3380_v40, %v3379_v37  ;;  %v3383_v56 = vld [vmem:[%s4581_s29 + $0x122] sm:$0xff] }
  0x25   : > { %3788 = vmatmul.mubr.msk.bf16.gmra.mrb[8].mxu1 %vm289_vm0, %v4620_v26  ;;  %v3382_v44 = vld [vmem:[%s4581_s29 + $0x112] sm:$0xff]  ;;  %v4782_v47 = vpack.c.bf16 %v177_v42, %v176_v41  ;;  %v178_v54 = vld [vmem:[%s4581_s29 + $0x48] sm:$0xff]  ;;  %v180_v58 = vld [vmem:[%s4581_s29 + $0x60] sm:$0xff] }
  0x26   : > { %3932 = vmatmul.mubr.msk.bf16.gmra.mrb[8].mxu0 %vm289_vm0, %v4634_v31  ;;  %3791 = vmatprep.mubr.msk.bf16.mxu1 %vm289_vm0, %v4634_v31  ;;  %v179_v55 = vld [vmem:[%s4581_s29 + $0x50] sm:$0xff]  ;;  %v181_v59 = vld [vmem:[%s4581_s29 + $0x68] sm:$0xff]  ;;  %v182_v9 = vld [vmem:[%s4581_s29 + $0x78] sm:$0xff] }
  0x27   : > { %3935 = vmatprep.mubr.msk.bf16.mxu0 %vm289_vm0, %v4636_v32  ;;  %v3384_v57 = vld [vmem:[%s4581_s29 + $0x12a] sm:$0xff]  ;;  %v3386_v4 = vld [vmem:[%s4581_s29 + $0x142] sm:$0xff]  ;;  %v4811_v5 = vpack.c.bf16 %v179_v55, %v178_v54  ;;  %v4815_v7 = vpack.c.bf16 %v181_v59, %v180_v58  ;;  %v3387_v11 = vld [vmem:[%s4581_s29 + $0x152] sm:$0xff] }
  0x28   : > { %v4807_v60 = vld [vmem:[%s5240_s1 + $0x30] sm:$0xff]   ;;  %v4813_v6 = vpack.c.bf16 %v3384_v57, %v3383_v56  ;;  %v183_v10 = vld [vmem:[%s4581_s29 + $0x80] sm:$0xff]  ;;  %v185_v20 = vld [vmem:[%s4581_s29 + $0x98] sm:$0xff] }
  0x29   : > { %v3388_v18 = vld [vmem:[%s4581_s29 + $0x15a] sm:$0xff]  ;;  %v184_v19 = vld [vmem:[%s4581_s29 + $0x90] sm:$0xff]  ;;  %v4836_v23 = vpack.c.bf16 %v183_v10, %v182_v9  ;;  %v186_v35 = vld [vmem:[%s4581_s29 + $0xa8] sm:$0xff] }
  0x2a   : > { %v3389_v21 = vld [vmem:[%s4581_s29 + $0x16a] sm:$0xff]  ;;  %v3390_v22 = vld [vmem:[%s4581_s29 + $0x172] sm:$0xff]  ;;  %v3391_v37 = vld [vmem:[%s4581_s29 + $0x182] sm:$0xff] }
  0x2b   : > { %v187_v36 = vld [vmem:[%s4581_s29 + $0xb0] sm:$0xff]  ;;  %v188_v41 = vld [vmem:[%s4581_s29 + $0xc0] sm:$0xff]  ;;  %v189_v42 = vld [vmem:[%s4581_s29 + $0xc8] sm:$0xff] }
  0x2c   : > { %v3392_v40 = vld [vmem:[%s4581_s29 + $0x18a] sm:$0xff]  ;;  %v190_v54 = vld [vmem:[%s4581_s29 + $0xd8] sm:$0xff]  ;;  %v191_v55 = vld [vmem:[%s4581_s29 + $0xe0] sm:$0xff] }
  0x2d   : > { %3792 = vmatmul.mubr.msk.bf16.gmra.mrb[12].mxu1 %vm289_vm0, %v4636_v32  ;;  %v192_v56 = vld [vmem:[%s4581_s29 + $0xf0] sm:$0xff]  ;;  %v193_v57 = vld [vmem:[%s4581_s29 + $0xf8] sm:$0xff]  ;;  %v4876_v58 = vpack.c.bf16 %v191_v55, %v190_v54  ;;  %v196_v10 = vld [vmem:[%s4581_s29 + $0x120] sm:$0xff] }
  0x2e   : > { %3936 = vmatmul.mubr.msk.bf16.gmra.mrb[12].mxu0 %vm289_vm0, %v4656_v38  ;;  %3795 = vmatprep.mubr.msk.bf16.mxu1 %vm289_vm0, %v4656_v38  ;;  %v4878_v59 = vpack.c.bf16 %v193_v57, %v192_v56  ;;  %v195_v9 = vld [vmem:[%s4581_s29 + $0x110] sm:$0xff]  ;;  %v4383_v57 = vld [vmem:[%s5240_s1 + $0x38] sm:$0xff]  }
  0x2f   : > { %3959 = vmatprep.mubr.msk.bf16.mxu0 %vm289_vm0, %v4658_v39  ;;  %v721_v54 = vld [vmem:[%s4581_s29 + $0xa] sm:$0xff] }
  0x35   : > { %3796 = vmatmul.mubr.msk.bf16.gmra.mrb[16].mxu1 %vm289_vm0, %v4676_v48 }
  0x36   : > { %3960 = vmatmul.mubr.msk.bf16.vlgmr.msra.gmra.mrb[0].mxu0 %vm289_vm0, %v4678_v49  ;;  %3799 = vmatprep.mubr.msk.bf16.mxu1 %vm289_vm0, %v4680_v50 }
  0x37   : > { %3992 = vmatpush3.bf16.msra.mxu0 %v4376_v25  ;;  %3963 = vmatprep.mubr.msk.bf16.mxu0 %vm289_vm0, %v4682_v51  ;;  %v3377_v25 = vld [vmem:[%s4581_s29 + $0xda] sm:$0xff] }
  0x38   : > { %3993 = vmatprep.subr.bf16.mxu0 %v4378_v52  ;;  %v4761_v34 = vpack.c.bf16 %v3378_v27, %v3377_v25  ;;  %v4838_v25 = vpack.c.bf16 %v3388_v18, %v3387_v11  ;;  %v4840_v27 = vpack.c.bf16 %v185_v20, %v184_v19  ;;  %v197_v11 = vld [vmem:[%s4581_s29 + $0x128] sm:$0xff]  ;;  %v4384_v18 = vld [vmem:[%s5240_s1 + $0x80] sm:$0xff]  }
  0x39   : > { %v4901_v20 = vpack.c.bf16 %v197_v11, %v196_v10  ;;  %v4385_v11 = vld [vmem:[%s5240_s1 + $0x88] sm:$0xff]  }
  0x3b   : > { %3994 = vmatpush3.bf16.msra.mxu0 %v4378_v52  ;;  %v4784_v52 = vpack.c.bf16 %v3382_v44, %v3381_v43  ;;  %v4858_v43 = vpack.c.bf16 %v187_v36, %v186_v35  ;;  %v4860_v44 = vpack.c.bf16 %v3392_v40, %v3391_v37  ;;  %v201_v35 = vld [vmem:[%s4581_s29 + $0x158] sm:$0xff]  ;;  %v202_v40 = vld [vmem:[%s4581_s29 + $0x168] sm:$0xff] }
  0x3c   : > { %4027 = vmatprep.subr.bf16.mxu0 %v4706_v61 }
  0x3d   : > { %3800 = vmatmul.mubr.msk.bf16.gmra.mrb[20].mxu1 %vm289_vm0, %v4708_v62 }
  0x3e   : > { %3964 = vmatmul.mubr.msk.bf16.gmra.mrb[4].mxu0 %vm289_vm0, %v4710_v63  ;;  %3803 = vmatprep.mubr.msk.bf16.mxu1 %vm289_vm0, %v4712_v0 }
  0x3f   : > { %3967 = vmatprep.mubr.msk.bf16.mxu0 %vm289_vm0, %v4714_v2 }
  0x45   : > { %3804 = vmatmul.mubr.msk.bf16.gmra.mrb[24].mxu1 %vm289_vm0, %v4733_v12 }
  0x46   : > { %3968 = vmatmul.mubr.msk.bf16.gmra.mrb[8].mxu0 %vm289_vm0, %v4735_v13  ;;  %3807 = vmatprep.mubr.msk.bf16.mxu1 %vm289_vm0, %v4737_v15 }
  0x47   : > { %3971 = vmatprep.mubr.msk.bf16.mxu0 %vm289_vm0, %v4739_v16 }
  0x4d   : > { %3808 = vmatmul.mubr.msk.bf16.gmra.mrb[28].mxu1 %vm289_vm0, %v4757_v28 }
  0x4e   : > { %3972 = vmatmul.mubr.msk.bf16.gmra.mrb[12].mxu0 %vm289_vm0, %v4759_v29  ;;  %3815 = vmatprep.mubr.msk.bf16.mxu1 %vm289_vm0, %v204_v30  ;;  %v4842_v30 = vpack.c.bf16 %v3390_v22, %v3389_v21  ;;  %v199_v21 = vld [vmem:[%s4581_s29 + $0x140] sm:$0xff]  ;;  %v200_v22 = vld [vmem:[%s4581_s29 + $0x150] sm:$0xff] }
  0x4f   : > { %3975 = vmatprep.mubr.msk.bf16.mxu0 %vm289_vm0, %v4761_v34  ;;  %v4917_v37 = vpack.c.bf16 %v201_v35, %v200_v22 }
  0x55   : > { %3816 = vmatmul.mubr.msk.bf16.vlgmr.msra.gmra.mrb[0].mxu1 %vm289_vm0, %v4778_v45 }
  0x56   : > { %3976 = vmatmul.mubr.msk.bf16.gmra.mrb[16].mxu0 %vm289_vm0, %v4780_v46  ;;  %3848 = vmatpush3.bf16.msra.mxu1 %v4643_v33  ;;  %v3385_v33 = vld [vmem:[%s4581_s29 + $0x13a] sm:$0xff] }
  0x57   : > { %3819 = vmatprep.mubr.msk.bf16.mxu1 %vm289_vm0, %v4782_v47  ;;  %3979 = vmatprep.mubr.msk.bf16.mxu0 %vm289_vm0, %v4784_v52  ;;  %v4817_v8 = vpack.c.bf16 %v3386_v4, %v3385_v33  ;;  %v4382_v33 = vld [vmem:[%s5240_s1 + $0x78] sm:$0xff]   ;;  %v194_v4 = vld [vmem:[%s4581_s29 + $0x108] sm:$0xff] }
  0x58   : > { %3849 = vmatprep.subr.bf16.mxu1 %v4379_v53  ;;  %v4899_v19 = vpack.c.bf16 %v195_v9, %v194_v4  ;;  %v3445_v4 = vld [vmem:[%s4581_s29 + $0x198] sm:$0xff]  ;;  %v3446_v9 = vld [vmem:[%s4581_s29 + $0x1a0] sm:$0xff] }
  0x59   : > { %v1993_v10 = vpack.c.bf16 %v3446_v9, %v3445_v4 }
  0x5a   : > { %3850 = vmatpush3.bf16.msra.mxu1 %v4379_v53  ;;  %v4862_v53 = vpack.c.bf16 %v189_v42, %v188_v41  ;;  %v203_v41 = vld [vmem:[%s4581_s29 + $0x170] sm:$0xff]  ;;  %v720_v42 = vld [vmem:[%s4581_s29 + $0x2] sm:$0xff] }
  0x5b   : > { %3883 = vmatprep.subr.bf16.mxu1 %v4807_v60  ;;  %v4931_v55 = vpack.c.bf16 %v203_v41, %v202_v40  ;;  %v752_v56 = vpack.c.bf16 %v721_v54, %v720_v42 }
  0x5d   : > { %3820 = vmatmul.mubr.msk.bf16.gmra.mrb[4].mxu1 %vm289_vm0, %v4811_v5 }
  0x5e   : > { %3980 = vmatmul.mubr.msk.bf16.gmra.mrb[20].mxu0 %vm289_vm0, %v4813_v6  ;;  %3823 = vmatprep.mubr.msk.bf16.mxu1 %vm289_vm0, %v4815_v7 }
  0x5f   : > { %3983 = vmatprep.mubr.msk.bf16.mxu0 %vm289_vm0, %v4817_v8 }
  0x65   : > { %3824 = vmatmul.mubr.msk.bf16.gmra.mrb[8].mxu1 %vm289_vm0, %v4836_v23 }
  0x66   : > { %3984 = vmatmul.mubr.msk.bf16.gmra.mrb[24].mxu0 %vm289_vm0, %v4838_v25  ;;  %3827 = vmatprep.mubr.msk.bf16.mxu1 %vm289_vm0, %v4840_v27 }
  0x67   : > { %3987 = vmatprep.mubr.msk.bf16.mxu0 %vm289_vm0, %v4842_v30 }
  0x6d   : > { %3828 = vmatmul.mubr.msk.bf16.gmra.mrb[12].mxu1 %vm289_vm0, %v4858_v43 }
  0x6e   : > { %3988 = vmatmul.mubr.msk.bf16.gmra.mrb[28].mxu0 %vm289_vm0, %v4860_v44  ;;  %3831 = vmatprep.mubr.msk.bf16.mxu1 %vm289_vm0, %v4862_v53 }
  0x6f   : > { %3995 = vmatprep.mubr.msk.bf16.mxu0 %vm289_vm0, %v4782_v47 }
  0x75   : > { %3832 = vmatmul.mubr.msk.bf16.gmra.mrb[16].mxu1 %vm289_vm0, %v4876_v58 }
  0x76   : > { %3996 = vmatmul.mubr.msk.bf16.vlgmr.msra.gmra.mrb[0].mxu0 %vm289_vm0, %v4811_v5  ;;  %3835 = vmatprep.mubr.msk.bf16.mxu1 %vm289_vm0, %v4878_v59 }
  0x77   : > { %4028 = vmatpush3.bf16.msra.mxu0 %v4706_v61  ;;  %3999 = vmatprep.mubr.msk.bf16.mxu0 %vm289_vm0, %v4815_v7  ;;  %v198_v61 = vld [vmem:[%s4581_s29 + $0x138] sm:$0xff] }
  0x78   : > { %4029 = vmatprep.subr.bf16.mxu0 %v4382_v33  ;;  %v4915_v36 = vpack.c.bf16 %v199_v21, %v198_v61 }
  0x7b   : > { %4030 = vmatpush3.bf16.msra.mxu0 %v4382_v33 }
  0x7c   : > { %4063 = vmatprep.subr.bf16.mxu0 %v4384_v18 }
  0x7d   : > { %3836 = vmatmul.mubr.msk.bf16.gmra.mrb[20].mxu1 %vm289_vm0, %v4899_v19 }
  0x7e   : > { %4000 = vmatmul.mubr.msk.bf16.gmra.mrb[4].mxu0 %vm289_vm0, %v4836_v23  ;;  %3839 = vmatprep.mubr.msk.bf16.mxu1 %vm289_vm0, %v4901_v20 }
  0x7f   : > { %4003 = vmatprep.mubr.msk.bf16.mxu0 %vm289_vm0, %v4840_v27 }
  0x85   : > { %3840 = vmatmul.mubr.msk.bf16.gmra.mrb[24].mxu1 %vm289_vm0, %v4915_v36 }
  0x86   : > { %4004 = vmatmul.mubr.msk.bf16.gmra.mrb[8].mxu0 %vm289_vm0, %v4858_v43  ;;  %3843 = vmatprep.mubr.msk.bf16.mxu1 %vm289_vm0, %v4917_v37 }
  0x87   : > { %4007 = vmatprep.mubr.msk.bf16.mxu0 %vm289_vm0, %v4862_v53 }
  0x8d   : > { %3844 = vmatmul.mubr.msk.bf16.gmra.mrb[28].mxu1 %vm289_vm0, %v4931_v55 }
  0x8e   : > { %4008 = vmatmul.mubr.msk.bf16.gmra.mrb[12].mxu0 %vm289_vm0, %v4876_v58  ;;  %3851 = vmatprep.mubr.msk.bf16.mxu1 %vm289_vm0, %v752_v56 }
  0x8f   : > { %4011 = vmatprep.mubr.msk.bf16.mxu0 %vm289_vm0, %v4878_v59 }
  0x95   : > { %3852 = vmatmul.mubr.msk.bf16.vlgmr.msra.gmra.mrb[0].mxu1 %vm289_vm0, %v4658_v39  ;;  %v3443_v39 = vld [vmem:[%s4581_s29 + $0x180] sm:$0xff] }
  0x96   : > { %4012 = vmatmul.mubr.msk.bf16.gmra.mrb[16].mxu0 %vm289_vm0, %v4899_v19  ;;  %3884 = vmatpush3.bf16.msra.mxu1 %v4807_v60  ;;  %v3444_v60 = vld [vmem:[%s4581_s29 + $0x188] sm:$0xff] }
  0x97   : > { %3855 = vmatprep.mubr.msk.bf16.mxu1 %vm289_vm0, %v4678_v49  ;;  %4015 = vmatprep.mubr.msk.bf16.mxu0 %vm289_vm0, %v4901_v20  ;;  %v4963_v33 = vpack.c.bf16 %v3444_v60, %v3443_v39 }
  0x98   : > { %3885 = vmatprep.subr.bf16.mxu1 %v4383_v57 }
  0x9a   : > { %3886 = vmatpush3.bf16.msra.mxu1 %v4383_v57 }
  0x9b   : > { %4099 = vmatprep.subr.bf16.mxu1 %v4556_v1 }
  0x9d   : > { %3856 = vmatmul.mubr.msk.bf16.gmra.mrb[4].mxu1 %vm289_vm0, %v4682_v51 }
  0x9e   : > { %4016 = vmatmul.mubr.msk.bf16.gmra.mrb[20].mxu0 %vm289_vm0, %v4915_v36  ;;  %3859 = vmatprep.mubr.msk.bf16.mxu1 %vm289_vm0, %v4710_v63 }
  0x9f   : > { %4019 = vmatprep.mubr.msk.bf16.mxu0 %vm289_vm0, %v4917_v37 }
  0xa5   : > { %3860 = vmatmul.mubr.msk.bf16.gmra.mrb[8].mxu1 %vm289_vm0, %v4714_v2 }
  0xa6   : > { %4020 = vmatmul.mubr.msk.bf16.gmra.mrb[24].mxu0 %vm289_vm0, %v4931_v55  ;;  %3863 = vmatprep.mubr.msk.bf16.mxu1 %vm289_vm0, %v4735_v13 }
  0xa7   : > { %4023 = vmatprep.mubr.msk.bf16.mxu0 %vm289_vm0, %v4963_v33 }
  0xad   : > { %3864 = vmatmul.mubr.msk.bf16.gmra.mrb[12].mxu1 %vm289_vm0, %v4739_v16 }
  0xae   : > { %4024 = vmatmul.mubr.msk.bf16.gmra.mrb[28].mxu0 %vm289_vm0, %v1993_v10  ;;  %3867 = vmatprep.mubr.msk.bf16.mxu1 %vm289_vm0, %v4759_v29 }
  0xaf   : > { %4031 = vmatprep.mubr.msk.bf16.mxu0 %vm289_vm0, %v4590_v14  ;;  %v3498_v14 = vld [vmem:[%s4581_s29 + $0x189] sm:$0xff] }
  0xb5   : > { %3868 = vmatmul.mubr.msk.bf16.gmra.mrb[16].mxu1 %vm289_vm0, %v4761_v34 }
  0xb6   : > { %4032 = vmatmul.mubr.msk.bf16.vlgmr.msra.gmra.mrb[0].mxu0 %vm289_vm0, %v4595_v17  ;;  %3871 = vmatprep.mubr.msk.bf16.mxu1 %vm289_vm0, %v4780_v46 }
  0xb7   : > { %4064 = vmatpush3.bf16.msra.mxu0 %v4384_v18  ;;  %4035 = vmatprep.mubr.msk.bf16.mxu0 %vm289_vm0, %v4615_v24  ;;  %v3500_v24 = vld [vmem:[%s4581_s29 + $0x1a1] sm:$0xff] }
  0xb8   : > { %4065 = vmatprep.subr.bf16.mxu0 %v4385_v11 }
  0xbb   : > { %4066 = vmatpush3.bf16.msra.mxu0 %v4385_v11 }
  0xbd   : > { %3872 = vmatmul.mubr.msk.bf16.gmra.mrb[20].mxu1 %vm289_vm0, %v4784_v52 }
  0xbe   : > { %4036 = vmatmul.mubr.msk.bf16.gmra.mrb[4].mxu0 %vm289_vm0, %v4620_v26  ;;  %3875 = vmatprep.mubr.msk.bf16.mxu1 %vm289_vm0, %v4813_v6 }
  0xbf   : > { %4039 = vmatprep.mubr.msk.bf16.mxu0 %vm289_vm0, %v4634_v31  ;;  %v3553_v31 = vld [vmem:[%s4581_s29 + $0x19a] sm:$0xff] }
  0xc5   : > { %3876 = vmatmul.mubr.msk.bf16.gmra.mrb[24].mxu1 %vm289_vm0, %v4817_v8 }
  0xc6   : > { %4040 = vmatmul.mubr.msk.bf16.gmra.mrb[8].mxu0 %vm289_vm0, %v4636_v32  ;;  %3879 = vmatprep.mubr.msk.bf16.mxu1 %vm289_vm0, %v4838_v25  ;;  %v3554_v32 = vld [vmem:[%s4581_s29 + $0x1a2] sm:$0xff] }
  0xc7   : > { %4043 = vmatprep.mubr.msk.bf16.mxu0 %vm289_vm0, %v4656_v38  ;;  %v2605_v38 = vpack.c.bf16 %v3554_v32, %v3553_v31 }
  0xcd   : > { %3880 = vmatmul.mubr.msk.bf16.gmra.mrb[28].mxu1 %vm289_vm0, %v4842_v30 }
  0xce   : > { %4044 = vmatmul.mubr.msk.bf16.gmra.mrb[12].mxu0 %vm289_vm0, %v4676_v48  ;;  %3887 = vmatprep.mubr.msk.bf16.mxu1 %vm289_vm0, %v4778_v45 }
  0xcf   : > { %4047 = vmatprep.mubr.msk.bf16.mxu0 %vm289_vm0, %v4680_v50 }
  0xd5   : > { %3888 = vmatmul.mubr.msk.bf16.vlgmr.msra.gmra.mrb[0].mxu1 %vm289_vm0, %v4782_v47  ;;  %v5127_v47 = vld [vmem:[%s5241_s2] ss:$0 sm:$0xff] }
  0xd6   : > { %4048 = vmatmul.mubr.msk.bf16.gmra.mrb[16].mxu0 %vm289_vm0, %v4708_v62  ;;  %4101 = vmatpush3.bf16.msra.mxu1 %v4556_v1  ;;  %v3497_v1 = vld [vmem:[%s4581_s29 + $0x181] sm:$0xff] }
  0xd7   : > { %3891 = vmatprep.mubr.msk.bf16.mxu1 %vm289_vm0, %v4811_v5  ;;  %4051 = vmatprep.mubr.msk.bf16.mxu0 %vm289_vm0, %v4712_v0  ;;  %v2298_v17 = vpack.c.bf16 %v3498_v14, %v3497_v1 }
  0xd8   : > { %4100 = vmatprep.subr.bf16.mxu1 %v4567_v3 }
  0xda   : > { %4102 = vmatpush3.bf16.msra.mxu1 %v4567_v3  ;;  %v3499_v3 = vld [vmem:[%s4581_s29 + $0x199] sm:$0xff] }
  0xdb   : > { %v2299_v26 = vpack.c.bf16 %v3500_v24, %v3499_v3 }
  0xdd   : > { %3892 = vmatmul.mubr.msk.bf16.gmra.mrb[4].mxu1 %vm289_vm0, %v4815_v7 }
  0xde   : > { %4052 = vmatmul.mubr.msk.bf16.gmra.mrb[20].mxu0 %vm289_vm0, %v4733_v12  ;;  %3895 = vmatprep.mubr.msk.bf16.mxu1 %vm289_vm0, %v4836_v23 }
  0xdf   : > { %4055 = vmatprep.mubr.msk.bf16.mxu0 %vm289_vm0, %v4737_v15 }
  0xe5   : > { %3896 = vmatmul.mubr.msk.bf16.gmra.mrb[8].mxu1 %vm289_vm0, %v4840_v27 }
  0xe6   : > { %4056 = vmatmul.mubr.msk.bf16.gmra.mrb[24].mxu0 %vm289_vm0, %v4757_v28  ;;  %3899 = vmatprep.mubr.msk.bf16.mxu1 %vm289_vm0, %v4858_v43 }
  0xe7   : > { %4059 = vmatprep.mubr.msk.bf16.mxu0 %vm289_vm0, %v2298_v17 }
  0xed   : > { %3900 = vmatmul.mubr.msk.bf16.gmra.mrb[12].mxu1 %vm289_vm0, %v4862_v53 }
  0xee   : > { %4060 = vmatmul.mubr.msk.bf16.gmra.mrb[28].mxu0 %vm289_vm0, %v2299_v26  ;;  %3903 = vmatprep.mubr.msk.bf16.mxu1 %vm289_vm0, %v4876_v58 }
  0xef   : > { %4067 = vmatprep.mubr.msk.bf16.mxu0 %vm289_vm0, %v4678_v49 }
  0xf5   : > { %3904 = vmatmul.mubr.msk.bf16.gmra.mrb[16].mxu1 %vm289_vm0, %v4878_v59 }
  0xf6   : > { %4068 = vmatmul.mubr.msk.bf16.vlgmr.msra.gmra.mrb[0].mxu0 %vm289_vm0, %v4682_v51  ;;  %3907 = vmatprep.mubr.msk.bf16.mxu1 %vm289_vm0, %v4899_v19 }
  0xf7   : > { %4071 = vmatprep.mubr.msk.bf16.mxu0 %vm289_vm0, %v4710_v63 }
  0xfd   : > { %3908 = vmatmul.mubr.msk.bf16.gmra.mrb[20].mxu1 %vm289_vm0, %v4901_v20 }
  0xfe   : > { %4072 = vmatmul.mubr.msk.bf16.gmra.mrb[4].mxu0 %vm289_vm0, %v4714_v2  ;;  %3911 = vmatprep.mubr.msk.bf16.mxu1 %vm289_vm0, %v4915_v36 }
  0xff   : > { %4075 = vmatprep.mubr.msk.bf16.mxu0 %vm289_vm0, %v4735_v13 }
 0x105   : > { %3912 = vmatmul.mubr.msk.bf16.gmra.mrb[24].mxu1 %vm289_vm0, %v4917_v37 }
 0x106   : > { %4076 = vmatmul.mubr.msk.bf16.gmra.mrb[8].mxu0 %vm289_vm0, %v4739_v16  ;;  %3915 = vmatprep.mubr.msk.bf16.mxu1 %vm289_vm0, %v4931_v55 }
 0x107   : > { %4079 = vmatprep.mubr.msk.bf16.mxu0 %vm289_vm0, %v4759_v29 }
 0x10d   : > { %3916 = vmatmul.mubr.msk.bf16.gmra.mrb[28].mxu1 %vm289_vm0, %v4963_v33 }
 0x10e   : > { %4080 = vmatmul.mubr.msk.bf16.gmra.mrb[12].mxu0 %vm289_vm0, %v4761_v34  ;;  %3939 = vmatprep.mubr.msk.bf16.mxu1 %vm289_vm0, %v4676_v48 }
 0x10f   : > { %4083 = vmatprep.mubr.msk.bf16.mxu0 %vm289_vm0, %v4780_v46 }
 0x115   : > { %3940 = vmatmul.mubr.msk.bf16.vlgmr.msra.gmra.mrb[16].mxu1 %vm289_vm0, %v4680_v50 }
 0x116   : > { %4084 = vmatmul.mubr.msk.bf16.gmra.mrb[16].mxu0 %vm289_vm0, %v4784_v52  ;;  %3943 = vmatprep.mubr.msk.bf16.mxu1 %vm289_vm0, %v4708_v62 }
 0x117   : > { %4087 = vmatprep.mubr.msk.bf16.mxu0 %vm289_vm0, %v4813_v6 }
 0x11d   : > { %3944 = vmatmul.mubr.msk.bf16.gmra.mrb[20].mxu1 %vm289_vm0, %v4712_v0 }
 0x11e   : > { %4088 = vmatmul.mubr.msk.bf16.gmra.mrb[20].mxu0 %vm289_vm0, %v4817_v8  ;;  %3947 = vmatprep.mubr.msk.bf16.mxu1 %vm289_vm0, %v4733_v12 }
 0x11f   : > { %4091 = vmatprep.mubr.msk.bf16.mxu0 %vm289_vm0, %v4838_v25 }
 0x125   : > { %3948 = vmatmul.mubr.msk.bf16.gmra.mrb[24].mxu1 %vm289_vm0, %v4737_v15 }
 0x126   : > { %4092 = vmatmul.mubr.msk.bf16.gmra.mrb[24].mxu0 %vm289_vm0, %v4842_v30  ;;  %3951 = vmatprep.mubr.msk.bf16.mxu1 %vm289_vm0, %v4757_v28 }
 0x127   : > { %4095 = vmatprep.mubr.msk.bf16.mxu0 %vm289_vm0, %v4860_v44 }
 0x12d   : > { %3952 = vmatmul.mubr.msk.bf16.gmra.mrb[28].mxu1 %vm289_vm0, %v2298_v17 }
 0x12e   : > { %4096 = vmatmul.mubr.msk.bf16.gmra.mrb[28].mxu0 %vm289_vm0, %v2605_v38 }
 0x1a8   : > { %v3889_v48 = vpop.f32.mrb[0].mxu1 }
 0x1a9   : > { %v1174_v49 = vpop.f32.mrb[1].mxu1 }
 0x1aa   : > { %v3890_v50 = vpop.f32.mrb[2].mxu1 }
 0x1ab   : > { %v1177_v51 = vpop.f32.mrb[3].mxu1 }
 0x1b0   : > { %v3893_v62 = vpop.f32.mrb[4].mxu1 }
 0x1b1   : > { %v1190_v63 = vpop.f32.mrb[5].mxu1 }
 0x1b2   : > { %v3894_v0 = vpop.f32.mrb[6].mxu1 }
 0x1b3   : > { %v1193_v2 = vpop.f32.mrb[7].mxu1 }
 0x1b8   : > { %v3897_v12 = vpop.f32.mrb[8].mxu1 }
 0x1b9   : > { %v1206_v13 = vpop.f32.mrb[9].mxu1 }
 0x1ba   : > { %v3898_v15 = vpop.f32.mrb[10].mxu1 }
 0x1bb   : > { %v5114_v16 = vpop.f32.mrb[11].mxu1 }
 0x1c0   : > { %v5116_v28 = vpop.f32.mrb[12].mxu1 }
 0x1c1   : > { %v5118_v29 = vpop.f32.mrb[13].mxu1 }
 0x1c2   : > { %v5120_v34 = vpop.f32.mrb[14].mxu1 }
 0x1c3   : > { %v5122_v45 = vpop.f32.mrb[15].mxu1 }
 0x1c9   : > { %v4069_v46 = vpop.f32.mrb[0].mxu0 }
 0x1ca   : > { %v4103_v52 = vadd.f32 %v4069_v46, %v3889_v48  ;;  %v2705_v5 = vpop.f32.mrb[1].mxu0 }
 0x1cb   : > { %v4104_v6 = vadd.f32 %v2705_v5, %v1174_v49  ;;  %v4070_v7 = vpop.f32.mrb[2].mxu0 }
 0x1cc   : > { %v2873_v8 = vadd.f32 %v4103_v52, %v5127_v47  ;;  %v4105_v23 = vadd.f32 %v4070_v7, %v3890_v50  ;;  %v2708_v25 = vpop.f32.mrb[3].mxu0 }
 0x1cd   : > { %v2871_v27 = vadd.f32 %v4104_v6, %v5127_v47  ;;  %v4106_v30 = vadd.f32 %v2708_v25, %v1177_v51 }
 0x1ce   : > { %v3580_v43 = vmul.f32 -1.442695, %v2873_v8  ;;  %v2874_v44 = vadd.f32 %v4105_v23, %v5127_v47 }
 0x1cf   : > { %v3578_v53 = vmul.f32 -1.442695, %v2871_v27  ;;  %v2872_v58 = vadd.f32 %v4106_v30, %v5127_v47 }
 0x1d0   : > { %4386 = vpow2.f32 %v3580_v43  ;;  %v3581_v59 = vmul.f32 -1.442695, %v2874_v44 }
 0x1d1   : > { %4388 = vpow2.f32 %v3578_v53  ;;  %v3579_v18 = vmul.f32 -1.442695, %v2872_v58  ;;  %v4073_v19 = vpop.f32.mrb[4].mxu0 }
 0x1d2   : > { %4390 = vpow2.f32 %v3581_v59  ;;  %v4107_v20 = vadd.f32 %v4073_v19, %v3893_v62  ;;  %v2721_v61 = vpop.f32.mrb[5].mxu0 }
 0x1d3   : > { %4392 = vpow2.f32 %v3579_v18  ;;  %v4108_v21 = vadd.f32 %v2721_v61, %v1190_v63  ;;  %v4074_v22 = vpop.f32.mrb[6].mxu0 }
 0x1d4   : > { %v2877_v35 = vadd.f32 %v4107_v20, %v5127_v47  ;;  %v4109_v36 = vadd.f32 %v4074_v22, %v3894_v0  ;;  %v2724_v37 = vpop.f32.mrb[7].mxu0 }
 0x1d5   : > { %v2875_v40 = vadd.f32 %v4108_v21, %v5127_v47  ;;  %v4110_v41 = vadd.f32 %v2724_v37, %v1193_v2 }
 0x1d6   : > { %v3584_v42 = vmul.f32 -1.442695, %v2877_v35  ;;  %v2878_v54 = vadd.f32 %v4109_v36, %v5127_v47 }
 0x1d7   : > { %v3582_v55 = vmul.f32 -1.442695, %v2875_v40  ;;  %v2876_v56 = vadd.f32 %v4110_v41, %v5127_v47 }
 0x1d8   : > { %4394 = vpow2.f32 %v3584_v42  ;;  %v3585_v57 = vmul.f32 -1.442695, %v2878_v54 }
 0x1d9   : > { %4396 = vpow2.f32 %v3582_v55  ;;  %v3583_v39 = vmul.f32 -1.442695, %v2876_v56  ;;  %v4077_v60 = vpop.f32.mrb[8].mxu0 }
 0x1da   : > { %v4387_v33 = vpop.eup %4386  ;;  %4398 = vpow2.f32 %v3585_v57  ;;  %v4111_v4 = vadd.f32 %v4077_v60, %v3897_v12  ;;  %v2737_v9 = vpop.f32.mrb[9].mxu0 }
 0x1db   : > { %v4389_v10 = vpop.eup %4388  ;;  %v3001_v11 = vadd.f32 1.0, %v4387_v33  ;;  %4400 = vpow2.f32 %v3583_v39  ;;  %v4112_v1 = vadd.f32 %v2737_v9, %v1206_v13  ;;  %v4078_v14 = vpop.f32.mrb[10].mxu0 }
 0x1dc   : > { %v4391_v17 = vpop.eup %4390  ;;  %v2999_v3 = vadd.f32 1.0, %v4389_v10  ;;  %v2881_v24 = vadd.f32 %v4111_v4, %v5127_v47  ;;  %v4113_v26 = vadd.f32 %v4078_v14, %v3898_v15  ;;  %v2740_v31 = vpop.f32.mrb[11].mxu0 }
 0x1dd   : > { %v4393_v32 = vpop.eup %4392  ;;  %4402 = vrcp.f32 %v3001_v11  ;;  %v3002_v38 = vadd.f32 1.0, %v4391_v17  ;;  %v2879_v48 = vadd.f32 %v4112_v1, %v5127_v47  ;;  %v4114_v49 = vadd.f32 %v2740_v31, %v5114_v16 }
 0x1de   : > { %4404 = vrcp.f32 %v2999_v3  ;;  %v3000_v50 = vadd.f32 1.0, %v4393_v32  ;;  %v3588_v51 = vmul.f32 -1.442695, %v2881_v24  ;;  %v2882_v62 = vadd.f32 %v4113_v26, %v5127_v47 }
 0x1df   : > { %4406 = vrcp.f32 %v3002_v38  ;;  %v3586_v63 = vmul.f32 -1.442695, %v2879_v48  ;;  %v2880_v0 = vadd.f32 %v4114_v49, %v5127_v47 }
 0x1e0   : > { %4408 = vrcp.f32 %v3000_v50  ;;  %v3589_v2 = vmul.f32 -1.442695, %v2882_v62 }
 0x1e1   : > { %4410 = vpow2.f32 %v3588_v51  ;;  %v3587_v12 = vmul.f32 -1.442695, %v2880_v0  ;;  %v4081_v13 = vpop.f32.mrb[12].mxu0 }
 0x1e2   : > { %v4395_v15 = vpop.eup %4394  ;;  %4412 = vpow2.f32 %v3586_v63  ;;  %v4115_v46 = vadd.f32 %v4081_v13, %v5116_v28  ;;  %v2753_v16 = vpop.f32.mrb[13].mxu0 }
 0x1e3   : > { %v4397_v52 = vpop.eup %4396  ;;  %v3005_v5 = vadd.f32 1.0, %v4395_v15  ;;  %4414 = vpow2.f32 %v3589_v2  ;;  %v4116_v6 = vadd.f32 %v2753_v16, %v5118_v29  ;;  %v4082_v7 = vpop.f32.mrb[14].mxu0 }
 0x1e4   : > { %v4399_v8 = vpop.eup %4398  ;;  %v3003_v23 = vadd.f32 1.0, %v4397_v52  ;;  %4416 = vpow2.f32 %v3587_v12  ;;  %v2885_v25 = vadd.f32 %v4115_v46, %v5127_v47  ;;  %v4117_v27 = vadd.f32 %v4082_v7, %v5120_v34  ;;  %v2756_v30 = vpop.f32.mrb[15].mxu0 }
 0x1e5   : > { %v4401_v43 = vpop.eup %4400  ;;  %4418 = vrcp.f32 %v3005_v5  ;;  %v3006_v28 = vadd.f32 1.0, %v4399_v8  ;;  %v2883_v29 = vadd.f32 %v4116_v6, %v5127_v47  ;;  %v4118_v44 = vadd.f32 %v2756_v30, %v5122_v45 }
 0x1e6   : > { %4420 = vrcp.f32 %v3003_v23  ;;  %v3004_v53 = vadd.f32 1.0, %v4401_v43  ;;  %v3592_v58 = vmul.f32 -1.442695, %v2885_v25  ;;  %v2886_v34 = vadd.f32 %v4117_v27, %v5127_v47 }
 0x1e7   : > { %v4403_v59 = vpop.eup %4402  ;;  %4422 = vrcp.f32 %v3006_v28  ;;  %v3590_v18 = vmul.f32 -1.442695, %v2883_v29  ;;  %v2884_v19 = vadd.f32 %v4118_v44, %v5127_v47 }
 0x1e8   : > { %v4405_v20 = vpop.eup %4404  ;;  %3098 = vst.msk [vmem:[%s5150_s6 + $0x10] sm:$0xff] %vm3095_vm1, %v4403_v59  ;;  %4424 = vrcp.f32 %v3004_v53  ;;  %v3593_v61 = vmul.f32 -1.442695, %v2886_v34  ;;  %v3941_v21 = vpop.f32.mrb[16].mxu1 }
 0x1e9   : > { %v4407_v22 = vpop.eup %4406  ;;  %3096 = vst.msk [vmem:[%s5150_s6] sm:$0xff] %vm3095_vm1, %v4405_v20  ;;  %4426 = vpow2.f32 %v3592_v58  ;;  %v3591_v45 = vmul.f32 -1.442695, %v2884_v19  ;;  %v4085_v35 = vpop.f32.mrb[16].mxu0 }
 0x1ea   : > { %v1544_v36 = vpop.f32.mrb[17].mxu1  ;;  %v4409_v37 = vpop.eup %4408  ;;  %3099 = vst.msk [vmem:[%s5150_s6 + $0x18] sm:$0xff] %vm3095_vm1, %v4407_v22  ;;  %4428 = vpow2.f32 %v3590_v18  ;;  %v4119_v40 = vadd.f32 %v4085_v35, %v3941_v21 }
 0x1eb   : > { %v2769_v41 = vpop.f32.mrb[17].mxu0  ;;  %v3942_v42 = vpop.f32.mrb[18].mxu1  ;;  %3097 = vst.msk [vmem:[%s5150_s6 + $0x8] sm:$0xff] %vm3095_vm1, %v4409_v37  ;;  %4430 = vpow2.f32 %v3593_v61 }
 0x1ec   : > { %v4411_v54 = vpop.eup %4410  ;;  %v4120_v55 = vadd.f32 %v2769_v41, %v1544_v36  ;;  %v4086_v56 = vpop.f32.mrb[18].mxu0  ;;  %4432 = vpow2.f32 %v3591_v45  ;;  %v2889_v33 = vadd.f32 %v4119_v40, %v5127_v47 }
 0x1ed   : > { %v1547_v57 = vpop.f32.mrb[19].mxu1  ;;  %v4413_v39 = vpop.eup %4412  ;;  %v3009_v60 = vadd.f32 1.0, %v4411_v54  ;;  %v4121_v4 = vadd.f32 %v4086_v56, %v3942_v42 }
 0x1ee   : > { %v2772_v9 = vpop.f32.mrb[19].mxu0  ;;  %v4415_v10 = vpop.eup %4414  ;;  %v3007_v11 = vadd.f32 1.0, %v4413_v39  ;;  %v2887_v1 = vadd.f32 %v4120_v55, %v5127_v47  ;;  %v3596_v24 = vmul.f32 -1.442695, %v2889_v33 }
 0x1ef   : > { %v4122_v14 = vadd.f32 %v2772_v9, %v1547_v57  ;;  %v4417_v17 = vpop.eup %4416  ;;  %4434 = vrcp.f32 %v3009_v60  ;;  %v3010_v3 = vadd.f32 1.0, %v4415_v10  ;;  %v2890_v26 = vadd.f32 %v4121_v4, %v5127_v47 }
 0x1f0   : > { %v4419_v31 = vpop.eup %4418  ;;  %4436 = vrcp.f32 %v3007_v11  ;;  %v3008_v32 = vadd.f32 1.0, %v4417_v17  ;;  %v3594_v38 = vmul.f32 -1.442695, %v2887_v1  ;;  %v3945_v51 = vpop.f32.mrb[20].mxu1 }
 0x1f1   : > { %v2888_v48 = vadd.f32 %v4122_v14, %v5127_v47  ;;  %v4421_v49 = vpop.eup %4420  ;;  %3102 = vst.msk [vmem:[%s5150_s6 + $0x30] sm:$0xff] %vm3095_vm1, %v4419_v31  ;;  %4438 = vrcp.f32 %v3010_v3  ;;  %v3597_v50 = vmul.f32 -1.442695, %v2890_v26  ;;  %v4089_v0 = vpop.f32.mrb[20].mxu0 }
 0x1f2   : > { %v4423_v62 = vpop.eup %4422  ;;  %3100 = vst.msk [vmem:[%s5150_s6 + $0x20] sm:$0xff] %vm3095_vm1, %v4421_v49  ;;  %4440 = vrcp.f32 %v3008_v32  ;;  %v1560_v2 = vpop.f32.mrb[21].mxu1  ;;  %v4123_v13 = vadd.f32 %v4089_v0, %v3945_v51 }
 0x1f3   : > { %v3595_v63 = vmul.f32 -1.442695, %v2888_v48  ;;  %v4425_v12 = vpop.eup %4424  ;;  %3103 = vst.msk [vmem:[%s5150_s6 + $0x38] sm:$0xff] %vm3095_vm1, %v4423_v62  ;;  %4442 = vpow2.f32 %v3596_v24  ;;  %v2785_v15 = vpop.f32.mrb[21].mxu0 }
 0x1f4   : > { %v3946_v46 = vpop.f32.mrb[22].mxu1  ;;  %v4427_v16 = vpop.eup %4426  ;;  %3101 = vst.msk [vmem:[%s5150_s6 + $0x28] sm:$0xff] %vm3095_vm1, %v4425_v12  ;;  %4444 = vpow2.f32 %v3594_v38  ;;  %v4124_v52 = vadd.f32 %v2785_v15, %v1560_v2  ;;  %v2893_v23 = vadd.f32 %v4123_v13, %v5127_v47 }
 0x1f5   : > { %v4090_v5 = vpop.f32.mrb[22].mxu0  ;;  %v1563_v6 = vpop.f32.mrb[23].mxu1  ;;  %v3013_v8 = vadd.f32 1.0, %v4427_v16  ;;  %4446 = vpow2.f32 %v3597_v50 }
 0x1f6   : > { %v4429_v7 = vpop.eup %4428  ;;  %v4125_v25 = vadd.f32 %v4090_v5, %v3946_v46  ;;  %v2788_v27 = vpop.f32.mrb[23].mxu0  ;;  %4448 = vpow2.f32 %v3595_v63  ;;  %v2891_v28 = vadd.f32 %v4124_v52, %v5127_v47  ;;  %v3600_v58 = vmul.f32 -1.442695, %v2893_v23 }
 0x1f7   : > { %v4431_v30 = vpop.eup %4430  ;;  %v3011_v43 = vadd.f32 1.0, %v4429_v7  ;;  %v4126_v29 = vadd.f32 %v2788_v27, %v1563_v6  ;;  %4450 = vrcp.f32 %v3013_v8 }
 0x1f8   : > { %v4433_v44 = vpop.eup %4432  ;;  %v3014_v53 = vadd.f32 1.0, %v4431_v30  ;;  %v2894_v34 = vadd.f32 %v4125_v25, %v5127_v47  ;;  %v3598_v18 = vmul.f32 -1.442695, %v2891_v28  ;;  %v3949_v21 = vpop.f32.mrb[24].mxu1 }
 0x1f9   : > { %4452 = vrcp.f32 %v3011_v43  ;;  %v3012_v59 = vadd.f32 1.0, %v4433_v44  ;;  %v2892_v19 = vadd.f32 %v4126_v29, %v5127_v47  ;;  %v4435_v20 = vpop.eup %4434  ;;  %v4093_v35 = vpop.f32.mrb[24].mxu0 }
 0x1fa   : > { %4454 = vrcp.f32 %v3014_v53  ;;  %v3601_v61 = vmul.f32 -1.442695, %v2894_v34  ;;  %v4437_v22 = vpop.eup %4436  ;;  %3106 = vst.msk [vmem:[%s5150_s6 + $0x50] sm:$0xff] %vm3095_vm1, %v4435_v20  ;;  %v1576_v36 = vpop.f32.mrb[25].mxu1  ;;  %v4127_v40 = vadd.f32 %v4093_v35, %v3949_v21 }
 0x1fb   : > { %4456 = vrcp.f32 %v3012_v59  ;;  %v3599_v45 = vmul.f32 -1.442695, %v2892_v19  ;;  %v4439_v37 = vpop.eup %4438  ;;  %3104 = vst.msk [vmem:[%s5150_s6 + $0x40] sm:$0xff] %vm3095_vm1, %v4437_v22  ;;  %v2801_v41 = vpop.f32.mrb[25].mxu0 }
 0x1fc   : > { %4458 = vpow2.f32 %v3600_v58  ;;  %v3950_v42 = vpop.f32.mrb[26].mxu1  ;;  %v4441_v54 = vpop.eup %4440  ;;  %3107 = vst.msk [vmem:[%s5150_s6 + $0x58] sm:$0xff] %vm3095_vm1, %v4439_v37  ;;  %v4128_v55 = vadd.f32 %v2801_v41, %v1576_v36  ;;  %v2897_v60 = vadd.f32 %v4127_v40, %v5127_v47 }
 0x1fd   : > { %4460 = vpow2.f32 %v3598_v18  ;;  %v4094_v56 = vpop.f32.mrb[26].mxu0  ;;  %v1579_v57 = vpop.f32.mrb[27].mxu1  ;;  %3105 = vst.msk [vmem:[%s5150_s6 + $0x48] sm:$0xff] %vm3095_vm1, %v4441_v54 }
 0x1fe   : > { %v4443_v39 = vpop.eup %4442  ;;  %4462 = vpow2.f32 %v3601_v61  ;;  %v4129_v33 = vadd.f32 %v4094_v56, %v3950_v42  ;;  %v2804_v4 = vpop.f32.mrb[27].mxu0  ;;  %v2895_v11 = vadd.f32 %v4128_v55, %v5127_v47  ;;  %v3604_v31 = vmul.f32 -1.442695, %v2897_v60 }
 0x1ff   : > { %v4445_v9 = vpop.eup %4444  ;;  %v3017_v10 = vadd.f32 1.0, %v4443_v39  ;;  %4464 = vpow2.f32 %v3599_v45  ;;  %v4130_v1 = vadd.f32 %v2804_v4, %v1579_v57 }
 0x200   : > { %v4447_v14 = vpop.eup %4446  ;;  %v3015_v17 = vadd.f32 1.0, %v4445_v9  ;;  %v2898_v3 = vadd.f32 %v4129_v33, %v5127_v47  ;;  %v3602_v49 = vmul.f32 -1.442695, %v2895_v11  ;;  %v3953_v50 = vpop.f32.mrb[28].mxu1 }
 0x201   : > { %v4449_v24 = vpop.eup %4448  ;;  %4466 = vrcp.f32 %v3017_v10  ;;  %v3018_v26 = vadd.f32 1.0, %v4447_v14  ;;  %v2896_v32 = vadd.f32 %v4130_v1, %v5127_v47  ;;  %v4097_v63 = vpop.f32.mrb[28].mxu0 }
 0x202   : > { %v4451_v38 = vpop.eup %4450  ;;  %4468 = vrcp.f32 %v3015_v17  ;;  %v3016_v48 = vadd.f32 1.0, %v4449_v24  ;;  %v3605_v62 = vmul.f32 -1.442695, %v2898_v3  ;;  %v1592_v0 = vpop.f32.mrb[29].mxu1  ;;  %v4131_v13 = vadd.f32 %v4097_v63, %v3953_v50 }
 0x203   : > { %v4453_v51 = vpop.eup %4452  ;;  %3110 = vst.msk [vmem:[%s5150_s6 + $0x70] sm:$0xff] %vm3095_vm1, %v4451_v38  ;;  %4470 = vrcp.f32 %v3018_v26  ;;  %v3603_v12 = vmul.f32 -1.442695, %v2896_v32  ;;  %v2817_v15 = vpop.f32.mrb[29].mxu0 }
 0x204   : > { %v4455_v2 = vpop.eup %4454  ;;  %3108 = vst.msk [vmem:[%s5150_s6 + $0x60] sm:$0xff] %vm3095_vm1, %v4453_v51  ;;  %4472 = vrcp.f32 %v3016_v48  ;;  %v3954_v46 = vpop.f32.mrb[30].mxu1  ;;  %v4132_v52 = vadd.f32 %v2817_v15, %v1592_v0  ;;  %v2901_v8 = vadd.f32 %v4131_v13, %v5127_v47 }
 0x205   : > { %v4457_v16 = vpop.eup %4456  ;;  %3111 = vst.msk [vmem:[%s5150_s6 + $0x78] sm:$0xff] %vm3095_vm1, %v4455_v2  ;;  %4474 = vpow2.f32 %v3604_v31  ;;  %v4098_v5 = vpop.f32.mrb[30].mxu0 }
 0x206   : > { %v1595_v6 = vpop.f32.mrb[31].mxu1  ;;  %v4459_v7 = vpop.eup %4458  ;;  %3109 = vst.msk [vmem:[%s5150_s6 + $0x68] sm:$0xff] %vm3095_vm1, %v4457_v16  ;;  %4476 = vpow2.f32 %v3602_v49  ;;  %v4133_v23 = vadd.f32 %v4098_v5, %v3954_v46  ;;  %v2899_v43 = vadd.f32 %v4132_v52, %v5127_v47  ;;  %v3608_v59 = vmul.f32 -1.442695, %v2901_v8 }
 0x207   : > { %v2820_v25 = vpop.f32.mrb[31].mxu0  ;;  %v4461_v27 = vpop.eup %4460  ;;  %v3021_v30 = vadd.f32 1.0, %v4459_v7  ;;  %4478 = vpow2.f32 %v3605_v62 }
 0x208   : > { %v4134_v28 = vadd.f32 %v2820_v25, %v1595_v6  ;;  %v4463_v29 = vpop.eup %4462  ;;  %v3019_v44 = vadd.f32 1.0, %v4461_v27  ;;  %4480 = vpow2.f32 %v3603_v12  ;;  %v2902_v53 = vadd.f32 %v4133_v23, %v5127_v47 }
 0x209   : > { %v4465_v58 = vpop.eup %4464  ;;  %4482 = vrcp.f32 %v3021_v30  ;;  %v3022_v34 = vadd.f32 1.0, %v4463_v29  ;;  %v3606_v20 = vmul.f32 -1.442695, %v2899_v43 }
 0x20a   : > { %v2900_v18 = vadd.f32 %v4134_v28, %v5127_v47  ;;  %4484 = vrcp.f32 %v3019_v44  ;;  %v3020_v19 = vadd.f32 1.0, %v4465_v58  ;;  %v3609_v21 = vmul.f32 -1.442695, %v2902_v53 }
 0x20b   : > { %v4467_v61 = vpop.eup %4466  ;;  %4486 = vrcp.f32 %v3022_v34 }
 0x20c   : > { %v4469_v22 = vpop.eup %4468  ;;  %3114 = vst.msk [vmem:[%s5150_s6 + $0x90] sm:$0xff] %vm3095_vm1, %v4467_v61  ;;  %4488 = vrcp.f32 %v3020_v19  ;;  %v3607_v45 = vmul.f32 -1.442695, %v2900_v18 }
 0x20d   : > { %v4471_v35 = vpop.eup %4470  ;;  %3112 = vst.msk [vmem:[%s5150_s6 + $0x80] sm:$0xff] %vm3095_vm1, %v4469_v22  ;;  %4490 = vpow2.f32 %v3608_v59 }
 0x20e   : > { %v4473_v36 = vpop.eup %4472  ;;  %3115 = vst.msk [vmem:[%s5150_s6 + $0x98] sm:$0xff] %vm3095_vm1, %v4471_v35  ;;  %4492 = vpow2.f32 %v3606_v20 }
 0x20f   : > { %v4475_v47 = vpop.eup %4474  ;;  %3113 = vst.msk [vmem:[%s5150_s6 + $0x88] sm:$0xff] %vm3095_vm1, %v4473_v36  ;;  %4494 = vpow2.f32 %v3609_v21 }
 0x210   : > { %v4477_v37 = vpop.eup %4476  ;;  %v3025_v40 = vadd.f32 1.0, %v4475_v47  ;;  %4496 = vpow2.f32 %v3607_v45 }
 0x211   : > { %v4479_v41 = vpop.eup %4478  ;;  %v3023_v42 = vadd.f32 1.0, %v4477_v37 }
 0x212   : > { %v4481_v54 = vpop.eup %4480  ;;  %4498 = vrcp.f32 %v3025_v40  ;;  %v3026_v55 = vadd.f32 1.0, %v4479_v41 }
 0x213   : > { %v4483_v56 = vpop.eup %4482  ;;  %4500 = vrcp.f32 %v3023_v42  ;;  %v3024_v57 = vadd.f32 1.0, %v4481_v54 }
 0x214   : > { %v4485_v39 = vpop.eup %4484  ;;  %3118 = vst.msk [vmem:[%s5150_s6 + $0xb0] sm:$0xff] %vm3095_vm1, %v4483_v56  ;;  %4502 = vrcp.f32 %v3026_v55 }
 0x215   : > { %v4487_v60 = vpop.eup %4486  ;;  %3116 = vst.msk [vmem:[%s5150_s6 + $0xa0] sm:$0xff] %vm3095_vm1, %v4485_v39  ;;  %4504 = vrcp.f32 %v3024_v57 }
 0x216   : > { %v4489_v33 = vpop.eup %4488  ;;  %3119 = vst.msk [vmem:[%s5150_s6 + $0xb8] sm:$0xff] %vm3095_vm1, %v4487_v60 }
 0x217   : > { %v4491_v4 = vpop.eup %4490  ;;  %3117 = vst.msk [vmem:[%s5150_s6 + $0xa8] sm:$0xff] %vm3095_vm1, %v4489_v33 }
 0x218   : > { %v4493_v9 = vpop.eup %4492  ;;  %v3029_v10 = vadd.f32 1.0, %v4491_v4 }
 0x219   : > { %v4495_v11 = vpop.eup %4494  ;;  %v3027_v1 = vadd.f32 1.0, %v4493_v9 }
 0x21a   : > { %v4497_v14 = vpop.eup %4496  ;;  %4506 = vrcp.f32 %v3029_v10  ;;  %v3030_v17 = vadd.f32 1.0, %v4495_v11 }
 0x21b   : > { %4508 = vrcp.f32 %v3027_v1  ;;  %v3028_v3 = vadd.f32 1.0, %v4497_v14 }
 0x21c   : > { %v4499_v24 = vpop.eup %4498  ;;  %4510 = vrcp.f32 %v3030_v17 }
 0x21d   : > { %v4501_v26 = vpop.eup %4500  ;;  %3122 = vst.msk [vmem:[%s5150_s6 + $0xd0] sm:$0xff] %vm3095_vm1, %v4499_v24  ;;  %4512 = vrcp.f32 %v3028_v3 }
 0x21e   : > { %v4503_v31 = vpop.eup %4502  ;;  %3120 = vst.msk [vmem:[%s5150_s6 + $0xc0] sm:$0xff] %vm3095_vm1, %v4501_v26 }
 0x21f   : > { %v4505_v32 = vpop.eup %4504  ;;  %3123 = vst.msk [vmem:[%s5150_s6 + $0xd8] sm:$0xff] %vm3095_vm1, %v4503_v31 }
 0x220   : > { %3121 = vst.msk [vmem:[%s5150_s6 + $0xc8] sm:$0xff] %vm3095_vm1, %v4505_v32 }
 0x224   : > { %v4507_v38 = vpop.eup %4506 }
 0x225   : > { %v4509_v48 = vpop.eup %4508  ;;  %3126 = vst.msk [vmem:[%s5150_s6 + $0xf0] sm:$0xff] %vm3095_vm1, %v4507_v38 }
 0x226   : > { %v4511_v49 = vpop.eup %4510  ;;  %3124 = vst.msk [vmem:[%s5150_s6 + $0xe0] sm:$0xff] %vm3095_vm1, %v4509_v48 }
 0x227   : > { %v4513_v50 = vpop.eup %4512  ;;  %3127 = vst.msk [vmem:[%s5150_s6 + $0xf8] sm:$0xff] %vm3095_vm1, %v4511_v49 }
 0x228   : > { %3125 = vst.msk [vmem:[%s5150_s6 + $0xe8] sm:$0xff] %vm3095_vm1, %v4513_v50 }
 0x229 PF: > { %s13_s12 = sadd.s32 1, %s4520_s12  }
 0x22a   : > { %p10_p4 = scmp.ge.s32.totalorder %s13_s12, 4  }
 0x22c   :  { %12 = sbr.rel (!%p10_p4) target bundleno = 1 (0x1), region = 72 }

</bundles_post_ra>
